<compile_context>
chip_gen: v5e
topology: v5e:2x2
jax: 0.10.0
libtpu: 0.0.40
codegen_flags: <defaults>
</compile_context>

<pallas_src>
import functools

import jax
import jax.numpy as jnp
from jax.experimental import pallas as pl
from jax.experimental.pallas import tpu as pltpu


# ----------------------------- fused Pallas kernel -----------------------------

def _bottleneck_kernel(x_ref, w1_ref, b1_ref, w2_ref, b2_ref, w3_ref, b3_ref,
                       o_ref, pad_ref, *, H, W):
    """relu(bn3(conv3(relu(bn2(conv2(relu(bn1(conv1(x)))))))) + x) for one image.

    x_ref  : (HW, Cp)        bf16, channels zero-padded to a lane-dense width
    w*_ref : bf16 conv weights with BN scale folded in; b*_ref: f32 BN shifts
    pad_ref: (HW + 2W, 3*Pp) bf16 VMEM scratch staging the 3x3 taps
    """
    HW = H * W
    Pp = b1_ref.shape[-1]
    f32, bf16 = jnp.float32, jnp.bfloat16

    # ---- conv1 (1x1) + folded bn1 + relu --------------------------------------
    y1 = jnp.dot(x_ref[...], w1_ref[...], preferred_element_type=f32)
    y1 = jnp.maximum(y1 + b1_ref[...], 0.0)                      # (HW, Pp) f32

    # ---- stage the three kw-variants of y1 into the zero-padded scratch -------
    # Flattened row r = h*W + w.  Tap (kh, kw) of the 3x3 needs
    # y1_flat[r + (kh-1)*W + (kw-1)], zeroed outside the image (padding=1).
    # Scratch layout (rows [0,W) and [W+HW, 2W+HW) stay zero = top/bottom border):
    #   band 0 (kw=0): y1 masked at the last image column,  rolled +1 row
    #   band 1 (kw=1): y1 unmasked, unshifted
    #   band 2 (kw=2): y1 masked at the first image column, rolled -1 row
    # The masks guarantee each roll's wrap-around element is zero, so a full-width
    # row slice at offset W + (kh-1)*W yields all three kw taps of that kh already
    # shifted & masked -> one K = 3*Pp matmul per kh.
    qcol = jax.lax.broadcasted_iota(jnp.int32, (HW, 1), 0) % W   # source column w
    zero = jnp.zeros_like(y1)
    y1_m = jnp.roll(jnp.where(qcol != W - 1, y1, zero), 1, axis=0)   # kw = 0 band
    y1_p = jnp.roll(jnp.where(qcol != 0, y1, zero), -1, axis=0)      # kw = 2 band

    pad_ref[0:W, :] = jnp.zeros((W, 3 * Pp), bf16)                   # top border
    pad_ref[W + HW:2 * W + HW, :] = jnp.zeros((W, 3 * Pp), bf16)     # bottom border
    pad_ref[W:W + HW, 0:Pp] = y1_m.astype(bf16)
    pad_ref[W:W + HW, Pp:2 * Pp] = y1.astype(bf16)
    pad_ref[W:W + HW, 2 * Pp:3 * Pp] = y1_p.astype(bf16)

    # ---- conv2 (3x3, padding=1, stride=1): 3 deep matmuls, one per kh ---------
    acc = jnp.dot(pad_ref[W:W + HW, :], w2_ref[1], preferred_element_type=f32)
    acc += jnp.dot(pad_ref[0:HW, :], w2_ref[0], preferred_element_type=f32)
    acc += jnp.dot(pad_ref[2 * W:2 * W + HW, :], w2_ref[2],
                   preferred_element_type=f32)
    y2 = jnp.maximum(acc + b2_ref[...], 0.0)                     # (HW, Pp) f32

    # ---- conv3 (1x1) + folded bn3 + identity residual + relu ------------------
    y3 = jnp.dot(y2.astype(bf16), w3_ref[...], preferred_element_type=f32)
    y3 = y3 + b3_ref[...] + x_ref[...].astype(f32)    # residual re-read from VMEM
    o_ref[...] = jnp.maximum(y3, 0.0).astype(o_ref.dtype)


# ------------------------------- glue (JAX) ------------------------------------

def _round_up(v, m):
    return (v + m - 1) // m * m


def _bn_fold(gamma, beta, mean, var, eps=1e-5):
    scale = gamma / jnp.sqrt(var + eps)
    shift = beta - mean * scale
    return scale, shift


@functools.lru_cache(maxsize=None)
def _vmem_limit_bytes():
    # Generation-aware VMEM limit: ~3/4 of physical, capped (v5e/v6e: 128 MiB phys,
    # v7x: 64 MiB phys).  Fall back to 64 MiB if the query is unavailable.
    try:
        cap = int(pltpu.get_tpu_info().vmem_capacity_bytes)
    except Exception:
        cap = 64 * 1024 * 1024
    return int(min(cap * 3 // 4, 96 * 1024 * 1024))


@functools.partial(jax.jit, static_argnames=("stride",))
def bottleneck_forward(x_nchw, params, stride=1):
    """Bottleneck(inplanes, planes, stride=1, downsample=None) forward, eval-mode BN."""
    assert stride == 1, "downsample=None requires stride == 1"
    N, Cin, H, W = x_nchw.shape
    planes = params["conv1_w"].shape[0]
    Cout = params["conv3_w"].shape[0]
    assert Cout == Cin, (
        "identity residual requires inplanes == planes * expansion "
        f"(got inplanes={Cin}, planes*expansion={Cout})")

    LANE = 128
    Cp = _round_up(Cin, LANE)      # padded in/out channel width (Cin == Cout)
    Pp = _round_up(planes, LANE)   # padded bottleneck width
    HW = H * W
    f32, bf16 = jnp.float32, jnp.bfloat16

    # NCHW -> (N, H*W, C) rows, zero-padded to a lane-dense channel width, bf16 in HBM.
    x_rows = jnp.transpose(x_nchw, (0, 2, 3, 1)).reshape(N, HW, Cin)
    x_rows = jnp.pad(x_rows, ((0, 0), (0, 0), (0, Cp - Cin))).astype(bf16)

    # conv1 (1x1): fold bn1 scale into the weight, keep the shift as a bias.
    s1, t1 = _bn_fold(params["bn1_g"], params["bn1_b"], params["bn1_m"], params["bn1_v"])
    w1 = params["conv1_w"][:, :, 0, 0].T * s1[None, :]                 # (Cin, planes)
    w1 = jnp.pad(w1, ((0, Cp - Cin), (0, Pp - planes))).astype(bf16)
    b1 = jnp.pad(t1, (0, Pp - planes)).reshape(1, Pp).astype(f32)

    # conv2 (3x3): bn2 folded; packed as (kh, 3*Pp, Pp) so that the K dimension is
    # [kw=0 | kw=1 | kw=2] channel bands, matching the scratch column layout.
    s2, t2 = _bn_fold(params["bn2_g"], params["bn2_b"], params["bn2_m"], params["bn2_v"])
    w2 = jnp.transpose(params["conv2_w"], (2, 3, 1, 0))                # (kh,kw,in,out)
    w2 = w2 * s2[None, None, None, :]
    w2 = jnp.pad(w2, ((0, 0), (0, 0), (0, Pp - planes), (0, Pp - planes)))
    w2 = w2.reshape(3, 3 * Pp, Pp).astype(bf16)
    b2 = jnp.pad(t2, (0, Pp - planes)).reshape(1, Pp).astype(f32)

    # conv3 (1x1): bn3 scale folded.
    s3, t3 = _bn_fold(params["bn3_g"], params["bn3_b"], params["bn3_m"], params["bn3_v"])
    w3 = params["conv3_w"][:, :, 0, 0].T * s3[None, :]                 # (planes, Cout)
    w3 = jnp.pad(w3, ((0, Pp - planes), (0, Cp - Cout))).astype(bf16)
    b3 = jnp.pad(t3, (0, Cp - Cout)).reshape(1, Cp).astype(f32)

    flops = 2 * N * HW * (Cp * Pp + 9 * Pp * Pp + Pp * Cp)
    bytes_accessed = (2 * N * HW * Cp * 2                      # x rows + output, bf16
                      + (w1.size + w2.size + w3.size) * 2
                      + (b1.size + b2.size + b3.size) * 4)

    kernel = functools.partial(_bottleneck_kernel, H=H, W=W)
    out = pl.pallas_call(
        kernel,
        out_shape=jax.ShapeDtypeStruct((N, HW, Cp), bf16),
        grid=(N,),
        in_specs=[
            pl.BlockSpec((None, HW, Cp), lambda n: (n, 0, 0)),   # x rows, per image
            pl.BlockSpec((Cp, Pp), lambda n: (0, 0)),            # w1 (bn1 folded)
            pl.BlockSpec((1, Pp), lambda n: (0, 0)),             # b1
            pl.BlockSpec((3, 3 * Pp, Pp), lambda n: (0, 0, 0)),  # w2 (bn2 folded)
            pl.BlockSpec((1, Pp), lambda n: (0, 0)),             # b2
            pl.BlockSpec((Pp, Cp), lambda n: (0, 0)),            # w3 (bn3 folded)
            pl.BlockSpec((1, Cp), lambda n: (0, 0)),             # b3
        ],
        out_specs=pl.BlockSpec((None, HW, Cp), lambda n: (n, 0, 0)),
        scratch_shapes=[pltpu.VMEM((HW + 2 * W, 3 * Pp), bf16)],  # 3x3 tap staging
        compiler_params=pltpu.CompilerParams(
            dimension_semantics=("parallel",),           # shard batch over TCs
            vmem_limit_bytes=_vmem_limit_bytes()),
        cost_estimate=pl.CostEstimate(flops=flops, transcendentals=0,
                                      bytes_accessed=bytes_accessed),
    )(x_rows, w1, b1, w2, b2, w3, b3)

    out = out[:, :, :Cout].reshape(N, H, W, Cout)
    return jnp.transpose(out, (0, 3, 1, 2)).astype(f32)   # back to NCHW, f32


# --------------------------- reference (pure JAX) -------------------------------

def _ref_bn(x, g, b, m, v, eps=1e-5):
    return (x - m[None, :, None, None]) / jnp.sqrt(v + eps)[None, :, None, None] \
        * g[None, :, None, None] + b[None, :, None, None]


def _ref_conv(x, w, stride, padding):
    return jax.lax.conv_general_dilated(
        x, w, window_strides=(stride, stride),
        padding=((padding, padding), (padding, padding)),
        dimension_numbers=("NCHW", "OIHW", "NCHW"))


def bottleneck_ref(x, p, stride=1):
    out = _ref_conv(x, p["conv1_w"], 1, 0)
    out = jnp.maximum(_ref_bn(out, p["bn1_g"], p["bn1_b"], p["bn1_m"], p["bn1_v"]), 0.0)
    out = _ref_conv(out, p["conv2_w"], stride, 1)
    out = jnp.maximum(_ref_bn(out, p["bn2_g"], p["bn2_b"], p["bn2_m"], p["bn2_v"]), 0.0)
    out = _ref_conv(out, p["conv3_w"], 1, 0)
    out = _ref_bn(out, p["bn3_g"], p["bn3_b"], p["bn3_m"], p["bn3_v"])
    return jnp.maximum(out + x, 0.0)


# ----------------------------------- main ---------------------------------------

if __name__ == "__main__":
    inplanes, planes, expansion = 16, 4, 4
    N, H, W = 2, 16, 16
    stride = 1

    key = jax.random.PRNGKey(0)
    ks = jax.random.split(key, 16)

    def normal(k, shape, scale=0.1):
        return (scale * jax.random.normal(k, shape)).astype(jnp.float32)

    params = {
        "conv1_w": normal(ks[0], (planes, inplanes, 1, 1)),
        "bn1_g": normal(ks[1], (planes,)) + 1.0,
        "bn1_b": normal(ks[2], (planes,)),
        "bn1_m": normal(ks[3], (planes,)),
        "bn1_v": jax.random.uniform(ks[4], (planes,), minval=0.5, maxval=1.5).astype(jnp.float32),
        "conv2_w": normal(ks[5], (planes, planes, 3, 3)),
        "bn2_g": normal(ks[6], (planes,)) + 1.0,
        "bn2_b": normal(ks[7], (planes,)),
        "bn2_m": normal(ks[8], (planes,)),
        "bn2_v": jax.random.uniform(ks[9], (planes,), minval=0.5, maxval=1.5).astype(jnp.float32),
        "conv3_w": normal(ks[10], (planes * expansion, planes, 1, 1)),
        "bn3_g": normal(ks[11], (planes * expansion,)) + 1.0,
        "bn3_b": normal(ks[12], (planes * expansion,)),
        "bn3_m": normal(ks[13], (planes * expansion,)),
        "bn3_v": jax.random.uniform(ks[14], (planes * expansion,), minval=0.5, maxval=1.5).astype(jnp.float32),
    }

    x = jax.random.normal(ks[15], (N, inplanes, H, W), dtype=jnp.float32)

    out = jax.block_until_ready(bottleneck_forward(x, params, stride=stride))
    ref = jax.block_until_ready(bottleneck_ref(x, params, stride=stride))

    assert out.shape == (N, planes * expansion, H, W), out.shape
    # bf16 HBM activations + bf16 MXU operands (f32 accumulate) -> loosened tolerance.
    assert jnp.allclose(out, ref, atol=3e-2, rtol=3e-2), float(jnp.abs(out - ref).max())

    print("KERNEL_OK")
</pallas_src>

<mosaic_0001>
module attributes {stable_mosaic.version = 11 : i64} {
  func.func @_bottleneck_kernel(%arg0: i32, %arg1: memref<1x256x128xbf16, #tpu.memory_space<vmem>>, %arg2: memref<128x128xbf16, #tpu.memory_space<vmem>>, %arg3: memref<1x128xf32, #tpu.memory_space<vmem>>, %arg4: memref<3x384x128xbf16, #tpu.memory_space<vmem>>, %arg5: memref<1x128xf32, #tpu.memory_space<vmem>>, %arg6: memref<128x128xbf16, #tpu.memory_space<vmem>>, %arg7: memref<1x128xf32, #tpu.memory_space<vmem>>, %arg8: memref<1x256x128xbf16, #tpu.memory_space<vmem>>, %arg9: memref<288x384xbf16, #tpu.memory_space<vmem>>) attributes {dimension_semantics = [#tpu.dimension_semantics<parallel>], iteration_bounds = array<i64: 2>, scalar_prefetch = 0 : i64, scratch_operands = 1 : i64, tpu.core_type = #tpu.core_type<tc>, window_params = [{transform_indices = @transform_0, window_bounds = array<i64: 1, 256, 128>}, {pipeline_mode = #tpu.pipeline_mode<synchronous>, transform_indices = @transform_1, window_bounds = array<i64: 128, 128>}, {pipeline_mode = #tpu.pipeline_mode<synchronous>, transform_indices = @transform_2, window_bounds = array<i64: 1, 128>}, {pipeline_mode = #tpu.pipeline_mode<synchronous>, transform_indices = @transform_3, window_bounds = array<i64: 3, 384, 128>}, {pipeline_mode = #tpu.pipeline_mode<synchronous>, transform_indices = @transform_4, window_bounds = array<i64: 1, 128>}, {pipeline_mode = #tpu.pipeline_mode<synchronous>, transform_indices = @transform_5, window_bounds = array<i64: 128, 128>}, {pipeline_mode = #tpu.pipeline_mode<synchronous>, transform_indices = @transform_6, window_bounds = array<i64: 1, 128>}, {transform_indices = @transform_7, window_bounds = array<i64: 1, 256, 128>}]} {
    %c0 = arith.constant 0 : index
    %c0_0 = arith.constant 0 : index
    %c0_1 = arith.constant 0 : index
    %0 = vector.load %arg1[%c0, %c0_0, %c0_1] : memref<1x256x128xbf16, #tpu.memory_space<vmem>>, vector<1x256x128xbf16>
    %1 = vector.shape_cast %0 : vector<1x256x128xbf16> to vector<256x128xbf16>
    %c0_2 = arith.constant 0 : index
    %c0_3 = arith.constant 0 : index
    %2 = vector.load %arg2[%c0_2, %c0_3] : memref<128x128xbf16, #tpu.memory_space<vmem>>, vector<128x128xbf16>
    %cst = arith.constant dense<0.000000e+00> : vector<256x128xf32>
    %3 = tpu.matmul %1, %2, %cst {dimension_numbers = #tpu.dot_dimension_numbers<[1], [0], [0], [1], [0, 0, 1, 1], [], []>} : vector<256x128xbf16>, vector<128x128xbf16>, vector<256x128xf32> -> vector<256x128xf32>
    %c0_4 = arith.constant 0 : index
    %c0_5 = arith.constant 0 : index
    %4 = vector.load %arg3[%c0_4, %c0_5] : memref<1x128xf32, #tpu.memory_space<vmem>>, vector<1x128xf32>
    %5 = vector.broadcast %4 : vector<1x128xf32> to vector<256x128xf32>
    %6 = arith.addf %3, %5 : vector<256x128xf32>
    %cst_6 = arith.constant 0.000000e+00 : f32
    %7 = vector.broadcast %cst_6 : f32 to vector<256x128xf32>
    %8 = arith.maximumf %6, %7 : vector<256x128xf32>
    %9 = tpu.iota {dimensions = array<i32: 0>} : vector<256x1xi32>
    %c16_i32 = arith.constant 16 : i32
    %c0_i32 = arith.constant 0 : i32
    %10 = arith.cmpi eq, %c16_i32, %c0_i32 : i32
    %c1_i32 = arith.constant 1 : i32
    %11 = arith.select %10, %c1_i32, %c16_i32 : i32
    %12 = vector.broadcast %11 : i32 to vector<256x1xi32>
    %13 = arith.remsi %9, %12 : vector<256x1xi32>
    %c0_i32_7 = arith.constant 0 : i32
    %14 = vector.broadcast %c0_i32_7 : i32 to vector<256x1xi32>
    %15 = arith.cmpi ne, %13, %14 : vector<256x1xi32>
    %c0_i32_8 = arith.constant 0 : i32
    %16 = vector.broadcast %c0_i32_8 : i32 to vector<256x1xi32>
    %17 = arith.cmpi slt, %13, %16 : vector<256x1xi32>
    %c0_i32_9 = arith.constant 0 : i32
    %18 = arith.cmpi slt, %11, %c0_i32_9 : i32
    %19 = vector.broadcast %18 : i1 to vector<256x1xi1>
    %20 = vector.broadcast %19 : vector<256x1xi1> to vector<256x1xi1>
    %21 = arith.xori %17, %20 : vector<256x1xi1>
    %22 = arith.andi %21, %15 : vector<256x1xi1>
    %23 = vector.broadcast %11 : i32 to vector<256x1xi32>
    %24 = arith.addi %13, %23 : vector<256x1xi32>
    %25 = arith.select %22, %24, %13 : vector<256x1xi1>, vector<256x1xi32>
    %cst_10 = arith.constant 0.000000e+00 : f32
    %26 = vector.broadcast %cst_10 : f32 to vector<256x128xf32>
    %c15_i32 = arith.constant 15 : i32
    %27 = vector.broadcast %c15_i32 : i32 to vector<256x1xi32>
    %28 = arith.cmpi ne, %25, %27 : vector<256x1xi32>
    %29 = vector.shape_cast %28 : vector<256x1xi1> to vector<256x1xi1>
    %30 = vector.broadcast %29 : vector<256x1xi1> to vector<256x128xi1>
    %31 = arith.select %30, %8, %26 : vector<256x128xi1>, vector<256x128xf32>
    %32 = vector.extract_strided_slice %31 {offsets = [255, 0], sizes = [1, 128], strides = [1, 1]} : vector<256x128xf32> to vector<1x128xf32>
    %33 = vector.extract_strided_slice %31 {offsets = [0, 0], sizes = [255, 128], strides = [1, 1]} : vector<256x128xf32> to vector<255x128xf32>
    %34 = tpu.concatenate %32, %33 in 0 : vector<1x128xf32>, vector<255x128xf32> -> vector<256x128xf32>
    %c0_i32_11 = arith.constant 0 : i32
    %35 = vector.broadcast %c0_i32_11 : i32 to vector<256x1xi32>
    %36 = arith.cmpi ne, %25, %35 : vector<256x1xi32>
    %37 = vector.shape_cast %36 : vector<256x1xi1> to vector<256x1xi1>
    %38 = vector.broadcast %37 : vector<256x1xi1> to vector<256x128xi1>
    %39 = arith.select %38, %8, %26 : vector<256x128xi1>, vector<256x128xf32>
    %40 = vector.extract_strided_slice %39 {offsets = [1, 0], sizes = [255, 128], strides = [1, 1]} : vector<256x128xf32> to vector<255x128xf32>
    %41 = vector.extract_strided_slice %39 {offsets = [0, 0], sizes = [1, 128], strides = [1, 1]} : vector<256x128xf32> to vector<1x128xf32>
    %42 = tpu.concatenate %40, %41 in 0 : vector<255x128xf32>, vector<1x128xf32> -> vector<256x128xf32>
    %cst_12 = arith.constant 0.000000e+00 : bf16
    %43 = vector.broadcast %cst_12 : bf16 to vector<16x384xbf16>
    %c0_13 = arith.constant 0 : index
    %c0_14 = arith.constant 0 : index
    %44 = vector.load %arg9[%c0_13, %c0_14] : memref<288x384xbf16, #tpu.memory_space<vmem>>, vector<16x384xbf16>
    tpu.vector_store %arg9[%c0_13, %c0_14], %43 {strides = array<i32>} : memref<288x384xbf16, #tpu.memory_space<vmem>>, vector<16x384xbf16>,
    %cst_15 = arith.constant 0.000000e+00 : bf16
    %45 = vector.broadcast %cst_15 : bf16 to vector<16x384xbf16>
    %c272 = arith.constant 272 : index
    %c0_16 = arith.constant 0 : index
    %46 = vector.load %arg9[%c272, %c0_16] : memref<288x384xbf16, #tpu.memory_space<vmem>>, vector<16x384xbf16>
    tpu.vector_store %arg9[%c272, %c0_16], %45 {strides = array<i32>} : memref<288x384xbf16, #tpu.memory_space<vmem>>, vector<16x384xbf16>,
    %47 = arith.truncf %34 : vector<256x128xf32> to vector<256x128xbf16>
    %c16 = arith.constant 16 : index
    %c0_17 = arith.constant 0 : index
    %48 = vector.load %arg9[%c16, %c0_17] : memref<288x384xbf16, #tpu.memory_space<vmem>>, vector<256x128xbf16>
    tpu.vector_store %arg9[%c16, %c0_17], %47 {strides = array<i32>} : memref<288x384xbf16, #tpu.memory_space<vmem>>, vector<256x128xbf16>,
    %49 = arith.truncf %8 : vector<256x128xf32> to vector<256x128xbf16>
    %c16_18 = arith.constant 16 : index
    %c128 = arith.constant 128 : index
    %50 = vector.load %arg9[%c16_18, %c128] : memref<288x384xbf16, #tpu.memory_space<vmem>>, vector<256x128xbf16>
    tpu.vector_store %arg9[%c16_18, %c128], %49 {strides = array<i32>} : memref<288x384xbf16, #tpu.memory_space<vmem>>, vector<256x128xbf16>,
    %51 = arith.truncf %42 : vector<256x128xf32> to vector<256x128xbf16>
    %c16_19 = arith.constant 16 : index
    %c256 = arith.constant 256 : index
    %52 = vector.load %arg9[%c16_19, %c256] : memref<288x384xbf16, #tpu.memory_space<vmem>>, vector<256x128xbf16>
    tpu.vector_store %arg9[%c16_19, %c256], %51 {strides = array<i32>} : memref<288x384xbf16, #tpu.memory_space<vmem>>, vector<256x128xbf16>,
    %c16_20 = arith.constant 16 : index
    %c0_21 = arith.constant 0 : index
    %53 = vector.load %arg9[%c16_20, %c0_21] : memref<288x384xbf16, #tpu.memory_space<vmem>>, vector<256x384xbf16>
    %c1 = arith.constant 1 : index
    %c0_22 = arith.constant 0 : index
    %c0_23 = arith.constant 0 : index
    %54 = vector.load %arg4[%c1, %c0_22, %c0_23] : memref<3x384x128xbf16, #tpu.memory_space<vmem>>, vector<1x384x128xbf16>
    %55 = vector.shape_cast %54 : vector<1x384x128xbf16> to vector<384x128xbf16>
    %cst_24 = arith.constant dense<0.000000e+00> : vector<256x128xf32>
    %56 = tpu.matmul %53, %55, %cst_24 {dimension_numbers = #tpu.dot_dimension_numbers<[1], [0], [0], [1], [0, 0, 1, 1], [], []>} : vector<256x384xbf16>, vector<384x128xbf16>, vector<256x128xf32> -> vector<256x128xf32>
    %c0_25 = arith.constant 0 : index
    %c0_26 = arith.constant 0 : index
    %57 = vector.load %arg9[%c0_25, %c0_26] : memref<288x384xbf16, #tpu.memory_space<vmem>>, vector<256x384xbf16>
    %c0_27 = arith.constant 0 : index
    %c0_28 = arith.constant 0 : index
    %c0_29 = arith.constant 0 : index
    %58 = vector.load %arg4[%c0_27, %c0_28, %c0_29] : memref<3x384x128xbf16, #tpu.memory_space<vmem>>, vector<1x384x128xbf16>
    %59 = vector.shape_cast %58 : vector<1x384x128xbf16> to vector<384x128xbf16>
    %cst_30 = arith.constant dense<0.000000e+00> : vector<256x128xf32>
    %60 = tpu.matmul %57, %59, %cst_30 {dimension_numbers = #tpu.dot_dimension_numbers<[1], [0], [0], [1], [0, 0, 1, 1], [], []>} : vector<256x384xbf16>, vector<384x128xbf16>, vector<256x128xf32> -> vector<256x128xf32>
    %61 = arith.addf %56, %60 : vector<256x128xf32>
    %c32 = arith.constant 32 : index
    %c0_31 = arith.constant 0 : index
    %62 = vector.load %arg9[%c32, %c0_31] : memref<288x384xbf16, #tpu.memory_space<vmem>>, vector<256x384xbf16>
    %c2 = arith.constant 2 : index
    %c0_32 = arith.constant 0 : index
    %c0_33 = arith.constant 0 : index
    %63 = vector.load %arg4[%c2, %c0_32, %c0_33] : memref<3x384x128xbf16, #tpu.memory_space<vmem>>, vector<1x384x128xbf16>
    %64 = vector.shape_cast %63 : vector<1x384x128xbf16> to vector<384x128xbf16>
    %cst_34 = arith.constant dense<0.000000e+00> : vector<256x128xf32>
    %65 = tpu.matmul %62, %64, %cst_34 {dimension_numbers = #tpu.dot_dimension_numbers<[1], [0], [0], [1], [0, 0, 1, 1], [], []>} : vector<256x384xbf16>, vector<384x128xbf16>, vector<256x128xf32> -> vector<256x128xf32>
    %66 = arith.addf %61, %65 : vector<256x128xf32>
    %c0_35 = arith.constant 0 : index
    %c0_36 = arith.constant 0 : index
    %67 = vector.load %arg5[%c0_35, %c0_36] : memref<1x128xf32, #tpu.memory_space<vmem>>, vector<1x128xf32>
    %68 = vector.broadcast %67 : vector<1x128xf32> to vector<256x128xf32>
    %69 = arith.addf %66, %68 : vector<256x128xf32>
    %cst_37 = arith.constant 0.000000e+00 : f32
    %70 = vector.broadcast %cst_37 : f32 to vector<256x128xf32>
    %71 = arith.maximumf %69, %70 : vector<256x128xf32>
    %72 = arith.truncf %71 : vector<256x128xf32> to vector<256x128xbf16>
    %c0_38 = arith.constant 0 : index
    %c0_39 = arith.constant 0 : index
    %73 = vector.load %arg6[%c0_38, %c0_39] : memref<128x128xbf16, #tpu.memory_space<vmem>>, vector<128x128xbf16>
    %cst_40 = arith.constant dense<0.000000e+00> : vector<256x128xf32>
    %74 = tpu.matmul %72, %73, %cst_40 {dimension_numbers = #tpu.dot_dimension_numbers<[1], [0], [0], [1], [0, 0, 1, 1], [], []>} : vector<256x128xbf16>, vector<128x128xbf16>, vector<256x128xf32> -> vector<256x128xf32>
    %c0_41 = arith.constant 0 : index
    %c0_42 = arith.constant 0 : index
    %75 = vector.load %arg7[%c0_41, %c0_42] : memref<1x128xf32, #tpu.memory_space<vmem>>, vector<1x128xf32>
    %76 = vector.broadcast %75 : vector<1x128xf32> to vector<256x128xf32>
    %77 = arith.addf %74, %76 : vector<256x128xf32>
    %c0_43 = arith.constant 0 : index
    %c0_44 = arith.constant 0 : index
    %c0_45 = arith.constant 0 : index
    %78 = vector.load %arg1[%c0_43, %c0_44, %c0_45] : memref<1x256x128xbf16, #tpu.memory_space<vmem>>, vector<1x256x128xbf16>
    %79 = vector.shape_cast %78 : vector<1x256x128xbf16> to vector<256x128xbf16>
    %80 = arith.extf %79 : vector<256x128xbf16> to vector<256x128xf32>
    %81 = arith.addf %77, %80 : vector<256x128xf32>
    %cst_46 = arith.constant 0.000000e+00 : f32
    %82 = vector.broadcast %cst_46 : f32 to vector<256x128xf32>
    %83 = arith.maximumf %81, %82 : vector<256x128xf32>
    %84 = arith.truncf %83 : vector<256x128xf32> to vector<256x128xbf16>
    %c0_47 = arith.constant 0 : index
    %c0_48 = arith.constant 0 : index
    %c0_49 = arith.constant 0 : index
    %85 = vector.load %arg8[%c0_47, %c0_48, %c0_49] : memref<1x256x128xbf16, #tpu.memory_space<vmem>>, vector<1x256x128xbf16>
    %86 = vector.shape_cast %85 : vector<1x256x128xbf16> to vector<256x128xbf16>
    %87 = vector.shape_cast %84 : vector<256x128xbf16> to vector<1x256x128xbf16>
    tpu.vector_store %arg8[%c0_47, %c0_48, %c0_49], %87 {strides = array<i32>} : memref<1x256x128xbf16, #tpu.memory_space<vmem>>, vector<1x256x128xbf16>,
    return
  }
  func.func @transform_0(%arg0: i32) -> (i32, i32, i32) {
    %c0_i32 = arith.constant 0 : i32
    %c0_i32_0 = arith.constant 0 : i32
    %c0_i32_1 = arith.constant 0 : i32
    return %arg0, %c0_i32, %c0_i32_0 : i32, i32, i32
  }
  func.func @transform_1(%arg0: i32) -> (i32, i32) {
    %c0_i32 = arith.constant 0 : i32
    %c0_i32_0 = arith.constant 0 : i32
    %c0_i32_1 = arith.constant 0 : i32
    return %c0_i32, %c0_i32_0 : i32, i32
  }
  func.func @transform_2(%arg0: i32) -> (i32, i32) {
    %c0_i32 = arith.constant 0 : i32
    %c0_i32_0 = arith.constant 0 : i32
    %c0_i32_1 = arith.constant 0 : i32
    return %c0_i32, %c0_i32_0 : i32, i32
  }
  func.func @transform_3(%arg0: i32) -> (i32, i32, i32) {
    %c0_i32 = arith.constant 0 : i32
    %c0_i32_0 = arith.constant 0 : i32
    %c0_i32_1 = arith.constant 0 : i32
    %c0_i32_2 = arith.constant 0 : i32
    return %c0_i32, %c0_i32_0, %c0_i32_1 : i32, i32, i32
  }
  func.func @transform_4(%arg0: i32) -> (i32, i32) {
    %c0_i32 = arith.constant 0 : i32
    %c0_i32_0 = arith.constant 0 : i32
    %c0_i32_1 = arith.constant 0 : i32
    return %c0_i32, %c0_i32_0 : i32, i32
  }
  func.func @transform_5(%arg0: i32) -> (i32, i32) {
    %c0_i32 = arith.constant 0 : i32
    %c0_i32_0 = arith.constant 0 : i32
    %c0_i32_1 = arith.constant 0 : i32
    return %c0_i32, %c0_i32_0 : i32, i32
  }
  func.func @transform_6(%arg0: i32) -> (i32, i32) {
    %c0_i32 = arith.constant 0 : i32
    %c0_i32_0 = arith.constant 0 : i32
    %c0_i32_1 = arith.constant 0 : i32
    return %c0_i32, %c0_i32_0 : i32, i32
  }
  func.func @transform_7(%arg0: i32) -> (i32, i32, i32) {
    %c0_i32 = arith.constant 0 : i32
    %c0_i32_0 = arith.constant 0 : i32
    %c0_i32_1 = arith.constant 0 : i32
    return %arg0, %c0_i32, %c0_i32_0 : i32, i32, i32
  }
}

</mosaic_0001>

<bundles_post_ra>
// kernel: bottleneck_forward.1
= control target key start
LH: loop header
LB: loop body
LE: loop exit
PB: predicated region body
PF: predicated region fallthrough
CT: control target
= control target key end

     0   :  { %s5673_s24 = smov 0   ;;  %s7219_s0 = inlined_call_operand.vmem [shape: bf16[2,256,128], index: 0, kind: input, shape index: {}]   ;;  %s7220_s1 = inlined_call_operand.vmem [shape: bf16[128,128], index: 1, kind: input, shape index: {}]   ;;  %s7221_s2 = inlined_call_operand.vmem [shape: f32[1,128], index: 2, kind: input, shape index: {}]   ;;  %s7222_s3 = inlined_call_operand.vmem [shape: bf16[3,384,128], index: 3, kind: input, shape index: {}]   ;;  %s7223_s4 = inlined_call_operand.vmem [shape: f32[1,128], index: 4, kind: input, shape index: {}]   ;;  %s7224_s5 = inlined_call_operand.vmem [shape: bf16[128,128], index: 5, kind: input, shape index: {}]   ;;  %s7225_s6 = inlined_call_operand.vmem [shape: f32[1,128], index: 6, kind: input, shape index: {}]   ;;  %s7226_s7 = inlined_call_operand.vmem [shape: bf16[2,256,128], index: 7, kind: output, shape index: {}]  }
   0x1 LB: > { %s4289_s25 = sadd.s32 4294967295, %s5630_s24   ;;  %p4293_p0 = scmp.ge.s32.totalorder %s5630_s24, 1  ;;  %s5630_s24 = sphi %s5673_s24, %s17_s24  }
   0x2   : > { %p237_p1 = scmp.lt.s32.totalorder %s5630_s24, 3 }
   0x4   : > { %p238_p2 = pnand %p4293_p0, %p237_p1 }
   0x6   : > { %241 = sbr.rel (%p238_p2) target bundleno = 1298 (0x512), region = 48 }
   0xb   : > { %v5233_v0 = vld [vmem:[%s7220_s1 + $0x38] sm:$0xff]  ;;  %v5232_v1 = vld [vmem:[%s7220_s1 + $0x30] sm:$0xff]  ;;  %v5231_v2 = vld [vmem:[%s7220_s1 + $0x28] sm:$0xff]  ;;  %p269_p3 = scmp.lt.s32.totalorder %s4289_s25, 1  ;;  %v5632_v25 = vmov 0   ;;  %v597_v32 = vlaneseq  ;;  %vm1176_vm3 = vcmask 1040384  }
   0xc   : > { %476 = vmatpush.bf16.msra.mxu0 %v5233_v0  ;;  %5587 = vmatpush.bf16.msra.mxu3 %v5233_v0  ;;  %v5230_v3 = vld [vmem:[%s7220_s1 + $0x20] sm:$0xff]  ;;  %v5229_v4 = vld [vmem:[%s7220_s1 + $0x18] sm:$0xff]  ;;  %v5228_v5 = vld [vmem:[%s7220_s1 + $0x10] sm:$0xff]  ;;  %1530 = vst [vmem:[#allocation2] sm:$0xff] %v5632_v25  ;;  %vm1432_vm4 = vcmask 1046528  }
   0xd   : > { %s7414_s25 = smov (!%p269_p3, %s4289_s25), 1  ;;  %v5227_v6 = vld [vmem:[%s7220_s1 + $0x8] sm:$0xff]  ;;  %v5226_v7 = vld [vmem:[%s7220_s1] sm:$0xff]  ;;  %v5727_v17 = vld [vmem:[%s7222_s3 + $0x78] sm:$0xff]  ;;  %1532 = vst [vmem:[#allocation2 + $0xc] sm:$0xff] %v5632_v25  ;;  %v5780_v34 = vshrl.u32 %v597_v32, 7 }
   0xe   : > { %s5208_s17 = sshll.u32 %s7414_s25, 7  ;;  %2384 = vmatpush.bf16.msra.mxu2 %v5727_v17  ;;  %v5733_v18 = vld [vmem:[%s7222_s3 + $0x70] sm:$0xff]  ;;  %v5739_v19 = vld [vmem:[%s7222_s3 + $0x68] sm:$0xff]  ;;  %v5746_v21 = vld [vmem:[%s7222_s3 + $0x60] sm:$0xff]  ;;  %1531 = vst [vmem:[#allocation2 + $0x8] sm:$0xf] %v5632_v25 }
   0xf   : > { %s5713_s22 = scalar_lea.vmem %s7219_s0, %s5208_s17  ;;  %v5752_v22 = vld [vmem:[%s7222_s3 + $0x58] sm:$0xff]  ;;  %v5758_v23 = vld [vmem:[%s7222_s3 + $0x50] sm:$0xff]  ;;  %v5765_v26 = vld [vmem:[%s7222_s3 + $0x48] sm:$0xff]  ;;  %1533 = vst [vmem:[#allocation2 + $0x14] sm:$0xf] %v5632_v25  ;;  %v599_v38 = vadd.s32 8, %v5780_v34  ;;  %s7100_s21 = scalar_lea.vmem %s7226_s7, %s5208_s17 }
  0x10   : > { %477 = vmatpush.bf16.msra.mxu0 %v5232_v1  ;;  %5588 = vmatpush.bf16.msra.mxu3 %v5232_v1  ;;  %v5210_v8 = vld [vmem:[%s5713_s22] sm:$0xff]  ;;  %v5211_v10 = vld [vmem:[%s5713_s22 + $0x8] sm:$0xff]  ;;  %v5212_v12 = vld [vmem:[%s5713_s22 + $0x10] sm:$0xff]  ;;  %1534 = vst [vmem:[#allocation2 + $0x198] sm:$0xff] %v5632_v25  ;;  %v634_v41 = vand.u32 15, %v5780_v34  ;;  %v622_v42 = vadd.s32 192, %v5780_v34 }
  0x11   : > { %v5222_v9 = vld [vmem:[%s5713_s22 + $0x60] sm:$0xff]  ;;  %v5223_v11 = vld [vmem:[%s5713_s22 + $0x68] sm:$0xff]  ;;  %v5224_v13 = vld [vmem:[%s5713_s22 + $0x70] sm:$0xff]  ;;  %1535 = vst [vmem:[#allocation2 + $0x1a0] sm:$0xf] %v5632_v25  ;;  %v641_v45 = vand.u32 15, %v599_v38 }
  0x12   : > { %v5213_v14 = vld [vmem:[%s5713_s22 + $0x18] sm:$0xff]  ;;  %v5214_v16 = vld [vmem:[%s5713_s22 + $0x20] sm:$0xff]  ;;  %2385 = vmatpush.bf16.msra.mxu2 %v5733_v18  ;;  %v5215_v20 = vld [vmem:[%s5713_s22 + $0x28] sm:$0xff]  ;;  %1536 = vst [vmem:[#allocation2 + $0x1a4] sm:$0xff] %v5632_v25  ;;  %vm5797_vm0 = vcmp.ne.s32.totalorder %v634_v41, 0  ;;  %v802_v49 = vand.u32 15, %v622_v42 }
  0x13   : > { %v5225_v15 = vld [vmem:[%s5713_s22 + $0x78] sm:$0xff]  ;;  %v5216_v24 = vld [vmem:[%s5713_s22 + $0x30] sm:$0xff]  ;;  %v5771_v27 = vld [vmem:[%s7222_s3 + $0x40] sm:$0xff]  ;;  %1537 = vst [vmem:[#allocation2 + $0x1ac] sm:$0xf] %v5632_v25  ;;  %v600_v50 = vadd.s32 16, %v5780_v34 }
  0x14   : > { %478 = vmatpush.bf16.msra.mxu0 %v5231_v2  ;;  %5589 = vmatpush.bf16.msra.mxu3 %v5231_v2  ;;  %v5306_v28 = vld [vmem:[#allocation2 + $0x4] sm:$0xf]  ;;  %v4446_v29 = vld [vmem:[#allocation2 + $0xc] sm:$0xf0]  ;;  %v5217_v31 = vld [vmem:[%s5713_s22 + $0x38] sm:$0xff]  ;;  %v623_v52 = vadd.s32 200, %v5780_v34 }
  0x15   : > { %v4449_v30 = vor.u32 %v5306_v28, %v4446_v29  ;;  %v5778_v33 = vld [vmem:[%s7221_s2] ss:$0 sm:$0xff]  ;;  %v5316_v39 = vld [vmem:[%s7222_s3 + $0x38] sm:$0xff]  ;;  %v5315_v46 = vld [vmem:[%s7222_s3 + $0x30] sm:$0xff]  ;;  %vm5810_vm1 = vcmp.ne.s32.totalorder %v641_v45, 15  ;;  %vm5817_vm2 = vcmp.ne.s32.totalorder %v802_v49, 0 }
  0x16   : > { %2386 = vmatpush.bf16.msra.mxu2 %v5739_v19  ;;  %v5218_v35 = vld [vmem:[%s5713_s22 + $0x40] sm:$0xff]  ;;  %2295 = vmatpush.bf16.msra.mxu1 %v5316_v39  ;;  %v5314_v57 = vld [vmem:[%s7222_s3 + $0x28] sm:$0xff]  ;;  %v648_v61 = vand.u32 15, %v600_v50  ;;  %v809_v62 = vand.u32 15, %v623_v52  ;;  %v5312_v32 = vld [vmem:[%s7222_s3 + $0x18] sm:$0xff] }
  0x17   : > { %v5288_v56 = vld [vmem:[%s7222_s3 + $0xf0] sm:$0xff] }
  0x18   : > { %479 = vmatpush.bf16.msra.mxu0 %v5230_v3  ;;  %5590 = vmatpush.bf16.msra.mxu3 %v5230_v3  ;;  %vm5844_vm5 = vcmp.ne.s32.totalorder %v648_v61, 0  ;;  %vm5852_vm6 = vcmp.ne.s32.totalorder %v809_v62, 15 }
  0x1a   : > { %2387 = vmatpush.bf16.msra.mxu2 %v5746_v21  ;;  %2296 = vmatpush.bf16.msra.mxu1 %v5315_v46 }
  0x1c   : > { %480 = vmatpush.bf16.msra.mxu0 %v5229_v4  ;;  %5591 = vmatpush.bf16.msra.mxu3 %v5229_v4 }
  0x1e   : > { %2388 = vmatpush.bf16.msra.mxu2 %v5752_v22  ;;  %2297 = vmatpush.bf16.msra.mxu1 %v5314_v57 }
  0x20   : > { %481 = vmatpush.bf16.msra.mxu0 %v5228_v5  ;;  %5592 = vmatpush.bf16.msra.mxu3 %v5228_v5 }
  0x22   : > { %2389 = vmatpush.bf16.msra.mxu2 %v5758_v23 }
  0x24   : > { %482 = vmatpush.bf16.msra.mxu0 %v5227_v6  ;;  %5593 = vmatpush.bf16.msra.mxu3 %v5227_v6 }
  0x26   : > { %2390 = vmatpush.bf16.msra.mxu2 %v5765_v26 }
  0x28   : > { %483 = vmatpush.bf16.msra.mxu0 %v5226_v7  ;;  %5594 = vmatpush.bf16.msra.mxu3 %v5226_v7  ;;  %v624_v7 = vadd.s32 208, %v5780_v34 }
  0x2a   : > { %2391 = vmatpush.bf16.msra.mxu2 %v5771_v27 }
  0x2b   : > { %484 = vmatmul.bf16.vlgmr.msra.gmra.mxu0 %v5210_v8  ;;  %544 = vmatmul.bf16.vlgmr.msra.gmra.mxu3 %v5222_v9  ;;  %v5313_v8 = vld [vmem:[%s7222_s3 + $0x20] sm:$0xff] }
  0x2c   : > { %5595 = vmatpush.bf16.msrb.mxu3 %v5316_v39  ;;  %2298 = vmatpush.bf16.msra.mxu1 %v5313_v8 }
  0x2d   : > { %2392 = vmatmul.bf16.vlgmr.msra.gmra.mxu2 %v4449_v30 }
  0x30   : > { %5596 = vmatpush.bf16.msrb.mxu3 %v5315_v46  ;;  %2299 = vmatpush.bf16.msra.mxu1 %v5312_v32 }
  0x34   : > { %5597 = vmatpush.bf16.msrb.mxu3 %v5314_v57 }
  0x38   : > { %5598 = vmatpush.bf16.msrb.mxu3 %v5313_v8  ;;  %v5310_v8 = vld [vmem:[%s7222_s3 + $0x8] sm:$0xff] }
  0x3b   : > { %489 = vmatmul.bf16.gmra.mxu0 %v5211_v10  ;;  %549 = vmatmul.bf16.gmra.mxu3 %v5223_v11 }
  0x3c   : > { %5599 = vmatpush.bf16.msrb.mxu3 %v5312_v32 }
  0x4b   : > { %494 = vmatmul.bf16.gmra.mxu0 %v5212_v12  ;;  %554 = vmatmul.bf16.gmra.mxu3 %v5224_v13  ;;  %v5219_v12 = vld [vmem:[%s5713_s22 + $0x48] sm:$0xff] }
  0x5b   : > { %499 = vmatmul.bf16.gmra.mxu0 %v5213_v14  ;;  %559 = vmatmul.bf16.gmra.mxu3 %v5225_v15 }
  0x6b   : > { %504 = vmatmul.bf16.gmra.mxu0 %v5214_v16 }
  0x7b   : > { %509 = vmatmul.bf16.gmra.mxu0 %v5215_v20  ;;  %v601_v20 = vadd.s32 24, %v5780_v34 }
  0x7d   : > { %v655_v42 = vand.u32 15, %v601_v20 }
  0x7f   : > { %vm5913_vm8 = vcmp.ne.s32.totalorder %v655_v42, 15 }
  0x8b   : > { %514 = vmatmul.bf16.gmra.mxu0 %v5216_v24 }
  0x9b   : > { %519 = vmatmul.bf16.gmra.mxu0 %v5217_v31  ;;  %v816_v31 = vand.u32 15, %v624_v7 }
  0x9d   : > { %vm5890_vm7 = vcmp.ne.s32.totalorder %v816_v31, 0 }
  0xa8   : > { %v485_v36 = vpop.f32.mrf.mxu0 }
  0xa9   : > { %v486_v37 = vadd.f32 %v5778_v33, %v485_v36 }
  0xab   : > { %v5788_v40 = vmax.f32 %v486_v37, 0.0  ;;  %524 = vmatmul.bf16.gmra.mxu0 %v5218_v35  ;;  %v5289_v35 = vld [vmem:[%s7222_s3 + $0xf8] sm:$0xff] }
  0xac   : > { %2722 = vmatpush.bf16.msrb.mxu0 %v5289_v35 }
  0xad   : > { %v1602_v43 = vpack.c.bf16 %v5788_v40, %v5788_v40  ;;  %v1368_v55 = vsel %vm5797_vm0, %v5788_v40, 0.0  ;;  %v1177_v3 = vrot.slane %v5788_v40, 7 }
  0xae   : > { %v545_v44 = vpop.f32.mrf.mxu3  ;;  %v5825_v63 = vrot.slane %v1368_v55, 1  ;;  %v5311_v55 = vld [vmem:[%s7222_s3 + $0x10] sm:$0xff] }
  0xaf   : > { %1634 = vst [vmem:[#allocation2 + $0x1c] sm:$0xf] %v1602_v43  ;;  %v546_v48 = vadd.f32 %v5778_v33, %v545_v44  ;;  %2300 = vmatpush.bf16.msra.mxu1 %v5311_v55  ;;  %5600 = vmatpush.bf16.msrb.mxu3 %v5311_v55 }
  0xb0   : > { %v487_v51 = vpop.f32.mrf.mxu0  ;;  %2723 = vmatpush.bf16.msrb.mxu0 %v5288_v56 }
  0xb1   : > { %v5804_v53 = vmax.f32 %v546_v48, 0.0  ;;  %v488_v54 = vadd.f32 %v5778_v33, %v487_v51 }
  0xb3   : > { %v1626_v59 = vpack.c.bf16 %v5804_v53, %v5804_v53  ;;  %v5823_v60 = vmax.f32 %v488_v54, 0.0  ;;  %v1392_v4 = vsel %vm5817_vm2, %v5804_v53, 0.0  ;;  %v1224_v30 = vrot.slane %v5804_v53, 7  ;;  %2301 = vmatpush.bf16.msra.mxu1 %v5310_v8  ;;  %5601 = vmatpush.bf16.msrb.mxu3 %v5310_v8 }
  0xb4   : > { %v5857_v24 = vrot.slane %v1392_v4, 1  ;;  %v602_v4 = vadd.s32 32, %v5780_v34 }
  0xb5   : > { %1658 = vst [vmem:[#allocation2 + $0x13c] sm:$0xf] %v1626_v59  ;;  %v1111_v0 = vsel %vm5810_vm1, %v5823_v60, 0.0  ;;  %v1434_v1 = vrot.slane %v5823_v60, 1  ;;  %v1603_v2 = vpack.c.bf16 %v5823_v60, %v5823_v60 }
  0xb6   : > { %v1178_v5 = vrot.slane %v1111_v0, 7  ;;  %v547_v6 = vpop.f32.mrf.mxu3  ;;  %v5234_v47 = vld [vmem:[#allocation2 + $0x1c] sm:$0xf] }
  0xb7   : > { %v1435_v9 = vsel %vm1432_vm4, %v5825_v63, %v1434_v1  ;;  %1635 = vst [vmem:[#allocation2 + $0x28] sm:$0xf] %v1603_v2  ;;  %v548_v10 = vadd.f32 %v5778_v33, %v547_v6  ;;  %v625_v2 = vadd.s32 216, %v5780_v34 }
  0xb8   : > { %v1179_v13 = vsel %vm1176_vm3, %v1177_v3, %v1178_v5  ;;  %v1666_v14 = vpack.c.bf16 %v1435_v9, %v1435_v9  ;;  %v490_v16 = vpop.f32.mrf.mxu0  ;;  %v5287_v9 = vld [vmem:[%s7222_s3 + $0xe8] sm:$0xff] }
  0xb9   : > { %v1539_v25 = vpack.c.bf16 %v1179_v13, %v1179_v13  ;;  %v5859_v28 = vmax.f32 %v548_v10, 0.0  ;;  %v491_v29 = vadd.f32 %v5778_v33, %v490_v16  ;;  %v823_v15 = vand.u32 15, %v625_v2  ;;  %2724 = vmatpush.bf16.msrb.mxu0 %v5287_v9 }
  0xba   : > { %1698 = vst [vmem:[#allocation2 + $0x20] sm:$0xf] %v1666_v14  ;;  %v662_v16 = vand.u32 15, %v602_v4 }
  0xbb   : > { %1571 = vst [vmem:[#allocation2 + $0x24] sm:$0xf] %v1539_v25  ;;  %v1135_v36 = vsel %vm5852_vm6, %v5859_v28, 0.0  ;;  %v1482_v37 = vrot.slane %v5859_v28, 1  ;;  %v1627_v38 = vpack.c.bf16 %v5859_v28, %v5859_v28  ;;  %v5875_v39 = vmax.f32 %v491_v29, 0.0  ;;  %529 = vmatmul.bf16.gmra.mxu0 %v5219_v12 }
  0xbc   : > { %v1226_v41 = vrot.slane %v1135_v36, 7  ;;  %vm5948_vm9 = vcmp.ne.s32.totalorder %v823_v15, 15  ;;  %vm5956_vm10 = vcmp.ne.s32.totalorder %v662_v16, 0 }
  0xbd   : > { %v1483_v43 = vsel %vm1432_vm4, %v5857_v24, %v1482_v37  ;;  %1659 = vst [vmem:[#allocation2 + $0x148] sm:$0xf] %v1627_v38  ;;  %v1180_v44 = vrot.slane %v5875_v39, 7  ;;  %v1370_v45 = vsel %vm5844_vm5, %v5875_v39, 0.0  ;;  %v1604_v46 = vpack.c.bf16 %v5875_v39, %v5875_v39 }
  0xbe   : > { %v1227_v48 = vsel %vm1176_vm3, %v1224_v30, %v1226_v41  ;;  %v1690_v49 = vpack.c.bf16 %v1483_v43, %v1483_v43  ;;  %v1436_v50 = vrot.slane %v1370_v45, 1  ;;  %v550_v51 = vpop.f32.mrf.mxu3  ;;  %v4458_v54 = vld [vmem:[#allocation2 + $0x24] sm:$0xf0] }
  0xbf   : > { %v1563_v57 = vpack.c.bf16 %v1227_v48, %v1227_v48  ;;  %v1181_v58 = vsel %vm1176_vm3, %v1178_v5, %v1180_v44  ;;  %1636 = vst [vmem:[#allocation2 + $0x34] sm:$0xf] %v1604_v46  ;;  %v551_v59 = vadd.f32 %v5778_v33, %v550_v51  ;;  %v5904_v60 = vor.u32 %v5234_v47, %v4458_v54  ;;  %v5220_v46 = vld [vmem:[%s5713_s22 + $0x50] sm:$0xff] }
  0xc0   : > { %1722 = vst [vmem:[#allocation2 + $0x140] sm:$0xf] %v1690_v49  ;;  %v1437_v61 = vsel %vm1432_vm4, %v1434_v1, %v1436_v50  ;;  %v1540_v62 = vpack.c.bf16 %v1181_v58, %v1181_v58  ;;  %v492_v0 = vpop.f32.mrf.mxu0  ;;  %v603_v49 = vadd.s32 40, %v5780_v34 }
  0xc1   : > { %1595 = vst [vmem:[#allocation2 + $0x144] sm:$0xf] %v1563_v57  ;;  %v1667_v6 = vpack.c.bf16 %v1437_v61, %v1437_v61  ;;  %v5909_v7 = vmax.f32 %v551_v59, 0.0  ;;  %v493_v5 = vadd.f32 %v5778_v33, %v492_v0  ;;  %2397 = vmatmul.bf16.gmra.mxu2 %v5904_v60  ;;  %v5309_v61 = vld [vmem:[%s7222_s3] sm:$0xff] }
  0xc2   : > { %1572 = vst [vmem:[#allocation2 + $0x30] sm:$0xf] %v1540_v62  ;;  %v669_v59 = vand.u32 15, %v603_v49  ;;  %v5286_v62 = vld [vmem:[%s7222_s3 + $0xe0] sm:$0xff]  ;;  %2302 = vmatpush.bf16.msra.mxu1 %v5309_v61  ;;  %5602 = vmatpush.bf16.msrb.mxu3 %v5309_v61  ;;  %v5284_v49 = vld [vmem:[%s7222_s3 + $0xd0] sm:$0xff] }
  0xc3   : > { %1699 = vst [vmem:[#allocation2 + $0x2c] sm:$0xf] %v1667_v6  ;;  %v1228_v10 = vrot.slane %v5909_v7, 7  ;;  %v1394_v11 = vsel %vm5890_vm7, %v5909_v7, 0.0  ;;  %v1628_v12 = vpack.c.bf16 %v5909_v7, %v5909_v7  ;;  %v5929_v13 = vmax.f32 %v493_v5, 0.0  ;;  %2725 = vmatpush.bf16.msrb.mxu0 %v5286_v62 }
  0xc4   : > { %v1484_v14 = vrot.slane %v1394_v11, 1  ;;  %vm6004_vm12 = vcmp.ne.s32.totalorder %v669_v59, 15  ;;  %v605_v11 = vadd.s32 56, %v5780_v34 }
  0xc5   : > { %v1229_v20 = vsel %vm1176_vm3, %v1226_v41, %v1228_v10  ;;  %1660 = vst [vmem:[#allocation2 + $0x154] sm:$0xf] %v1628_v12  ;;  %v1113_v25 = vsel %vm5913_vm8, %v5929_v13, 0.0  ;;  %v1438_v29 = vrot.slane %v5929_v13, 1  ;;  %v1605_v31 = vpack.c.bf16 %v5929_v13, %v5929_v13  ;;  %v4444_v13 = vld [vmem:[#allocation2] sm:$0xf] }
  0xc6   : > { %v1485_v32 = vsel %vm1432_vm4, %v1482_v37, %v1484_v14  ;;  %v1564_v35 = vpack.c.bf16 %v1229_v20, %v1229_v20  ;;  %v1182_v36 = vrot.slane %v1113_v25, 7  ;;  %v552_v38 = vpop.f32.mrf.mxu3  ;;  %v626_v41 = vadd.s32 224, %v5780_v34  ;;  %v5237_v7 = vld [vmem:[#allocation2 + $0x34] sm:$0xf]  ;;  %v5307_v20 = vld [vmem:[#allocation2 + $0x8] sm:$0xf0]  ;;  %5603 = vmatpush.bf16.msra.mxu3 %v5727_v17 }
  0xc7   : > { %v1691_v42 = vpack.c.bf16 %v1485_v32, %v1485_v32  ;;  %v1439_v43 = vsel %vm1432_vm4, %v1436_v50, %v1438_v29  ;;  %1637 = vst [vmem:[#allocation2 + $0x40] sm:$0xf] %v1605_v31  ;;  %v553_v45 = vadd.f32 %v5778_v33, %v552_v38  ;;  %v4445_v38 = vor.u32 %v5307_v20, %v4444_v13  ;;  %v5282_v20 = vld [vmem:[%s7222_s3 + $0xc0] sm:$0xff] }
  0xc8   : > { %1596 = vst [vmem:[#allocation2 + $0x150] sm:$0xf] %v1564_v35  ;;  %v1183_v47 = vsel %vm1176_vm3, %v1180_v44, %v1182_v36  ;;  %v1668_v28 = vpack.c.bf16 %v1439_v43, %v1439_v43  ;;  %v495_v48 = vpop.f32.mrf.mxu0  ;;  %v830_v39 = vand.u32 15, %v626_v41  ;;  %v627_v35 = vadd.s32 232, %v5780_v34  ;;  %v5285_v41 = vld [vmem:[%s7222_s3 + $0xd8] sm:$0xff] }
  0xc9   : > { %1723 = vst [vmem:[#allocation2 + $0x14c] sm:$0xf] %v1691_v42  ;;  %v1541_v51 = vpack.c.bf16 %v1183_v47, %v1183_v47  ;;  %v5953_v50 = vmax.f32 %v553_v45, 0.0  ;;  %v496_v52 = vadd.f32 %v5778_v33, %v495_v48  ;;  %v604_v45 = vadd.s32 48, %v5780_v34  ;;  %2303 = vmatmul.bf16.vlgmr.msra.gmra.mxu1 %v4445_v38  ;;  %2726 = vmatpush.bf16.msrb.mxu0 %v5285_v41 }
  0xca   : > { %1700 = vst [vmem:[#allocation2 + $0x38] sm:$0xf] %v1668_v28  ;;  %vm5984_vm11 = vcmp.ne.s32.totalorder %v830_v39, 0  ;;  %v837_v48 = vand.u32 15, %v627_v35  ;;  %5604 = vmatpush.bf16.msra.mxu3 %v5733_v18 }
  0xcb   : > { %1573 = vst [vmem:[#allocation2 + $0x3c] sm:$0xf] %v1541_v51  ;;  %v1137_v44 = vsel %vm5948_vm9, %v5953_v50, 0.0  ;;  %v1486_v55 = vrot.slane %v5953_v50, 1  ;;  %v1629_v56 = vpack.c.bf16 %v5953_v50, %v5953_v50  ;;  %v5966_v57 = vmax.f32 %v496_v52, 0.0  ;;  %534 = vmatmul.bf16.gmra.mxu0 %v5220_v46 }
  0xcc   : > { %v1230_v58 = vrot.slane %v1137_v44, 7  ;;  %v676_v61 = vand.u32 15, %v604_v45  ;;  %vm6037_vm13 = vcmp.ne.s32.totalorder %v837_v48, 15 }
  0xcd   : > { %v1487_v0 = vsel %vm1432_vm4, %v1484_v14, %v1486_v55  ;;  %1661 = vst [vmem:[#allocation2 + $0x160] sm:$0xf] %v1629_v56  ;;  %v1184_v2 = vrot.slane %v5966_v57, 7  ;;  %v1372_v4 = vsel %vm5956_vm10, %v5966_v57, 0.0  ;;  %v1606_v6 = vpack.c.bf16 %v5966_v57, %v5966_v57  ;;  %2727 = vmatpush.bf16.msrb.mxu0 %v5284_v49 }
  0xce   : > { %v1231_v5 = vsel %vm1176_vm3, %v1228_v10, %v1230_v58  ;;  %v1692_v1 = vpack.c.bf16 %v1487_v0, %v1487_v0  ;;  %v1440_v8 = vrot.slane %v1372_v4, 1  ;;  %v555_v9 = vpop.f32.mrf.mxu3  ;;  %v4470_v12 = vld [vmem:[#allocation2 + $0x3c] sm:$0xf0]  ;;  %5605 = vmatpush.bf16.msra.mxu3 %v5739_v19  ;;  %vm6049_vm14 = vcmp.ne.s32.totalorder %v676_v61, 0 }
  0xcf   : > { %v1565_v14 = vpack.c.bf16 %v1231_v5, %v1231_v5  ;;  %v1185_v15 = vsel %vm1176_vm3, %v1182_v36, %v1184_v2  ;;  %1638 = vst [vmem:[#allocation2 + $0x4c] sm:$0xf] %v1606_v6  ;;  %v556_v16 = vadd.f32 %v5778_v33, %v555_v9  ;;  %v5992_v10 = vor.u32 %v5237_v7, %v4470_v12  ;;  %v5221_v6 = vld [vmem:[%s5713_s22 + $0x58] sm:$0xff] }
  0xd0   : > { %1724 = vst [vmem:[#allocation2 + $0x158] sm:$0xf] %v1692_v1  ;;  %v1441_v25 = vsel %vm1432_vm4, %v1438_v29, %v1440_v8  ;;  %v1542_v31 = vpack.c.bf16 %v1185_v15, %v1185_v15  ;;  %v497_v32 = vpop.f32.mrf.mxu0  ;;  %v628_v5 = vadd.s32 240, %v5780_v34  ;;  %v5283_v1 = vld [vmem:[%s7222_s3 + $0xc8] sm:$0xff] }
  0xd1   : > { %1597 = vst [vmem:[#allocation2 + $0x15c] sm:$0xf] %v1565_v14  ;;  %v1669_v36 = vpack.c.bf16 %v1441_v25, %v1441_v25  ;;  %v5999_v42 = vmax.f32 %v556_v16, 0.0  ;;  %v498_v43 = vadd.f32 %v5778_v33, %v497_v32  ;;  %2402 = vmatmul.bf16.gmra.mxu2 %v5992_v10  ;;  %2728 = vmatpush.bf16.msrb.mxu0 %v5283_v1 }
  0xd2   : > { %1574 = vst [vmem:[#allocation2 + $0x48] sm:$0xf] %v1542_v31  ;;  %v844_v16 = vand.u32 15, %v628_v5  ;;  %5606 = vmatpush.bf16.msra.mxu3 %v5746_v21 }
  0xd3   : > { %1701 = vst [vmem:[#allocation2 + $0x44] sm:$0xf] %v1669_v36  ;;  %v1232_v46 = vrot.slane %v5999_v42, 7  ;;  %v1396_v47 = vsel %vm5984_vm11, %v5999_v42, 0.0  ;;  %v1630_v28 = vpack.c.bf16 %v5999_v42, %v5999_v42  ;;  %v6015_v17 = vmax.f32 %v498_v43, 0.0 }
  0xd4   : > { %v1488_v37 = vrot.slane %v1396_v47, 1  ;;  %v683_v43 = vand.u32 15, %v605_v11  ;;  %vm6079_vm15 = vcmp.ne.s32.totalorder %v844_v16, 0 }
  0xd5   : > { %v1233_v51 = vsel %vm1176_vm3, %v1230_v58, %v1232_v46  ;;  %1662 = vst [vmem:[#allocation2 + $0x16c] sm:$0xf] %v1630_v28  ;;  %v1115_v52 = vsel %vm6004_vm12, %v6015_v17, 0.0  ;;  %v1442_v54 = vrot.slane %v6015_v17, 1  ;;  %v1607_v39 = vpack.c.bf16 %v6015_v17, %v6015_v17  ;;  %2729 = vmatpush.bf16.msrb.mxu0 %v5282_v20 }
  0xd6   : > { %v1489_v44 = vsel %vm1432_vm4, %v1486_v55, %v1488_v37  ;;  %v1566_v56 = vpack.c.bf16 %v1233_v51, %v1233_v51  ;;  %v1186_v59 = vrot.slane %v1115_v52, 7  ;;  %v557_v58 = vpop.f32.mrf.mxu3  ;;  %v5240_v29 = vld [vmem:[#allocation2 + $0x4c] sm:$0xf]  ;;  %v629_v51 = vadd.s32 248, %v5780_v34  ;;  %5607 = vmatpush.bf16.msra.mxu3 %v5752_v22 }
  0xd7   : > { %v1693_v62 = vpack.c.bf16 %v1489_v44, %v1489_v44  ;;  %v1443_v0 = vsel %vm1432_vm4, %v1440_v8, %v1442_v54  ;;  %1639 = vst [vmem:[#allocation2 + $0x58] sm:$0xf] %v1607_v39  ;;  %v558_v4 = vadd.f32 %v5778_v33, %v557_v58  ;;  %vm6087_vm0 = vcmp.ne.s32.totalorder %v683_v43, 15 }
  0xd8   : > { %1598 = vst [vmem:[#allocation2 + $0x168] sm:$0xf] %v1566_v56  ;;  %v1187_v18 = vsel %vm1176_vm3, %v1184_v2, %v1186_v59  ;;  %v1670_v50 = vpack.c.bf16 %v1443_v0, %v1443_v0  ;;  %v500_v7 = vpop.f32.mrf.mxu0  ;;  %v606_v56 = vadd.s32 64, %v5780_v34 }
  0xd9   : > { %1725 = vst [vmem:[#allocation2 + $0x164] sm:$0xf] %v1693_v62  ;;  %v1543_v8 = vpack.c.bf16 %v1187_v18, %v1187_v18  ;;  %v6045_v9 = vmax.f32 %v558_v4, 0.0  ;;  %v501_v57 = vadd.f32 %v5778_v33, %v500_v7  ;;  %v851_v4 = vand.u32 15, %v629_v51 }
  0xda   : > { %1702 = vst [vmem:[#allocation2 + $0x50] sm:$0xf] %v1670_v50  ;;  %5608 = vmatpush.bf16.msra.mxu3 %v5758_v23  ;;  %v607_v23 = vadd.s32 72, %v5780_v34 }
  0xdb   : > { %1575 = vst [vmem:[#allocation2 + $0x54] sm:$0xf] %v1543_v8  ;;  %v1139_v12 = vsel %vm6037_vm13, %v6045_v9, 0.0  ;;  %v1490_v13 = vrot.slane %v6045_v9, 1  ;;  %v1631_v14 = vpack.c.bf16 %v6045_v9, %v6045_v9  ;;  %v6060_v15 = vmax.f32 %v501_v57, 0.0  ;;  %539 = vmatmul.bf16.gmra.mxu0 %v5221_v6 }
  0xdc   : > { %v1234_v19 = vrot.slane %v1139_v12, 7  ;;  %v690_v8 = vand.u32 15, %v606_v56  ;;  %vm1045_vm1 = vcmp.ne.s32.totalorder %v851_v4, 15 }
  0xdd   : > { %v1491_v25 = vsel %vm1432_vm4, %v1488_v37, %v1490_v13  ;;  %1663 = vst [vmem:[#allocation2 + $0x178] sm:$0xf] %v1631_v14  ;;  %v1188_v31 = vrot.slane %v6060_v15, 7  ;;  %v1374_v32 = vsel %vm6049_vm14, %v6060_v15, 0.0  ;;  %v1608_v35 = vpack.c.bf16 %v6060_v15, %v6060_v15 }
  0xde   : > { %v1235_v38 = vsel %vm1176_vm3, %v1232_v46, %v1234_v19  ;;  %v1694_v41 = vpack.c.bf16 %v1491_v25, %v1491_v25  ;;  %v1444_v36 = vrot.slane %v1374_v32, 1  ;;  %v560_v42 = vpop.f32.mrf.mxu3  ;;  %v4482_v45 = vld [vmem:[#allocation2 + $0x54] sm:$0xf0]  ;;  %5609 = vmatpush.bf16.msra.mxu3 %v5765_v26  ;;  %vm6105_vm2 = vcmp.ne.s32.totalorder %v690_v8, 0 }
  0xdf   : > { %v1567_v47 = vpack.c.bf16 %v1235_v38, %v1235_v38  ;;  %v1189_v28 = vsel %vm1176_vm3, %v1186_v59, %v1188_v31  ;;  %1640 = vst [vmem:[#allocation2 + $0x64] sm:$0xf] %v1608_v35  ;;  %v561_v17 = vadd.f32 %v5778_v33, %v560_v42  ;;  %v6076_v37 = vor.u32 %v5240_v29, %v4482_v45 }
  0xe0   : > { %1726 = vst [vmem:[#allocation2 + $0x170] sm:$0xf] %v1694_v41  ;;  %v1445_v21 = vsel %vm1432_vm4, %v1442_v54, %v1444_v36  ;;  %v1544_v48 = vpack.c.bf16 %v1189_v28, %v1189_v28  ;;  %v502_v49 = vpop.f32.mrf.mxu0  ;;  %v697_v38 = vand.u32 15, %v607_v23 }
  0xe1   : > { %1599 = vst [vmem:[#allocation2 + $0x174] sm:$0xf] %v1567_v47  ;;  %v1671_v52 = vpack.c.bf16 %v1445_v21, %v1445_v21  ;;  %v595_v39 = vmax.f32 %v561_v17, 0.0  ;;  %v503_v44 = vadd.f32 %v5778_v33, %v502_v49  ;;  %2407 = vmatmul.bf16.gmra.mxu2 %v6076_v37 }
  0xe2   : > { %1576 = vst [vmem:[#allocation2 + $0x60] sm:$0xf] %v1544_v48  ;;  %5610 = vmatpush.bf16.msra.mxu3 %v5771_v27  ;;  %vm1023_vm5 = vcmp.ne.s32.totalorder %v697_v38, 15 }
  0xe3   : > { %1703 = vst [vmem:[#allocation2 + $0x5c] sm:$0xf] %v1671_v52  ;;  %v1236_v59 = vrot.slane %v595_v39, 7  ;;  %v1398_v58 = vsel %vm6079_vm15, %v595_v39, 0.0  ;;  %v1632_v61 = vpack.c.bf16 %v595_v39, %v595_v39  ;;  %v572_v62 = vmax.f32 %v503_v44, 0.0 }
  0xe4   : > { %v1492_v0 = vrot.slane %v1398_v58, 1  ;;  %v608_v44 = vadd.s32 80, %v5780_v34 }
  0xe5   : > { %v1237_v6 = vsel %vm1176_vm3, %v1234_v19, %v1236_v59  ;;  %1664 = vst [vmem:[#allocation2 + $0x184] sm:$0xf] %v1632_v61  ;;  %v1117_v22 = vsel %vm6087_vm0, %v572_v62, 0.0  ;;  %v1446_v18 = vrot.slane %v572_v62, 1  ;;  %v1609_v50 = vpack.c.bf16 %v572_v62, %v572_v62 }
  0xe6   : > { %v1493_v55 = vsel %vm1432_vm4, %v1490_v13, %v1492_v0  ;;  %v1568_v7 = vpack.c.bf16 %v1237_v6, %v1237_v6  ;;  %v1190_v5 = vrot.slane %v1117_v22, 7  ;;  %v562_v1 = vpop.f32.mrf.mxu3  ;;  %v5243_v46 = vld [vmem:[#allocation2 + $0x64] sm:$0xf]  ;;  %v704_v62 = vand.u32 15, %v608_v44 }
  0xe7   : > { %v1695_v9 = vpack.c.bf16 %v1493_v55, %v1493_v55  ;;  %v1447_v57 = vsel %vm1432_vm4, %v1444_v36, %v1446_v18  ;;  %1641 = vst [vmem:[#allocation2 + $0x70] sm:$0xf] %v1609_v50  ;;  %v563_v2 = vadd.f32 %v5778_v33, %v562_v1  ;;  %v5235_v50 = vld [vmem:[#allocation2 + $0x20] sm:$0xf0]  ;;  %v609_v1 = vadd.s32 88, %v5780_v34 }
  0xe8   : > { %1600 = vst [vmem:[#allocation2 + $0x180] sm:$0xf] %v1568_v7  ;;  %v1191_v11 = vsel %vm1176_vm3, %v1188_v31, %v1190_v5  ;;  %v1672_v12 = vpack.c.bf16 %v1447_v57, %v1447_v57  ;;  %v505_v14 = vpop.f32.mrf.mxu0  ;;  %vm1282_vm6 = vcmp.ne.s32.totalorder %v704_v62, 0 }
  0xe9   : > { %1727 = vst [vmem:[#allocation2 + $0x17c] sm:$0xf] %v1695_v9  ;;  %v1545_v13 = vpack.c.bf16 %v1191_v11, %v1191_v11  ;;  %v596_v15 = vmax.f32 %v563_v2, 0.0  ;;  %v506_v19 = vadd.f32 %v5778_v33, %v505_v14 }
  0xea   : > { %1704 = vst [vmem:[#allocation2 + $0x68] sm:$0xf] %v1672_v12  ;;  %v711_v12 = vand.u32 15, %v609_v1  ;;  %v5241_v1 = vld [vmem:[#allocation2 + $0x50] sm:$0xf0] }
  0xeb   : > { %1577 = vst [vmem:[#allocation2 + $0x6c] sm:$0xf] %v1545_v13  ;;  %v1141_v20 = vsel %vm1045_vm1, %v596_v15, 0.0  ;;  %v1494_v25 = vrot.slane %v596_v15, 1  ;;  %v1633_v31 = vpack.c.bf16 %v596_v15, %v596_v15  ;;  %v573_v32 = vmax.f32 %v506_v19, 0.0 }
  0xec   : > { %v1143_v35 = vrot.slane %v1141_v20, 7  ;;  %vm1025_vm7 = vcmp.ne.s32.totalorder %v711_v12, 15 }
  0xed   : > { %v1495_v41 = vsel %vm1432_vm4, %v1492_v0, %v1494_v25  ;;  %v1529_v36 = vsel %vm1432_vm4, %v1494_v25, %v5825_v63  ;;  %1665 = vst [vmem:[#allocation2 + $0x190] sm:$0xf] %v1633_v31  ;;  %v1192_v42 = vrot.slane %v573_v32, 7  ;;  %v1376_v26 = vsel %vm6105_vm2, %v573_v32, 0.0 }
  0xee   : > { %v1238_v43 = vsel %vm1176_vm3, %v1236_v59, %v1143_v35  ;;  %v1271_v29 = vsel %vm1176_vm3, %v1143_v35, %v1177_v3  ;;  %v1696_v45 = vpack.c.bf16 %v1495_v41, %v1495_v41  ;;  %v1697_v47 = vpack.c.bf16 %v1529_v36, %v1529_v36  ;;  %v4494_v28 = vld [vmem:[#allocation2 + $0x6c] sm:$0xf0] }
  0xef   : > { %v1538_v17 = vpack.c.bf16 %v1271_v29, %v1271_v29  ;;  %v1569_v21 = vpack.c.bf16 %v1238_v43, %v1238_v43  ;;  %v1193_v63 = vsel %vm1176_vm3, %v1190_v5, %v1192_v42  ;;  %v1448_v48 = vrot.slane %v1376_v26, 1  ;;  %v5238_v43 = vld [vmem:[#allocation2 + $0x38] sm:$0xf0] }
  0xf0   : > { %1728 = vst [vmem:[#allocation2 + $0x188] sm:$0xf] %v1696_v45  ;;  %v1546_v49 = vpack.c.bf16 %v1193_v63, %v1193_v63  ;;  %v507_v51 = vpop.f32.mrf.mxu0  ;;  %v6120_v52 = vor.u32 %v5243_v46, %v4494_v28  ;;  %v1610_v40 = vpack.c.bf16 %v573_v32, %v573_v32  ;;  %v610_v32 = vadd.s32 96, %v5780_v34 }
  0xf1   : > { %1570 = vst [vmem:[#allocation2 + $0x18] sm:$0xf] %v1538_v17  ;;  %v1449_v27 = vsel %vm1432_vm4, %v1446_v18, %v1448_v48  ;;  %v508_v3 = vadd.f32 %v5778_v33, %v507_v51  ;;  %v4468_v17 = vld [vmem:[#allocation2 + $0x30] sm:$0xf]  ;;  %v611_v46 = vadd.s32 104, %v5780_v34 }
  0xf2   : > { %1601 = vst [vmem:[#allocation2 + $0x18c] sm:$0xf] %v1569_v21  ;;  %v1673_v39 = vpack.c.bf16 %v1449_v27, %v1449_v27  ;;  %2412 = vmatmul.bf16.gmra.mxu2 %v6120_v52  ;;  %v718_v26 = vand.u32 15, %v610_v32 }
  0xf3   : > { %1729 = vst [vmem:[#allocation2 + $0x194] sm:$0xf] %v1697_v47  ;;  %v574_v54 = vmax.f32 %v508_v3, 0.0 }
  0xf4   : > { %1578 = vst [vmem:[#allocation2 + $0x78] sm:$0xf] %v1546_v49  ;;  %vm1284_vm8 = vcmp.ne.s32.totalorder %v718_v26, 0 }
  0xf5   : > { %1642 = vst [vmem:[#allocation2 + $0x7c] sm:$0xf] %v1610_v40  ;;  %v1119_v56 = vsel %vm1023_vm5, %v574_v54, 0.0  ;;  %v1450_v59 = vrot.slane %v574_v54, 1  ;;  %v1611_v58 = vpack.c.bf16 %v574_v54, %v574_v54 }
  0xf6   : > { %1705 = vst [vmem:[#allocation2 + $0x74] sm:$0xf] %v1673_v39  ;;  %v1194_v61 = vrot.slane %v1119_v56, 7  ;;  %v725_v39 = vand.u32 15, %v611_v46 }
  0xf7   : > { %v1451_v0 = vsel %vm1432_vm4, %v1448_v48, %v1450_v59  ;;  %1643 = vst [vmem:[#allocation2 + $0x88] sm:$0xf] %v1611_v58  ;;  %v4469_v48 = vor.u32 %v5238_v43, %v4468_v17  ;;  %v5297_v17 = vld [vmem:[%s7222_s3 + $0x138] sm:$0xff] }
  0xf8   : > { %v1195_v4 = vsel %vm1176_vm3, %v1192_v42, %v1194_v61  ;;  %v1674_v6 = vpack.c.bf16 %v1451_v0, %v1451_v0  ;;  %v510_v22 = vpop.f32.mrf.mxu0  ;;  %v4456_v18 = vld [vmem:[#allocation2 + $0x18] sm:$0xf]  ;;  %vm1027_vm9 = vcmp.ne.s32.totalorder %v725_v39, 15  ;;  %2811 = vmatpush.bf16.msrb.mxu1 %v5297_v17  ;;  %v4492_v39 = vld [vmem:[#allocation2 + $0x60] sm:$0xf] }
  0xf9   : > { %v1547_v55 = vpack.c.bf16 %v1195_v4, %v1195_v4  ;;  %v511_v7 = vadd.f32 %v5778_v33, %v510_v22  ;;  %v4457_v5 = vor.u32 %v5235_v50, %v4456_v18 }
  0xfa   : > { %1706 = vst [vmem:[#allocation2 + $0x80] sm:$0xf] %v1674_v6  ;;  %v612_v6 = vadd.s32 112, %v5780_v34 }
  0xfb   : > { %1579 = vst [vmem:[#allocation2 + $0x84] sm:$0xf] %v1547_v55  ;;  %v575_v8 = vmax.f32 %v511_v7, 0.0  ;;  %2308 = vmatmul.bf16.gmra.mxu1 %v4457_v5  ;;  %2730 = vmatmul.bf16.vlgmr.msrb.gmra.mxu0 %v4457_v5 }
  0xfc   : > { %v5246_v14 = vld [vmem:[#allocation2 + $0x7c] sm:$0xf]  ;;  %v732_v5 = vand.u32 15, %v612_v6 }
  0xfd   : > { %v1196_v9 = vrot.slane %v575_v8, 7  ;;  %v1378_v57 = vsel %vm1282_vm6, %v575_v8, 0.0  ;;  %v1612_v2 = vpack.c.bf16 %v575_v8, %v575_v8 }
  0xfe   : > { %v1452_v11 = vrot.slane %v1378_v57, 1  ;;  %v4506_v23 = vld [vmem:[#allocation2 + $0x84] sm:$0xf0]  ;;  %vm1286_vm10 = vcmp.ne.s32.totalorder %v732_v5, 0 }
  0xff   : > { %v1197_v13 = vsel %vm1176_vm3, %v1194_v61, %v1196_v9  ;;  %1644 = vst [vmem:[#allocation2 + $0x94] sm:$0xf] %v1612_v2  ;;  %v6131_v15 = vor.u32 %v5246_v14, %v4506_v23 }
 0x100   : > { %v1453_v19 = vsel %vm1432_vm4, %v1450_v59, %v1452_v11  ;;  %v1548_v16 = vpack.c.bf16 %v1197_v13, %v1197_v13  ;;  %v512_v20 = vpop.f32.mrf.mxu0  ;;  %v613_v13 = vadd.s32 120, %v5780_v34 }
 0x101   : > { %v1675_v25 = vpack.c.bf16 %v1453_v19, %v1453_v19  ;;  %v513_v31 = vadd.f32 %v5778_v33, %v512_v20 }
 0x102   : > { %1580 = vst [vmem:[#allocation2 + $0x90] sm:$0xf] %v1548_v16  ;;  %2417 = vmatmul.bf16.gmra.mxu2 %v6131_v15  ;;  %v739_v32 = vand.u32 15, %v613_v13 }
 0x103   : > { %1707 = vst [vmem:[#allocation2 + $0x8c] sm:$0xf] %v1675_v25  ;;  %v576_v35 = vmax.f32 %v513_v31, 0.0 }
 0x104   : > { %vm1029_vm11 = vcmp.ne.s32.totalorder %v739_v32, 15 }
 0x105   : > { %v1121_v38 = vsel %vm1025_vm7, %v576_v35, 0.0  ;;  %v1454_v41 = vrot.slane %v576_v35, 1  ;;  %v1613_v36 = vpack.c.bf16 %v576_v35, %v576_v35 }
 0x106   : > { %v1198_v42 = vrot.slane %v1121_v38, 7  ;;  %v5249_v44 = vld [vmem:[#allocation2 + $0x94] sm:$0xf] }
 0x107   : > { %v1455_v29 = vsel %vm1432_vm4, %v1452_v11, %v1454_v41  ;;  %1645 = vst [vmem:[#allocation2 + $0xa0] sm:$0xf] %v1613_v36  ;;  %v4480_v11 = vld [vmem:[#allocation2 + $0x48] sm:$0xf] }
 0x108   : > { %v1199_v45 = vsel %vm1176_vm3, %v1196_v9, %v1198_v42  ;;  %v1676_v47 = vpack.c.bf16 %v1455_v29, %v1455_v29  ;;  %v515_v28 = vpop.f32.mrf.mxu0  ;;  %v4481_v23 = vor.u32 %v5241_v1, %v4480_v11 }
 0x109   : > { %v1549_v21 = vpack.c.bf16 %v1199_v45, %v1199_v45  ;;  %v516_v63 = vadd.f32 %v5778_v33, %v515_v28 }
 0x10a   : > { %1708 = vst [vmem:[#allocation2 + $0x98] sm:$0xf] %v1676_v47  ;;  %v614_v47 = vadd.s32 128, %v5780_v34 }
 0x10b   : > { %1581 = vst [vmem:[#allocation2 + $0x9c] sm:$0xf] %v1549_v21  ;;  %v577_v49 = vmax.f32 %v516_v63, 0.0  ;;  %2313 = vmatmul.bf16.gmra.mxu1 %v4469_v48  ;;  %2735 = vmatmul.bf16.gmra.mxu0 %v4469_v48 }
 0x10d   : > { %v1200_v51 = vrot.slane %v577_v49, 7  ;;  %v1380_v27 = vsel %vm1284_vm8, %v577_v49, 0.0  ;;  %v1614_v40 = vpack.c.bf16 %v577_v49, %v577_v49  ;;  %v746_v49 = vand.u32 15, %v614_v47 }
 0x10e   : > { %v1456_v3 = vrot.slane %v1380_v27, 1  ;;  %v4518_v54 = vld [vmem:[#allocation2 + $0x9c] sm:$0xf0] }
 0x10f   : > { %v1201_v56 = vsel %vm1176_vm3, %v1198_v42, %v1200_v51  ;;  %1646 = vst [vmem:[#allocation2 + $0xac] sm:$0xf] %v1614_v40  ;;  %v6142_v59 = vor.u32 %v5249_v44, %v4518_v54  ;;  %v6167_v54 = vld [vmem:[%s7221_s2] ss:$0 sm:$0xff]  ;;  %vm1288_vm12 = vcmp.ne.s32.totalorder %v746_v49, 0 }
 0x110   : > { %v1457_v58 = vsel %vm1432_vm4, %v1454_v41, %v1456_v3  ;;  %v1550_v61 = vpack.c.bf16 %v1201_v56, %v1201_v56  ;;  %v517_v62 = vpop.f32.mrf.mxu0 }
 0x111   : > { %v1677_v0 = vpack.c.bf16 %v1457_v58, %v1457_v58  ;;  %v518_v4 = vadd.f32 %v5778_v33, %v517_v62 }
 0x112   : > { %1582 = vst [vmem:[#allocation2 + $0xa8] sm:$0xf] %v1550_v61  ;;  %2422 = vmatmul.bf16.gmra.mxu2 %v6142_v59  ;;  %v615_v61 = vadd.s32 136, %v5780_v34 }
 0x113   : > { %1709 = vst [vmem:[#allocation2 + $0xa4] sm:$0xf] %v1677_v0  ;;  %v578_v22 = vmax.f32 %v518_v4, 0.0 }
 0x115   : > { %v1123_v18 = vsel %vm1027_vm9, %v578_v22, 0.0  ;;  %v1458_v50 = vrot.slane %v578_v22, 1  ;;  %v1615_v55 = vpack.c.bf16 %v578_v22, %v578_v22 }
 0x116   : > { %v1202_v7 = vrot.slane %v1123_v18, 7  ;;  %v5252_v35 = vld [vmem:[#allocation2 + $0xac] sm:$0xf]  ;;  %v753_v18 = vand.u32 15, %v615_v61 }
 0x117   : > { %v1459_v8 = vsel %vm1432_vm4, %v1456_v3, %v1458_v50  ;;  %1647 = vst [vmem:[#allocation2 + $0xb8] sm:$0xf] %v1615_v55 }
 0x118   : > { %v1203_v9 = vsel %vm1176_vm3, %v1200_v51, %v1202_v7  ;;  %v1678_v57 = vpack.c.bf16 %v1459_v8, %v1459_v8  ;;  %v520_v2 = vpop.f32.mrf.mxu0  ;;  %v5244_v51 = vld [vmem:[#allocation2 + $0x68] sm:$0xf0]  ;;  %vm1031_vm13 = vcmp.ne.s32.totalorder %v753_v18, 15 }
 0x119   : > { %v1551_v12 = vpack.c.bf16 %v1203_v9, %v1203_v9  ;;  %v521_v14 = vadd.f32 %v5778_v33, %v520_v2  ;;  %v4493_v58 = vor.u32 %v5244_v51, %v4492_v39 }
 0x11a   : > { %1710 = vst [vmem:[#allocation2 + $0xb0] sm:$0xf] %v1678_v57  ;;  %v6175_v57 = vpop.f32.mrf.mxu2 }
 0x11b   : > { %1583 = vst [vmem:[#allocation2 + $0xb4] sm:$0xf] %v1551_v12  ;;  %v579_v19 = vmax.f32 %v521_v14, 0.0  ;;  %2318 = vmatmul.bf16.gmra.mxu1 %v4481_v23  ;;  %2740 = vmatmul.bf16.gmra.mxu0 %v4481_v23  ;;  %v616_v12 = vadd.s32 144, %v5780_v34 }
 0x11d   : > { %v1204_v16 = vrot.slane %v579_v19, 7  ;;  %v1382_v20 = vsel %vm1286_vm10, %v579_v19, 0.0  ;;  %v1616_v25 = vpack.c.bf16 %v579_v19, %v579_v19 }
 0x11e   : > { %v1460_v31 = vrot.slane %v1382_v20, 1  ;;  %v4530_v38 = vld [vmem:[#allocation2 + $0xb4] sm:$0xf0]  ;;  %v760_v20 = vand.u32 15, %v616_v12 }
 0x11f   : > { %v1205_v41 = vsel %vm1176_vm3, %v1202_v7, %v1204_v16  ;;  %1648 = vst [vmem:[#allocation2 + $0xc4] sm:$0xf] %v1616_v25  ;;  %v6153_v36 = vor.u32 %v5252_v35, %v4530_v38  ;;  %v5247_v25 = vld [vmem:[#allocation2 + $0x80] sm:$0xf0] }
 0x120   : > { %v1461_v42 = vsel %vm1432_vm4, %v1458_v50, %v1460_v31  ;;  %v1552_v26 = vpack.c.bf16 %v1205_v41, %v1205_v41  ;;  %v522_v43 = vpop.f32.mrf.mxu0  ;;  %vm1290_vm14 = vcmp.ne.s32.totalorder %v760_v20, 0  ;;  %v619_v20 = vadd.s32 168, %v5780_v34 }
 0x121   : > { %v1679_v29 = vpack.c.bf16 %v1461_v42, %v1461_v42  ;;  %v523_v45 = vadd.f32 %v5778_v33, %v522_v43  ;;  %v4504_v42 = vld [vmem:[#allocation2 + $0x78] sm:$0xf] }
 0x122   : > { %1584 = vst [vmem:[#allocation2 + $0xc0] sm:$0xf] %v1552_v26  ;;  %2427 = vmatmul.bf16.gmra.mxu2 %v6153_v36  ;;  %v6187_v47 = vpop.f32.mrf.mxu2 }
 0x123   : > { %1711 = vst [vmem:[#allocation2 + $0xbc] sm:$0xf] %v1679_v29  ;;  %v580_v28 = vmax.f32 %v523_v45, 0.0  ;;  %v4505_v29 = vor.u32 %v5247_v25, %v4504_v42  ;;  %v617_v45 = vadd.s32 152, %v5780_v34  ;;  %v5300_v25 = vld [vmem:[%s7222_s3 + $0x150] sm:$0xff]  ;;  %v5299_v42 = vld [vmem:[%s7222_s3 + $0x148] sm:$0xff] }
 0x125   : > { %v1125_v21 = vsel %vm1029_vm11, %v580_v28, 0.0  ;;  %v1462_v63 = vrot.slane %v580_v28, 1  ;;  %v1617_v48 = vpack.c.bf16 %v580_v28, %v580_v28  ;;  %v5304_v28 = vld [vmem:[%s7222_s3 + $0x170] sm:$0xff]  ;;  %v767_v49 = vand.u32 15, %v617_v45 }
 0x126   : > { %v1206_v46 = vrot.slane %v1125_v21, 7  ;;  %v5255_v50 = vld [vmem:[#allocation2 + $0xc4] sm:$0xf]  ;;  %v5296_v21 = vld [vmem:[%s7222_s3 + $0x130] sm:$0xff] }
 0x127   : > { %v1463_v33 = vsel %vm1432_vm4, %v1460_v31, %v1462_v63  ;;  %1649 = vst [vmem:[#allocation2 + $0xd0] sm:$0xf] %v1617_v48  ;;  %v5305_v31 = vld [vmem:[%s7222_s3 + $0x178] sm:$0xff]  ;;  %2812 = vmatpush.bf16.msrb.mxu1 %v5296_v21  ;;  %vm1033_vm15 = vcmp.ne.s32.totalorder %v767_v49, 15 }
 0x128   : > { %v1207_v27 = vsel %vm1176_vm3, %v1204_v16, %v1206_v46  ;;  %v1680_v40 = vpack.c.bf16 %v1463_v33, %v1463_v33  ;;  %v525_v3 = vpop.f32.mrf.mxu0  ;;  %2900 = vmatpush.bf16.msrb.mxu2 %v5305_v31 }
 0x129   : > { %v1553_v44 = vpack.c.bf16 %v1207_v27, %v1207_v27  ;;  %v526_v56 = vadd.f32 %v6167_v54, %v525_v3 }
 0x12a   : > { %1712 = vst [vmem:[#allocation2 + $0xc8] sm:$0xf] %v1680_v40  ;;  %v5303_v40 = vld [vmem:[%s7222_s3 + $0x168] sm:$0xff] }
 0x12b   : > { %1585 = vst [vmem:[#allocation2 + $0xcc] sm:$0xf] %v1553_v44  ;;  %v581_v62 = vmax.f32 %v526_v56, 0.0  ;;  %2323 = vmatmul.bf16.gmra.mxu1 %v4493_v58  ;;  %2745 = vmatmul.bf16.gmra.mxu0 %v4493_v58 }
 0x12c   : > { %2901 = vmatpush.bf16.msrb.mxu2 %v5304_v28 }
 0x12d   : > { %v1208_v0 = vrot.slane %v581_v62, 7  ;;  %v1384_v4 = vsel %vm1288_vm12, %v581_v62, 0.0  ;;  %v1618_v6 = vpack.c.bf16 %v581_v62, %v581_v62 }
 0x12e   : > { %v1464_v22 = vrot.slane %v1384_v4, 1  ;;  %v4542_v55 = vld [vmem:[#allocation2 + $0xcc] sm:$0xf0]  ;;  %v5302_v4 = vld [vmem:[%s7222_s3 + $0x160] sm:$0xff] }
 0x12f   : > { %v1209_v7 = vsel %vm1176_vm3, %v1206_v46, %v1208_v0  ;;  %1650 = vst [vmem:[#allocation2 + $0xdc] sm:$0xf] %v1618_v6  ;;  %v6172_v5 = vor.u32 %v5255_v50, %v4542_v55 }
 0x130   : > { %v1465_v1 = vsel %vm1432_vm4, %v1462_v63, %v1464_v22  ;;  %v1554_v8 = vpack.c.bf16 %v1209_v7, %v1209_v7  ;;  %v527_v9 = vpop.f32.mrf.mxu0  ;;  %2902 = vmatpush.bf16.msrb.mxu2 %v5303_v40 }
 0x131   : > { %v1681_v2 = vpack.c.bf16 %v1465_v1, %v1465_v1  ;;  %v528_v11 = vadd.f32 %v6167_v54, %v527_v9  ;;  %v5301_v9 = vld [vmem:[%s7222_s3 + $0x158] sm:$0xff] }
 0x132   : > { %1586 = vst [vmem:[#allocation2 + $0xd8] sm:$0xf] %v1554_v8  ;;  %2432 = vmatmul.bf16.gmra.mxu2 %v6172_v5  ;;  %v5250_v8 = vld [vmem:[#allocation2 + $0x98] sm:$0xf0] }
 0x133   : > { %1713 = vst [vmem:[#allocation2 + $0xd4] sm:$0xf] %v1681_v2  ;;  %v582_v14 = vmax.f32 %v528_v11, 0.0 }
 0x134   : > { %2903 = vmatpush.bf16.msrb.mxu2 %v5302_v4  ;;  %v5253_v4 = vld [vmem:[#allocation2 + $0xb0] sm:$0xf0] }
 0x135   : > { %v1127_v23 = vsel %vm1031_vm13, %v582_v14, 0.0  ;;  %v1466_v13 = vrot.slane %v582_v14, 1  ;;  %v1619_v19 = vpack.c.bf16 %v582_v14, %v582_v14 }
 0x136   : > { %v1210_v16 = vrot.slane %v1127_v23, 7  ;;  %v5258_v33 = vld [vmem:[#allocation2 + $0xdc] sm:$0xf]  ;;  %v4516_v23 = vld [vmem:[#allocation2 + $0x90] sm:$0xf] }
 0x137   : > { %v1467_v32 = vsel %vm1432_vm4, %v1464_v22, %v1466_v13  ;;  %1651 = vst [vmem:[#allocation2 + $0xe8] sm:$0xf] %v1619_v19 }
 0x138   : > { %v1211_v35 = vsel %vm1176_vm3, %v1208_v0, %v1210_v16  ;;  %v1682_v38 = vpack.c.bf16 %v1467_v32, %v1467_v32  ;;  %v530_v41 = vpop.f32.mrf.mxu0  ;;  %v618_v0 = vadd.s32 160, %v5780_v34  ;;  %2904 = vmatpush.bf16.msrb.mxu2 %v5301_v9 }
 0x139   : > { %v1555_v26 = vpack.c.bf16 %v1211_v35, %v1211_v35  ;;  %v531_v43 = vadd.f32 %v6167_v54, %v530_v41 }
 0x13a   : > { %1714 = vst [vmem:[#allocation2 + $0xe0] sm:$0xf] %v1682_v38  ;;  %v774_v1 = vand.u32 15, %v618_v0 }
 0x13b   : > { %1587 = vst [vmem:[#allocation2 + $0xe4] sm:$0xf] %v1555_v26  ;;  %v583_v17 = vmax.f32 %v531_v43, 0.0  ;;  %2328 = vmatmul.bf16.gmra.mxu1 %v4505_v29  ;;  %2750 = vmatmul.bf16.gmra.mxu0 %v4505_v29  ;;  %v5295_v26 = vld [vmem:[%s7222_s3 + $0x128] sm:$0xff]  ;;  %v781_v29 = vand.u32 15, %v619_v20 }
 0x13c   : > { %vm1292_vm0 = vcmp.ne.s32.totalorder %v774_v1, 0  ;;  %2905 = vmatpush.bf16.msrb.mxu2 %v5300_v25  ;;  %2813 = vmatpush.bf16.msrb.mxu1 %v5295_v26 }
 0x13d   : > { %v1212_v63 = vrot.slane %v583_v17, 7  ;;  %v1386_v48 = vsel %vm1290_vm14, %v583_v17, 0.0  ;;  %v1620_v46 = vpack.c.bf16 %v583_v17, %v583_v17  ;;  %vm1035_vm1 = vcmp.ne.s32.totalorder %v781_v29, 15 }
 0x13e   : > { %v1468_v51 = vrot.slane %v1386_v48, 1  ;;  %v4554_v27 = vld [vmem:[#allocation2 + $0xe4] sm:$0xf0] }
 0x13f   : > { %v1213_v3 = vsel %vm1176_vm3, %v1210_v16, %v1212_v63  ;;  %1652 = vst [vmem:[#allocation2 + $0xf4] sm:$0xf] %v1620_v46  ;;  %v6199_v39 = vor.u32 %v5258_v33, %v4554_v27  ;;  %v4517_v16 = vor.u32 %v5250_v8, %v4516_v23  ;;  %v5298_v33 = vld [vmem:[%s7222_s3 + $0x140] sm:$0xff] }
 0x140   : > { %v1469_v44 = vsel %vm1432_vm4, %v1466_v13, %v1468_v51  ;;  %v1556_v56 = vpack.c.bf16 %v1213_v3, %v1213_v3  ;;  %v532_v58 = vpop.f32.mrf.mxu0  ;;  %2906 = vmatpush.bf16.msrb.mxu2 %v5299_v42  ;;  %v620_v3 = vadd.s32 176, %v5780_v34 }
 0x141   : > { %v1683_v61 = vpack.c.bf16 %v1469_v44, %v1469_v44  ;;  %v533_v62 = vadd.f32 %v6167_v54, %v532_v58 }
 0x142   : > { %1588 = vst [vmem:[#allocation2 + $0xf0] sm:$0xf] %v1556_v56  ;;  %2437 = vmatmul.bf16.gmra.mxu2 %v6199_v39  ;;  %v788_v0 = vand.u32 15, %v620_v3  ;;  %v4540_v3 = vld [vmem:[#allocation2 + $0xc0] sm:$0xf] }
 0x143   : > { %1715 = vst [vmem:[#allocation2 + $0xec] sm:$0xf] %v1683_v61  ;;  %v584_v6 = vmax.f32 %v533_v62, 0.0 }
 0x144   : > { %v6208_v22 = vpop.f32.mrf.mxu2  ;;  %2907 = vmatpush.bf16.msrb.mxu2 %v5298_v33  ;;  %vm1294_vm2 = vcmp.ne.s32.totalorder %v788_v0, 0  ;;  %v4464_v0 = vld [vmem:[#allocation2 + $0x20] sm:$0xf] }
 0x145   : > { %v1129_v18 = vsel %vm1033_vm15, %v584_v6, 0.0  ;;  %v1470_v50 = vrot.slane %v584_v6, 1  ;;  %v1621_v55 = vpack.c.bf16 %v584_v6, %v584_v6 }
 0x146   : > { %v1214_v7 = vrot.slane %v1129_v18, 7  ;;  %v5261_v45 = vld [vmem:[#allocation2 + $0xf4] sm:$0xf] }
 0x147   : > { %v1471_v2 = vsel %vm1432_vm4, %v1468_v51, %v1470_v50  ;;  %1653 = vst [vmem:[#allocation2 + $0x100] sm:$0xf] %v1621_v55 }
 0x148   : > { %v1215_v11 = vsel %vm1176_vm3, %v1212_v63, %v1214_v7  ;;  %v1684_v12 = vpack.c.bf16 %v1471_v2, %v1471_v2  ;;  %v535_v14 = vpop.f32.mrf.mxu0  ;;  %v2304_v63 = vpop.f32.mrf.mxu1  ;;  %v621_v2 = vadd.s32 184, %v5780_v34 }
 0x149   : > { %v1557_v13 = vpack.c.bf16 %v1215_v11, %v1215_v11  ;;  %v536_v19 = vadd.f32 %v6167_v54, %v535_v14  ;;  %v6233_v51 = vadd.f32 %v6175_v57, %v2304_v63 }
 0x14a   : > { %1716 = vst [vmem:[#allocation2 + $0xf8] sm:$0xf] %v1684_v12 }
 0x14b   : > { %1589 = vst [vmem:[#allocation2 + $0xfc] sm:$0xf] %v1557_v13  ;;  %v585_v31 = vmax.f32 %v536_v19, 0.0  ;;  %2333 = vmatmul.bf16.gmra.mxu1 %v4517_v16  ;;  %2755 = vmatmul.bf16.gmra.mxu0 %v4517_v16  ;;  %v795_v16 = vand.u32 15, %v621_v2 }
 0x14c   : > { %v6220_v32 = vpop.f32.mrf.mxu2 }
 0x14d   : > { %v1216_v35 = vrot.slane %v585_v31, 7  ;;  %v1388_v38 = vsel %vm1292_vm0, %v585_v31, 0.0  ;;  %v1622_v41 = vpack.c.bf16 %v585_v31, %v585_v31  ;;  %vm1037_vm5 = vcmp.ne.s32.totalorder %v795_v16, 15 }
 0x14e   : > { %v1472_v43 = vrot.slane %v1388_v38, 1  ;;  %v4566_v28 = vld [vmem:[#allocation2 + $0xfc] sm:$0xf0] }
 0x14f   : > { %v1217_v17 = vsel %vm1176_vm3, %v1214_v7, %v1216_v35  ;;  %1654 = vst [vmem:[#allocation2 + $0x10c] sm:$0xf] %v1622_v41  ;;  %v6229_v21 = vor.u32 %v5261_v45, %v4566_v28  ;;  %v4528_v7 = vld [vmem:[#allocation2 + $0xa8] sm:$0xf] }
 0x150   : > { %v1473_v48 = vsel %vm1432_vm4, %v1470_v50, %v1472_v43  ;;  %v1558_v46 = vpack.c.bf16 %v1217_v17, %v1217_v17  ;;  %v537_v49 = vpop.f32.mrf.mxu0  ;;  %v4529_v9 = vor.u32 %v5253_v4, %v4528_v7  ;;  %v5294_v17 = vld [vmem:[%s7222_s3 + $0x120] sm:$0xff] }
 0x151   : > { %v1685_v27 = vpack.c.bf16 %v1473_v48, %v1473_v48  ;;  %v538_v40 = vadd.f32 %v6167_v54, %v537_v49  ;;  %v5256_v48 = vld [vmem:[#allocation2 + $0xc8] sm:$0xf0]  ;;  %2814 = vmatpush.bf16.msrb.mxu1 %v5294_v17  ;;  %v5242_v17 = vld [vmem:[#allocation2 + $0x58] sm:$0xf0] }
 0x152   : > { %1590 = vst [vmem:[#allocation2 + $0x108] sm:$0xf] %v1558_v46  ;;  %2442 = vmatmul.bf16.gmra.mxu2 %v6229_v21 }
 0x153   : > { %1717 = vst [vmem:[#allocation2 + $0x104] sm:$0xf] %v1685_v27  ;;  %v586_v44 = vmax.f32 %v538_v40, 0.0 }
 0x154   : > { %v6241_v56 = vpop.f32.mrf.mxu2 }
 0x155   : > { %v1131_v57 = vsel %vm1035_vm1, %v586_v44, 0.0  ;;  %v1474_v58 = vrot.slane %v586_v44, 1  ;;  %v1623_v61 = vpack.c.bf16 %v586_v44, %v586_v44 }
 0x156   : > { %v1218_v62 = vrot.slane %v1131_v57, 7  ;;  %v5264_v20 = vld [vmem:[#allocation2 + $0x10c] sm:$0xf] }
 0x157   : > { %v1475_v6 = vsel %vm1432_vm4, %v1472_v43, %v1474_v58  ;;  %1655 = vst [vmem:[#allocation2 + $0x118] sm:$0xf] %v1623_v61  ;;  %v4541_v61 = vor.u32 %v5256_v48, %v4540_v3  ;;  %v4488_v48 = vld [vmem:[#allocation2 + $0x50] sm:$0xf] }
 0x158   : > { %v1219_v18 = vsel %vm1176_vm3, %v1216_v35, %v1218_v62  ;;  %v1686_v50 = vpack.c.bf16 %v1475_v6, %v1475_v6  ;;  %v540_v55 = vpop.f32.mrf.mxu0 }
 0x159   : > { %v1559_v1 = vpack.c.bf16 %v1219_v18, %v1219_v18  ;;  %v541_v8 = vadd.f32 %v6167_v54, %v540_v55 }
 0x15a   : > { %1718 = vst [vmem:[#allocation2 + $0x110] sm:$0xf] %v1686_v50  ;;  %v5259_v50 = vld [vmem:[#allocation2 + $0xe0] sm:$0xf0] }
 0x15b   : > { %1591 = vst [vmem:[#allocation2 + $0x114] sm:$0xf] %v1559_v1  ;;  %v587_v11 = vmax.f32 %v541_v8, 0.0  ;;  %2338 = vmatmul.bf16.gmra.mxu1 %v4529_v9  ;;  %2760 = vmatmul.bf16.gmra.mxu0 %v4529_v9  ;;  %v4552_v1 = vld [vmem:[#allocation2 + $0xd8] sm:$0xf] }
 0x15c   : > { %v6247_v13 = vpop.f32.mrf.mxu2  ;;  %v4553_v9 = vor.u32 %v5259_v50, %v4552_v1  ;;  %v5331_v50 = vld [vmem:[%s7222_s3 + $0xb0] sm:$0xff] }
 0x15d   : > { %v1220_v12 = vrot.slane %v587_v11, 7  ;;  %v1390_v14 = vsel %vm1294_vm2, %v587_v11, 0.0  ;;  %v1624_v23 = vpack.c.bf16 %v587_v11, %v587_v11  ;;  %v5239_v11 = vld [vmem:[#allocation2 + $0x40] sm:$0xf0] }
 0x15e   : > { %v1476_v19 = vrot.slane %v1390_v14, 1  ;;  %v4578_v25 = vld [vmem:[#allocation2 + $0x114] sm:$0xf0] }
 0x15f   : > { %v1221_v31 = vsel %vm1176_vm3, %v1218_v62, %v1220_v12  ;;  %1656 = vst [vmem:[#allocation2 + $0x124] sm:$0xf] %v1624_v23  ;;  %v6250_v35 = vor.u32 %v5264_v20, %v4578_v25  ;;  %v6267_v62 = vpop.f32.mrf.mxu1  ;;  %v4476_v14 = vld [vmem:[#allocation2 + $0x38] sm:$0xf]  ;;  %v5292_v25 = vld [vmem:[%s7222_s3 + $0x110] sm:$0xff] }
 0x160   : > { %v1477_v34 = vsel %vm1432_vm4, %v1474_v58, %v1476_v19  ;;  %v1560_v38 = vpack.c.bf16 %v1221_v31, %v1221_v31  ;;  %v542_v41 = vpop.f32.mrf.mxu0  ;;  %v6289_v16 = vor.u32 %v5239_v11, %v4476_v14  ;;  %v5271_v31 = vld [vmem:[#allocation2 + $0x140] sm:$0xf0]  ;;  %v5277_v14 = vld [vmem:[#allocation2 + $0x170] sm:$0xf0] }
 0x161   : > { %v1687_v42 = vpack.c.bf16 %v1477_v34, %v1477_v34  ;;  %v543_v26 = vadd.f32 %v6167_v54, %v542_v41  ;;  %v5291_v41 = vld [vmem:[%s7222_s3 + $0x108] sm:$0xff] }
 0x162   : > { %1592 = vst [vmem:[#allocation2 + $0x120] sm:$0xf] %v1560_v38  ;;  %2447 = vmatmul.bf16.gmra.mxu2 %v6250_v35 }
 0x163   : > { %1719 = vst [vmem:[#allocation2 + $0x11c] sm:$0xf] %v1687_v42  ;;  %v588_v43 = vmax.f32 %v543_v26, 0.0 }
 0x164   : > { %v6261_v49 = vpop.f32.mrf.mxu2 }
 0x165   : > { %v1133_v29 = vsel %vm1037_vm5, %v588_v43, 0.0  ;;  %v1478_v45 = vrot.slane %v588_v43, 1  ;;  %v1625_v28 = vpack.c.bf16 %v588_v43, %v588_v43  ;;  %v4564_v43 = vld [vmem:[#allocation2 + $0xf0] sm:$0xf] }
 0x166   : > { %v1222_v63 = vrot.slane %v1133_v29, 7 }
 0x167   : > { %v1479_v46 = vsel %vm1432_vm4, %v1476_v19, %v1478_v45  ;;  %v1481_v54 = vsel %vm1432_vm4, %v1478_v45, %v5857_v24  ;;  %1657 = vst [vmem:[#allocation2 + $0x130] sm:$0xf] %v1625_v28  ;;  %v5236_v24 = vld [vmem:[#allocation2 + $0x28] sm:$0xf0]  ;;  %v5290_v28 = vld [vmem:[%s7222_s3 + $0x100] sm:$0xff] }
 0x168   : > { %v1223_v33 = vsel %vm1176_vm3, %v1220_v12, %v1222_v63  ;;  %v1225_v27 = vsel %vm1176_vm3, %v1222_v63, %v1224_v30  ;;  %v1688_v40 = vpack.c.bf16 %v1479_v46, %v1479_v46  ;;  %v1689_v58 = vpack.c.bf16 %v1481_v54, %v1481_v54  ;;  %v5293_v12 = vld [vmem:[%s7222_s3 + $0x118] sm:$0xff] }
 0x169   : > { %v1561_v44 = vpack.c.bf16 %v1223_v33, %v1223_v33  ;;  %v1562_v57 = vpack.c.bf16 %v1225_v27, %v1225_v27  ;;  %v6269_v4 = vor.u32 %v5236_v24, %v4464_v0  ;;  %v4588_v30 = vld [vmem:[#allocation2 + $0x120] sm:$0xf]  ;;  %2815 = vmatpush.bf16.msrb.mxu1 %v5293_v12  ;;  %v6316_v33 = vor.u32 %v5242_v17, %v4488_v48  ;;  %v4612_v27 = vld [vmem:[#allocation2 + $0x150] sm:$0xf]  ;;  %v4576_v24 = vld [vmem:[#allocation2 + $0x108] sm:$0xf] }
 0x16a   : > { %1720 = vst [vmem:[#allocation2 + $0x128] sm:$0xf] %v1688_v40  ;;  %v5274_v40 = vld [vmem:[#allocation2 + $0x158] sm:$0xf0]  ;;  %v4624_v12 = vld [vmem:[#allocation2 + $0x168] sm:$0xf] }
 0x16b   : > { %1593 = vst [vmem:[#allocation2 + $0x12c] sm:$0xf] %v1561_v44  ;;  %2343 = vmatmul.bf16.gmra.mxu1 %v4541_v61  ;;  %2765 = vmatmul.bf16.gmra.mxu0 %v4541_v61  ;;  %v6322_v3 = vor.u32 %v5274_v40, %v4612_v27  ;;  %v5332_v44 = vld [vmem:[%s7222_s3 + $0xb8] sm:$0xff] }
 0x16c   : > { %1594 = vst [vmem:[#allocation2 + $0x138] sm:$0xf] %v1562_v57  ;;  %v6271_v53 = vpop.f32.mrf.mxu2  ;;  %v5265_v57 = vld [vmem:[#allocation2 + $0x110] sm:$0xf0]  ;;  %v5328_v27 = vld [vmem:[%s7222_s3 + $0x98] sm:$0xff] }
 0x16d   : > { %1721 = vst [vmem:[#allocation2 + $0x134] sm:$0xf] %v1689_v58  ;;  %2816 = vmatpush.bf16.msrb.mxu1 %v5292_v25  ;;  %v5330_v25 = vld [vmem:[%s7222_s3 + $0xa8] sm:$0xff] }
 0x171   : > { %2817 = vmatpush.bf16.msrb.mxu1 %v5291_v41 }
 0x172   : > { %2908 = vmatmul.bf16.vlgmr.msrb.gmra.mxu2 %v6269_v4  ;;  %v5268_v6 = vld [vmem:[#allocation2 + $0x128] sm:$0xf0] }
 0x173   : > { %v6274_v18 = vor.u32 %v5268_v6, %v4588_v30  ;;  %v4600_v20 = vld [vmem:[#allocation2 + $0x138] sm:$0xf]  ;;  %v4577_v30 = vor.u32 %v5265_v57, %v4576_v24  ;;  %v5245_v6 = vld [vmem:[#allocation2 + $0x70] sm:$0xf0] }
 0x174   : > { %v6298_v34 = vor.u32 %v5271_v31, %v4600_v20  ;;  %v6344_v20 = vor.u32 %v5277_v14, %v4624_v12  ;;  %v5396_v24 = vld [vmem:[%s7222_s3 + $0x1f8] sm:$0xff] }
 0x175   : > { %2363 = vmatmul.bf16.vlgmr.msrb.gmra.mxu3 %v6274_v18  ;;  %v6282_v2 = vpop.f32.mrf.mxu2  ;;  %2818 = vmatpush.bf16.msrb.mxu1 %v5290_v28 }
 0x176   : > { %2473 = vmatpush.bf16.msrb.mxu3 %v5332_v44  ;;  %3591 = vmatpush.bf16.msra.mxu0 %v5396_v24 }
 0x178   : > { %v2309_v55 = vpop.f32.mrf.mxu1  ;;  %v6277_v7 = vpop.f32.mrf.mxu0 }
 0x179   : > { %v6280_v8 = vadd.f32 %v6208_v22, %v2309_v55  ;;  %v4500_v55 = vld [vmem:[#allocation2 + $0x68] sm:$0xf] }
 0x17a   : > { %2474 = vmatpush.bf16.msrb.mxu3 %v5331_v50  ;;  %v6338_v11 = vor.u32 %v5245_v6, %v4500_v55  ;;  %v4524_v6 = vld [vmem:[#allocation2 + $0x98] sm:$0xf]  ;;  %v5270_v55 = vld [vmem:[#allocation2 + $0x13c] sm:$0xf] }
 0x17b   : > { %2348 = vmatmul.bf16.gmra.mxu1 %v4553_v9  ;;  %2770 = vmatmul.bf16.gmra.mxu0 %v4553_v9 }
 0x17d   : > { %v6300_v38 = vpop.f32.mrf.mxu2 }
 0x17e   : > { %2475 = vmatpush.bf16.msrb.mxu3 %v5330_v25 }
 0x180   : > { %v2311_v23 = vpop.f32.mrf.mxu1  ;;  %v6287_v19 = vpop.f32.mrf.mxu0 }
 0x181   : > { %v6292_v22 = vadd.f32 %v6220_v32, %v2311_v23  ;;  %v5262_v32 = vld [vmem:[#allocation2 + $0xf8] sm:$0xf0] }
 0x182   : > { %2913 = vmatmul.bf16.gmra.mxu2 %v6289_v16  ;;  %v4565_v45 = vor.u32 %v5262_v32, %v4564_v43  ;;  %v5329_v43 = vld [vmem:[%s7222_s3 + $0xa0] sm:$0xff] }
 0x183   : > { %2476 = vmatpush.bf16.msrb.mxu3 %v5329_v43 }
 0x185   : > { %2368 = vmatmul.bf16.gmra.mxu3 %v6298_v34  ;;  %v2418_v63 = vpop.f32.mrf.mxu2 }
 0x187   : > { %2477 = vmatpush.bf16.msrb.mxu3 %v5328_v27  ;;  %v5392_v27 = vld [vmem:[%s7222_s3 + $0x1d8] sm:$0xff] }
 0x188   : > { %v2314_v42 = vpop.f32.mrf.mxu1  ;;  %v6306_v26 = vpop.f32.mrf.mxu0 }
 0x189   : > { %7259 = vst [vmem:[#allocation3_spill] sm:$0xff] %v6306_v26  ;;  %v6309_v29 = vadd.f32 %v6241_v56, %v2314_v42  ;;  %v5248_v42 = vld [vmem:[#allocation2 + $0x88] sm:$0xf0] }
 0x18b   : > { %2353 = vmatmul.bf16.gmra.mxu1 %v4565_v45  ;;  %2775 = vmatmul.bf16.gmra.mxu0 %v4565_v45  ;;  %v4512_v45 = vld [vmem:[#allocation2 + $0x80] sm:$0xf] }
 0x18c   : > { %v6362_v48 = vor.u32 %v5248_v42, %v4512_v45  ;;  %v5393_v45 = vld [vmem:[%s7222_s3 + $0x1e0] sm:$0xff] }
 0x18d   : > { %v2420_v0 = vpop.f32.mrf.mxu2 }
 0x190   : > { %v2316_v46 = vpop.f32.mrf.mxu1  ;;  %v6314_v54 = vpop.f32.mrf.mxu0 }
 0x191   : > { %7260 = vst [vmem:[#allocation4_spill] sm:$0xff] %v6314_v54  ;;  %v6319_v56 = vadd.f32 %v6247_v13, %v2316_v46  ;;  %v4590_v46 = vld [vmem:[#allocation2 + $0x12c] sm:$0xf0] }
 0x192   : > { %2918 = vmatmul.bf16.gmra.mxu2 %v6316_v33 }
 0x195   : > { %2373 = vmatmul.bf16.gmra.mxu3 %v6322_v3  ;;  %v2423_v23 = vpop.f32.mrf.mxu2 }
 0x198   : > { %v2319_v58 = vpop.f32.mrf.mxu1  ;;  %v6328_v61 = vpop.f32.mrf.mxu0 }
 0x199   : > { %7261 = vst [vmem:[#allocation5_spill] sm:$0xff] %v6328_v61  ;;  %v6331_v13 = vadd.f32 %v6261_v49, %v2319_v58 }
 0x19b   : > { %2358 = vmatmul.bf16.gmra.mxu1 %v4577_v30  ;;  %2780 = vmatmul.bf16.gmra.mxu0 %v4577_v30  ;;  %v5327_v30 = vld [vmem:[%s7222_s3 + $0x90] sm:$0xff] }
 0x19c   : > { %2478 = vmatpush.bf16.msrb.mxu3 %v5327_v30  ;;  %v4614_v30 = vld [vmem:[#allocation2 + $0x15c] sm:$0xf0] }
 0x1a0   : > { %v2321_v1 = vpop.f32.mrf.mxu1  ;;  %v6336_v9 = vpop.f32.mrf.mxu0 }
 0x1a1   : > { %7262 = vst [vmem:[#allocation6_spill] sm:$0xff] %v6336_v9  ;;  %v6341_v49 = vadd.f32 %v6271_v53, %v2321_v1  ;;  %v2425_v53 = vpop.f32.mrf.mxu2  ;;  %v4602_v1 = vld [vmem:[#allocation2 + $0x144] sm:$0xf0] }
 0x1a2   : > { %2923 = vmatmul.bf16.gmra.mxu2 %v6338_v11  ;;  %v6396_v25 = vor.u32 %v5270_v55, %v4602_v1  ;;  %v5390_v1 = vld [vmem:[%s7222_s3 + $0x1c8] sm:$0xff] }
 0x1a5   : > { %2378 = vmatmul.bf16.gmra.mxu3 %v6344_v20 }
 0x1a8   : > { %v2324_v31 = vpop.f32.mrf.mxu1  ;;  %v6350_v41 = vpop.f32.mrf.mxu0 }
 0x1a9   : > { %7263 = vst [vmem:[#allocation7_spill] sm:$0xff] %v6350_v41  ;;  %v6353_v32 = vadd.f32 %v6282_v2, %v2324_v31  ;;  %v2428_v40 = vpop.f32.mrf.mxu2  ;;  %v5394_v31 = vld [vmem:[%s7222_s3 + $0x1e8] sm:$0xff] }
 0x1ab   : > { %2785 = vmatmul.bf16.gmra.mxu0 %v6274_v18  ;;  %2819 = vmatmul.bf16.vlgmr.msrb.gmra.mxu1 %v5904_v60  ;;  %v5267_v60 = vld [vmem:[#allocation2 + $0x124] sm:$0xf] }
 0x1ac   : > { %v6368_v18 = vor.u32 %v5267_v60, %v4590_v46  ;;  %v5254_v60 = vld [vmem:[#allocation2 + $0xb8] sm:$0xf0] }
 0x1b0   : > { %v2326_v28 = vpop.f32.mrf.mxu1  ;;  %v6360_v17 = vpop.f32.mrf.mxu0 }
 0x1b1   : > { %7264 = vst [vmem:[#allocation8_spill] sm:$0xff] %v6360_v17  ;;  %v6365_v2 = vadd.f32 %v6300_v38, %v2326_v28  ;;  %v5251_v38 = vld [vmem:[#allocation2 + $0xa0] sm:$0xf0] }
 0x1b2   : > { %2928 = vmatmul.bf16.gmra.mxu2 %v6362_v48  ;;  %v6386_v50 = vor.u32 %v5251_v38, %v4524_v6  ;;  %v5391_v6 = vld [vmem:[%s7222_s3 + $0x1d0] sm:$0xff] }
 0x1b5   : > { %2452 = vmatmul.bf16.vlgmr.msra.gmra.mxu3 %v6368_v18 }
 0x1b8   : > { %v2329_v44 = vpop.f32.mrf.mxu1  ;;  %v6376_v58 = vpop.f32.mrf.mxu0 }
 0x1b9   : > { %v6374_v57 = vadd.f32 %v2418_v63, %v2329_v44  ;;  %7265 = vst [vmem:[#allocation9_spill] sm:$0xff] %v6376_v58  ;;  %v4536_v44 = vld [vmem:[#allocation2 + $0xb0] sm:$0xf] }
 0x1ba   : > { %v6420_v24 = vor.u32 %v5254_v60, %v4536_v44  ;;  %v5404_v60 = vld [vmem:[%s7222_s3 + $0x238] sm:$0xff] }
 0x1bb   : > { %2790 = vmatmul.bf16.gmra.mxu0 %v6298_v34  ;;  %2824 = vmatmul.bf16.gmra.mxu1 %v5992_v10  ;;  %v2430_v34 = vpop.f32.mrf.mxu2  ;;  %v5395_v10 = vld [vmem:[%s7222_s3 + $0x1f0] sm:$0xff] }
 0x1bc   : > { %3592 = vmatpush.bf16.msra.mxu0 %v5395_v10  ;;  %3680 = vmatpush.bf16.msra.mxu1 %v5404_v60 }
 0x1c0   : > { %v2331_v63 = vpop.f32.mrf.mxu1  ;;  %v6394_v14 = vpop.f32.mrf.mxu0  ;;  %3593 = vmatpush.bf16.msra.mxu0 %v5394_v31 }
 0x1c1   : > { %v6388_v12 = vadd.f32 %v2420_v0, %v2331_v63  ;;  %7266 = vst [vmem:[#allocation10_spill] sm:$0xff] %v6394_v14  ;;  %v5326_v0 = vld [vmem:[%s7222_s3 + $0x88] sm:$0xff] }
 0x1c2   : > { %2933 = vmatmul.bf16.gmra.mxu2 %v6386_v50  ;;  %2479 = vmatpush.bf16.msrb.mxu3 %v5326_v0 }
 0x1c3   : > { %v2433_v28 = vpop.f32.mrf.mxu2 }
 0x1c4   : > { %3594 = vmatpush.bf16.msra.mxu0 %v5393_v45  ;;  %v5257_v45 = vld [vmem:[#allocation2 + $0xd0] sm:$0xf0] }
 0x1c5   : > { %2457 = vmatmul.bf16.gmra.mxu3 %v6396_v25 }
 0x1c8   : > { %v2334_v42 = vpop.f32.mrf.mxu1  ;;  %v6412_v46 = vpop.f32.mrf.mxu0  ;;  %3595 = vmatpush.bf16.msra.mxu0 %v5392_v27 }
 0x1c9   : > { %v6405_v43 = vadd.f32 %v2423_v23, %v2334_v42  ;;  %7267 = vst [vmem:[#allocation11_spill] sm:$0xff] %v6412_v46  ;;  %v5325_v23 = vld [vmem:[%s7222_s3 + $0x80] sm:$0xff] }
 0x1ca   : > { %2480 = vmatpush.bf16.msrb.mxu3 %v5325_v23  ;;  %v5389_v42 = vld [vmem:[%s7222_s3 + $0x1c0] sm:$0xff]  ;;  %v4548_v23 = vld [vmem:[#allocation2 + $0xc8] sm:$0xf] }
 0x1cb   : > { %2795 = vmatmul.bf16.gmra.mxu0 %v6322_v3  ;;  %2829 = vmatmul.bf16.gmra.mxu1 %v6076_v37  ;;  %v5273_v3 = vld [vmem:[#allocation2 + $0x154] sm:$0xf]  ;;  %v2435_v55 = vpop.f32.mrf.mxu2 }
 0x1cc   : > { %v6428_v63 = vor.u32 %v5273_v3, %v4614_v30  ;;  %3596 = vmatpush.bf16.msra.mxu0 %v5391_v6  ;;  %v4626_v3 = vld [vmem:[#allocation2 + $0x174] sm:$0xf0] }
 0x1d0   : > { %v2336_v38 = vpop.f32.mrf.mxu1  ;;  %v6437_v10 = vpop.f32.mrf.mxu0  ;;  %3597 = vmatpush.bf16.msra.mxu0 %v5390_v1  ;;  %v5280_v1 = vld [vmem:[#allocation2 + $0x188] sm:$0xf0] }
 0x1d1   : > { %v6422_v37 = vadd.f32 %v2425_v53, %v2336_v38  ;;  %v5388_v53 = vld [vmem:[%s7222_s3 + $0x1b8] sm:$0xff]  ;;  %7268 = vst [vmem:[#allocation12_spill] sm:$0xff] %v6437_v10  ;;  %v5276_v38 = vld [vmem:[#allocation2 + $0x16c] sm:$0xf] }
 0x1d2   : > { %2938 = vmatmul.bf16.gmra.mxu2 %v6420_v24  ;;  %3502 = vmatpush.bf16.msra.mxu3 %v5388_v53 }
 0x1d3   : > { %v2438_v27 = vpop.f32.mrf.mxu2 }
 0x1d4   : > { %3598 = vmatpush.bf16.msra.mxu0 %v5389_v42 }
 0x1d5   : > { %2462 = vmatmul.bf16.gmra.mxu3 %v6428_v63 }
 0x1d8   : > { %v2339_v31 = vpop.f32.mrf.mxu1  ;;  %v6451_v30 = vpop.f32.mrf.mxu0 }
 0x1d9   : > { %v6439_v0 = vadd.f32 %v2428_v40, %v2339_v31  ;;  %v6449_v40 = vor.u32 %v5257_v45, %v4548_v23  ;;  %7269 = vst [vmem:[#allocation13_spill] sm:$0xff] %v6451_v30  ;;  %v4452_v23 = vld [vmem:[#allocation2 + $0x8] sm:$0xf]  ;;  %v4560_v30 = vld [vmem:[#allocation2 + $0xe0] sm:$0xf] }
 0x1db   : > { %2800 = vmatmul.bf16.gmra.mxu0 %v6344_v20  ;;  %2834 = vmatmul.bf16.gmra.mxu1 %v6120_v52  ;;  %v6456_v52 = vor.u32 %v5276_v38, %v4626_v3  ;;  %v4732_v20 = vld [vmem:[#allocation2 + $0x180] sm:$0xf]  ;;  %v2440_v31 = vpop.f32.mrf.mxu2 }
 0x1dc   : > { %v4733_v45 = vor.u32 %v5280_v1, %v4732_v20  ;;  %v4890_v20 = vld [vmem:[#allocation2 + $0x3c] sm:$0xf0] }
 0x1e0   : > { %v2341_v44 = vpop.f32.mrf.mxu1  ;;  %v6461_v60 = vpop.f32.mrf.mxu0 }
 0x1e1   : > { %v6453_v6 = vadd.f32 %v2430_v34, %v2341_v44  ;;  %7270 = vst [vmem:[#allocation14_spill] sm:$0xff] %v6461_v60  ;;  %v5260_v34 = vld [vmem:[#allocation2 + $0xe8] sm:$0xf0]  ;;  %v5308_v44 = vld [vmem:[#allocation2 + $0x10] sm:$0xf0] }
 0x1e2   : > { %2943 = vmatmul.bf16.gmra.mxu2 %v6449_v40  ;;  %v6464_v3 = vor.u32 %v5260_v34, %v4560_v30  ;;  %v4453_v46 = vor.u32 %v5308_v44, %v4452_v23  ;;  %v5333_v30 = vld [vmem:[#allocation2 + $0x34] sm:$0xf]  ;;  %v5263_v44 = vld [vmem:[#allocation2 + $0x100] sm:$0xf0] }
 0x1e5   : > { %2467 = vmatmul.bf16.gmra.mxu3 %v6456_v52 }
 0x1e8   : > { %v2344_v53 = vpop.f32.mrf.mxu1 }
 0x1e9   : > { %v6459_v42 = vadd.f32 %v2433_v28, %v2344_v53  ;;  %v2443_v28 = vpop.f32.mrf.mxu2  ;;  %v6469_v53 = vpop.f32.mrf.mxu0 }
 0x1ea   : > { %7271 = vst [vmem:[#allocation15_spill] sm:$0xff] %v6469_v53  ;;  %v4572_v53 = vld [vmem:[#allocation2 + $0xf8] sm:$0xf] }
 0x1eb   : > { %2805 = vmatmul.bf16.gmra.mxu0 %v4733_v45  ;;  %2839 = vmatmul.bf16.gmra.mxu1 %v6131_v15  ;;  %v5387_v15 = vld [vmem:[%s7222_s3 + $0x1b0] sm:$0xff]  ;;  %v6486_v14 = vor.u32 %v5263_v44, %v4572_v53 }
 0x1ec   : > { %3503 = vmatpush.bf16.msra.mxu3 %v5387_v15  ;;  %v4584_v53 = vld [vmem:[#allocation2 + $0x110] sm:$0xf] }
 0x1f0   : > { %v2346_v38 = vpop.f32.mrf.mxu1 }
 0x1f1   : > { %v6466_v10 = vadd.f32 %v2435_v55, %v2346_v38  ;;  %v4893_v55 = vor.u32 %v5333_v30, %v4890_v20  ;;  %v2445_v23 = vpop.f32.mrf.mxu2  ;;  %v6482_v38 = vpop.f32.mrf.mxu0 }
 0x1f2   : > { %2948 = vmatmul.bf16.gmra.mxu2 %v6464_v3  ;;  %7272 = vst [vmem:[#allocation16_spill] sm:$0xff] %v6482_v38 }
 0x1f5   : > { %2481 = vmatmul.bf16.vlgmr.msrb.gmra.mxu3 %v4453_v46  ;;  %v5403_v46 = vld [vmem:[%s7222_s3 + $0x230] sm:$0xff] }
 0x1f6   : > { %3681 = vmatpush.bf16.msra.mxu1 %v5403_v46 }
 0x1f8   : > { %v2349_v1 = vpop.f32.mrf.mxu1  ;;  %v6474_v45 = vpop.f32.mrf.mxu3 }
 0x1f9   : > { %v6476_v34 = vadd.f32 %v2438_v27, %v2349_v1  ;;  %v2448_v20 = vpop.f32.mrf.mxu2  ;;  %v6494_v38 = vpop.f32.mrf.mxu0 }
 0x1fa   : > { %7273 = vst [vmem:[#allocation17_spill] sm:$0xff] %v6494_v38 }
 0x1fb   : > { %2844 = vmatmul.bf16.gmra.mxu1 %v6142_v59  ;;  %3599 = vmatmul.bf16.vlgmr.msra.gmra.mxu0 %v4893_v55  ;;  %v4902_v59 = vld [vmem:[#allocation2 + $0x54] sm:$0xf0]  ;;  %v5336_v55 = vld [vmem:[#allocation2 + $0x4c] sm:$0xf] }
 0x1fc   : > { %v4905_v58 = vor.u32 %v5336_v55, %v4902_v59 }
 0x200   : > { %v2351_v15 = vpop.f32.mrf.mxu1  ;;  %v6484_v60 = vpop.f32.mrf.mxu3 }
 0x201   : > { %v6488_v27 = vadd.f32 %v2440_v31, %v2351_v15  ;;  %v5266_v31 = vld [vmem:[#allocation2 + $0x118] sm:$0xf0]  ;;  %v2450_v17 = vpop.f32.mrf.mxu2  ;;  %v6506_v9 = vpop.f32.mrf.mxu0 }
 0x202   : > { %2953 = vmatmul.bf16.gmra.mxu2 %v6486_v14  ;;  %7274 = vst [vmem:[#allocation18_spill] sm:$0xff] %v6506_v9 }
 0x205   : > { %2486 = vmatmul.bf16.gmra.mxu3 %v6269_v4  ;;  %v6501_v4 = vor.u32 %v5266_v31, %v4584_v53 }
 0x208   : > { %v2354_v1 = vpop.f32.mrf.mxu1  ;;  %v6492_v30 = vpop.f32.mrf.mxu3 }
 0x209   : > { %v6496_v46 = vadd.f32 %v2443_v28, %v2354_v1  ;;  %v5339_v1 = vld [vmem:[#allocation2 + $0x64] sm:$0xf]  ;;  %v6516_v31 = vpop.f32.mrf.mxu2  ;;  %v6519_v53 = vpop.f32.mrf.mxu0 }
 0x20a   : > { %7275 = vst [vmem:[#allocation19_spill] sm:$0xff] %v6516_v31 }
 0x20b   : > { %2849 = vmatmul.bf16.gmra.mxu1 %v6153_v36  ;;  %3604 = vmatmul.bf16.gmra.mxu0 %v4905_v58  ;;  %v5386_v36 = vld [vmem:[%s7222_s3 + $0x1a8] sm:$0xff]  ;;  %v4914_v58 = vld [vmem:[#allocation2 + $0x6c] sm:$0xf0]  ;;  %7276 = vst [vmem:[#allocation20_spill] sm:$0xff] %v6519_v53 }
 0x20c   : > { %3504 = vmatpush.bf16.msra.mxu3 %v5386_v36  ;;  %v5402_v36 = vld [vmem:[%s7222_s3 + $0x228] sm:$0xff] }
 0x20d   : > { %3682 = vmatpush.bf16.msra.mxu1 %v5402_v36  ;;  %v5342_v36 = vld [vmem:[#allocation2 + $0x7c] sm:$0xf] }
 0x210   : > { %v2356_v44 = vpop.f32.mrf.mxu1  ;;  %v6499_v15 = vpop.f32.mrf.mxu3 }
 0x211   : > { %v6503_v41 = vadd.f32 %v2445_v23, %v2356_v44  ;;  %v4917_v23 = vor.u32 %v5339_v1, %v4914_v58  ;;  %v5269_v44 = vld [vmem:[#allocation2 + $0x130] sm:$0xf0]  ;;  %v6534_v1 = vpop.f32.mrf.mxu0 }
 0x212   : > { %2958 = vmatmul.bf16.gmra.mxu2 %v6501_v4  ;;  %7278 = vst [vmem:[#allocation22_spill] sm:$0xff] %v6534_v1 }
 0x215   : > { %2491 = vmatmul.bf16.gmra.mxu3 %v6289_v16  ;;  %v4596_v16 = vld [vmem:[#allocation2 + $0x128] sm:$0xf] }
 0x218   : > { %v2359_v28 = vpop.f32.mrf.mxu1  ;;  %v6512_v59 = vpop.f32.mrf.mxu3 }
 0x219   : > { %v6514_v55 = vadd.f32 %v2448_v20, %v2359_v28  ;;  %v6526_v20 = vor.u32 %v5269_v44, %v4596_v16  ;;  %v4926_v28 = vld [vmem:[#allocation2 + $0x84] sm:$0xf0]  ;;  %v6549_v1 = vpop.f32.mrf.mxu0 }
 0x21a   : > { %v4929_v61 = vor.u32 %v5342_v36, %v4926_v28  ;;  %7280 = vst [vmem:[#allocation24_spill] sm:$0xff] %v6549_v1 }
 0x21b   : > { %2854 = vmatmul.bf16.gmra.mxu1 %v6172_v5  ;;  %3609 = vmatmul.bf16.gmra.mxu0 %v4917_v23  ;;  %v6531_v5 = vpop.f32.mrf.mxu2 }
 0x21c   : > { %7277 = vst [vmem:[#allocation21_spill] sm:$0xff] %v6531_v5  ;;  %v5275_v5 = vld [vmem:[#allocation2 + $0x160] sm:$0xf0] }
 0x220   : > { %v2361_v9 = vpop.f32.mrf.mxu1  ;;  %v6524_v38 = vpop.f32.mrf.mxu3 }
 0x221   : > { %v6528_v58 = vadd.f32 %v2450_v17, %v2361_v9  ;;  %v4608_v9 = vld [vmem:[#allocation2 + $0x140] sm:$0xf]  ;;  %v5272_v17 = vld [vmem:[#allocation2 + $0x148] sm:$0xf0]  ;;  %v6563_v1 = vpop.f32.mrf.mxu0 }
 0x222   : > { %2963 = vmatmul.bf16.gmra.mxu2 %v6526_v20  ;;  %7283 = vst [vmem:[#allocation27_spill] sm:$0xff] %v6563_v1 }
 0x223   : > { %v6541_v16 = vpop.f32.mrf.mxu2 }
 0x224   : > { %7279 = vst [vmem:[#allocation23_spill] sm:$0xff] %v6541_v16  ;;  %v5345_v16 = vld [vmem:[#allocation2 + $0x94] sm:$0xf] }
 0x225   : > { %2496 = vmatmul.bf16.gmra.mxu3 %v6316_v33  ;;  %v6547_v33 = vor.u32 %v5272_v17, %v4608_v9 }
 0x228   : > { %v6536_v23 = vpop.f32.mrf.mxu3  ;;  %v6538_v53 = vpop.f32.mrf.mxu1 }
 0x22b   : > { %2859 = vmatmul.bf16.gmra.mxu1 %v6199_v39  ;;  %3614 = vmatmul.bf16.gmra.mxu0 %v4929_v61  ;;  %v5385_v39 = vld [vmem:[%s7222_s3 + $0x1a0] sm:$0xff]  ;;  %v6558_v26 = vpop.f32.mrf.mxu2 }
 0x22c   : > { %v4938_v61 = vld [vmem:[#allocation2 + $0x9c] sm:$0xf0]  ;;  %3505 = vmatpush.bf16.msra.mxu3 %v5385_v39  ;;  %7282 = vst [vmem:[#allocation26_spill] sm:$0xff] %v6558_v26 }
 0x22d   : > { %v4941_v17 = vor.u32 %v5345_v16, %v4938_v61  ;;  %v5401_v39 = vld [vmem:[%s7222_s3 + $0x220] sm:$0xff]  ;;  %v4950_v61 = vld [vmem:[#allocation2 + $0xb4] sm:$0xf0] }
 0x22e   : > { %3683 = vmatpush.bf16.msra.mxu1 %v5401_v39  ;;  %v5348_v39 = vld [vmem:[#allocation2 + $0xac] sm:$0xf] }
 0x230   : > { %v6543_v44 = vpop.f32.mrf.mxu3  ;;  %v6545_v54 = vpop.f32.mrf.mxu1 }
 0x232   : > { %2968 = vmatmul.bf16.gmra.mxu2 %v6547_v33 }
 0x233   : > { %v6577_v16 = vpop.f32.mrf.mxu2 }
 0x234   : > { %7285 = vst [vmem:[#allocation29_spill] sm:$0xff] %v6577_v16 }
 0x235   : > { %2501 = vmatmul.bf16.gmra.mxu3 %v6338_v11  ;;  %v4620_v11 = vld [vmem:[#allocation2 + $0x158] sm:$0xf] }
 0x236   : > { %v6571_v26 = vor.u32 %v5275_v5, %v4620_v11  ;;  %v4953_v5 = vor.u32 %v5348_v39, %v4950_v61  ;;  %v5278_v11 = vld [vmem:[#allocation2 + $0x178] sm:$0xf0] }
 0x238   : > { %v2453_v28 = vpop.f32.mrf.mxu3  ;;  %v6556_v36 = vpop.f32.mrf.mxu1 }
 0x239   : > { %7281 = vst [vmem:[#allocation25_spill] sm:$0xff] %v6556_v36  ;;  %v6561_v9 = vadd.f32 %v2453_v28, %v6474_v45 }
 0x23b   : > { %2864 = vmatmul.bf16.gmra.mxu1 %v6229_v21  ;;  %3619 = vmatmul.bf16.gmra.mxu0 %v4941_v17  ;;  %v6579_v21 = vpop.f32.mrf.mxu0 }
 0x23c   : > { %7286 = vst [vmem:[#allocation30_spill] sm:$0xff] %v6579_v21 }
 0x240   : > { %v2455_v36 = vpop.f32.mrf.mxu3  ;;  %v6569_v31 = vpop.f32.mrf.mxu1 }
 0x241   : > { %7284 = vst [vmem:[#allocation28_spill] sm:$0xff] %v6569_v31  ;;  %v6574_v45 = vadd.f32 %v2455_v36, %v6484_v60  ;;  %v6588_v60 = vpop.f32.mrf.mxu2  ;;  %v4632_v36 = vld [vmem:[#allocation2 + $0x170] sm:$0xf] }
 0x242   : > { %2973 = vmatmul.bf16.gmra.mxu2 %v6571_v26  ;;  %v6594_v31 = vor.u32 %v5278_v11, %v4632_v36  ;;  %v5281_v11 = vld [vmem:[#allocation2 + $0x190] sm:$0xf0] }
 0x243   : > { %v6590_v16 = vpop.f32.mrf.mxu0 }
 0x244   : > { %7288 = vst [vmem:[#allocation32_spill] sm:$0xff] %v6590_v16  ;;  %v5400_v16 = vld [vmem:[%s7222_s3 + $0x218] sm:$0xff] }
 0x245   : > { %2506 = vmatmul.bf16.gmra.mxu3 %v6362_v48  ;;  %3684 = vmatpush.bf16.msra.mxu1 %v5400_v16 }
 0x248   : > { %v2458_v28 = vpop.f32.mrf.mxu3  ;;  %v6582_v17 = vpop.f32.mrf.mxu1 }
 0x249   : > { %7287 = vst [vmem:[#allocation31_spill] sm:$0xff] %v6582_v17  ;;  %v6585_v1 = vadd.f32 %v2458_v28, %v6492_v30  ;;  %v4962_v30 = vld [vmem:[#allocation2 + $0xcc] sm:$0xf0]  ;;  %v6604_v61 = vpop.f32.mrf.mxu2 }
 0x24a   : > { %7289 = vst [vmem:[#allocation33_spill] sm:$0xff] %v6604_v61 }
 0x24b   : > { %2869 = vmatmul.bf16.gmra.mxu1 %v6250_v35  ;;  %3624 = vmatmul.bf16.gmra.mxu0 %v4953_v5  ;;  %v5384_v35 = vld [vmem:[%s7222_s3 + $0x198] sm:$0xff]  ;;  %v5351_v5 = vld [vmem:[#allocation2 + $0xc4] sm:$0xf]  ;;  %v6608_v36 = vpop.f32.mrf.mxu0 }
 0x24c   : > { %3506 = vmatpush.bf16.msra.mxu3 %v5384_v35  ;;  %7291 = vst [vmem:[#allocation35_spill] sm:$0xff] %v6608_v36 }
 0x250   : > { %v2460_v21 = vpop.f32.mrf.mxu3  ;;  %v6592_v48 = vpop.f32.mrf.mxu1 }
 0x251   : > { %v6597_v17 = vadd.f32 %v2460_v21, %v6499_v15  ;;  %v4965_v21 = vor.u32 %v5351_v5, %v4962_v30 }
 0x252   : > { %2978 = vmatmul.bf16.gmra.mxu2 %v6594_v31 }
 0x253   : > { %v6624_v30 = vpop.f32.mrf.mxu0 }
 0x254   : > { %7293 = vst [vmem:[#allocation37_spill] sm:$0xff] %v6624_v30 }
 0x255   : > { %2511 = vmatmul.bf16.gmra.mxu3 %v6386_v50  ;;  %v4740_v50 = vld [vmem:[#allocation2 + $0x188] sm:$0xf] }
 0x258   : > { %v2463_v28 = vpop.f32.mrf.mxu3  ;;  %v6606_v39 = vpop.f32.mrf.mxu1 }
 0x259   : > { %7290 = vst [vmem:[#allocation34_spill] sm:$0xff] %v6606_v39  ;;  %v6611_v15 = vadd.f32 %v2463_v28, %v6512_v59  ;;  %v4741_v39 = vor.u32 %v5281_v11, %v4740_v50  ;;  %v6622_v59 = vpop.f32.mrf.mxu2 }
 0x25b   : > { %2874 = vmatmul.bf16.gmra.mxu1 %v6368_v18  ;;  %3629 = vmatmul.bf16.gmra.mxu0 %v4965_v21  ;;  %v4974_v18 = vld [vmem:[#allocation2 + $0xe4] sm:$0xf0]  ;;  %v5354_v21 = vld [vmem:[#allocation2 + $0xdc] sm:$0xf] }
 0x260   : > { %v2465_v35 = vpop.f32.mrf.mxu3  ;;  %v6617_v61 = vpop.f32.mrf.mxu1 }
 0x261   : > { %7292 = vst [vmem:[#allocation36_spill] sm:$0xff] %v6617_v61  ;;  %v6620_v36 = vadd.f32 %v2465_v35, %v6524_v38  ;;  %v4977_v61 = vor.u32 %v5354_v21, %v4974_v18  ;;  %v6633_v38 = vpop.f32.mrf.mxu0 }
 0x262   : > { %2983 = vmatmul.bf16.gmra.mxu2 %v4741_v39  ;;  %7294 = vst [vmem:[#allocation38_spill] sm:$0xff] %v6633_v38  ;;  %v5412_v39 = vld [vmem:[%s7224_s5 + $0x38] sm:$0xff] }
 0x263   : > { %3953 = vmatpush.bf16.msra.mxu2 %v5412_v39 }
 0x265   : > { %2516 = vmatmul.bf16.gmra.mxu3 %v6420_v24 }
 0x268   : > { %v2468_v28 = vpop.f32.mrf.mxu3  ;;  %v6627_v5 = vpop.f32.mrf.mxu1 }
 0x269   : > { %v6630_v16 = vadd.f32 %v2468_v28, %v6536_v23  ;;  %v4986_v23 = vld [vmem:[#allocation2 + $0xfc] sm:$0xf0]  ;;  %v5357_v28 = vld [vmem:[#allocation2 + $0xf4] sm:$0xf] }
 0x26a   : > { %v4989_v39 = vor.u32 %v5357_v28, %v4986_v23 }
 0x26b   : > { %2879 = vmatmul.bf16.gmra.mxu1 %v6396_v25  ;;  %3634 = vmatmul.bf16.gmra.mxu0 %v4977_v61  ;;  %v5383_v25 = vld [vmem:[%s7222_s3 + $0x190] sm:$0xff]  ;;  %v6647_v61 = vpop.f32.mrf.mxu0 }
 0x26c   : > { %7295 = vst [vmem:[#allocation39_spill] sm:$0xff] %v6647_v61  ;;  %3507 = vmatpush.bf16.msra.mxu3 %v5383_v25 }
 0x270   : > { %v2470_v24 = vpop.f32.mrf.mxu3  ;;  %v6638_v50 = vpop.f32.mrf.mxu1 }
 0x271   : > { %v6641_v11 = vadd.f32 %v2470_v24, %v6543_v44  ;;  %v2396_v44 = vadd.f32 %v6187_v47, %v6267_v62  ;;  %v5360_v47 = vld [vmem:[#allocation2 + $0x10c] sm:$0xf] }
 0x273   : > { %v6662_v61 = vpop.f32.mrf.mxu0 }
 0x274   : > { %7296 = vst [vmem:[#allocation40_spill] sm:$0xff] %v6662_v61 }
 0x275   : > { %2521 = vmatmul.bf16.gmra.mxu3 %v6449_v40  ;;  %v5399_v40 = vld [vmem:[%s7222_s3 + $0x210] sm:$0xff] }
 0x276   : > { %3685 = vmatpush.bf16.msra.mxu1 %v5399_v40  ;;  %v5411_v40 = vld [vmem:[%s7224_s5 + $0x30] sm:$0xff] }
 0x277   : > { %3954 = vmatpush.bf16.msra.mxu2 %v5411_v40  ;;  %v5363_v40 = vld [vmem:[#allocation2 + $0x124] sm:$0xf] }
 0x278   : > { %v2482_v35 = vpop.f32.mrf.mxu3  ;;  %v6649_v18 = vpop.f32.mrf.mxu1 }
 0x279   : > { %v6652_v21 = vadd.f32 %v2482_v35, %v6233_v51  ;;  %v5398_v51 = vld [vmem:[%s7222_s3 + $0x208] sm:$0xff] }
 0x27a   : > { %3686 = vmatpush.bf16.msra.mxu1 %v5398_v51 }
 0x27b   : > { %2884 = vmatmul.bf16.gmra.mxu1 %v6428_v63  ;;  %3639 = vmatmul.bf16.gmra.mxu0 %v4989_v39  ;;  %v4998_v63 = vld [vmem:[#allocation2 + $0x114] sm:$0xf0]  ;;  %v6675_v39 = vpop.f32.mrf.mxu0 }
 0x27c   : > { %v5001_v28 = vor.u32 %v5360_v47, %v4998_v63  ;;  %7298 = vst [vmem:[#allocation42_spill] sm:$0xff] %v6675_v39  ;;  %v5279_v63 = vld [vmem:[#allocation2 + $0x184] sm:$0xf]  ;;  %v5010_v47 = vld [vmem:[#allocation2 + $0x12c] sm:$0xf0] }
 0x280   : > { %v2484_v24 = vpop.f32.mrf.mxu3  ;;  %v6660_v25 = vpop.f32.mrf.mxu1 }
 0x281   : > { %v6664_v38 = vadd.f32 %v2484_v24, %v2396_v44 }
 0x283   : > { %v6689_v51 = vpop.f32.mrf.mxu0 }
 0x284   : > { %7300 = vst [vmem:[#allocation44_spill] sm:$0xff] %v6689_v51 }
 0x285   : > { %2526 = vmatmul.bf16.gmra.mxu3 %v6464_v3  ;;  %v5397_v3 = vld [vmem:[%s7222_s3 + $0x200] sm:$0xff] }
 0x286   : > { %3687 = vmatpush.bf16.msra.mxu1 %v5397_v3 }
 0x288   : > { %v2487_v23 = vpop.f32.mrf.mxu3  ;;  %v6670_v35 = vpop.f32.mrf.mxu1 }
 0x289   : > { %7297 = vst [vmem:[#allocation41_spill] sm:$0xff] %v6670_v35  ;;  %v6673_v62 = vadd.f32 %v2487_v23, %v6280_v8  ;;  %v4734_v23 = vld [vmem:[#allocation2 + $0x18c] sm:$0xf0] }
 0x28b   : > { %2889 = vmatmul.bf16.gmra.mxu1 %v6456_v52  ;;  %3644 = vmatmul.bf16.gmra.mxu0 %v5001_v28  ;;  %v5382_v52 = vld [vmem:[%s7222_s3 + $0x188] sm:$0xff] }
 0x28c   : > { %3508 = vmatpush.bf16.msra.mxu3 %v5382_v52  ;;  %v5366_v52 = vld [vmem:[#allocation2 + $0x13c] sm:$0xf] }
 0x290   : > { %v2489_v44 = vpop.f32.mrf.mxu3  ;;  %v6684_v24 = vpop.f32.mrf.mxu1 }
 0x291   : > { %7299 = vst [vmem:[#allocation43_spill] sm:$0xff] %v6684_v24  ;;  %v6687_v8 = vadd.f32 %v2489_v44, %v6292_v22  ;;  %v4737_v22 = vor.u32 %v5279_v63, %v4734_v23  ;;  %v5013_v44 = vor.u32 %v5363_v40, %v5010_v47  ;;  %v5335_v24 = vld [vmem:[#allocation2 + $0x40] sm:$0xf0]  ;;  %v4896_v63 = vld [vmem:[#allocation2 + $0x38] sm:$0xf] }
 0x292   : > { %v4897_v40 = vor.u32 %v5335_v24, %v4896_v63  ;;  %v5034_v24 = vld [vmem:[#allocation2 + $0x15c] sm:$0xf0] }
 0x295   : > { %2531 = vmatmul.bf16.gmra.mxu3 %v6486_v14  ;;  %v6700_v14 = vpop.f32.mrf.mxu0 }
 0x296   : > { %7302 = vst [vmem:[#allocation46_spill] sm:$0xff] %v6700_v14 }
 0x298   : > { %v2492_v28 = vpop.f32.mrf.mxu3  ;;  %v6695_v3 = vpop.f32.mrf.mxu1 }
 0x299   : > { %7301 = vst [vmem:[#allocation45_spill] sm:$0xff] %v6695_v3  ;;  %v6698_v39 = vadd.f32 %v2492_v28, %v6309_v29  ;;  %v5022_v3 = vld [vmem:[#allocation2 + $0x144] sm:$0xf0] }
 0x29a   : > { %v5025_v28 = vor.u32 %v5366_v52, %v5022_v3  ;;  %v5338_v3 = vld [vmem:[#allocation2 + $0x58] sm:$0xf0] }
 0x29b   : > { %2894 = vmatmul.bf16.gmra.mxu1 %v4737_v22  ;;  %3649 = vmatmul.bf16.gmra.mxu0 %v5013_v44 }
 0x29d   : > { %v6710_v23 = vpop.f32.mrf.mxu0 }
 0x2a0   : > { %v2494_v51 = vpop.f32.mrf.mxu3  ;;  %v6702_v61 = vpop.f32.mrf.mxu1 }
 0x2a1   : > { %7303 = vst [vmem:[#allocation47_spill] sm:$0xff] %v6702_v61  ;;  %v6705_v30 = vadd.f32 %v2494_v51, %v6319_v56  ;;  %v5410_v56 = vld [vmem:[%s7224_s5 + $0x28] sm:$0xff] }
 0x2a2   : > { %3955 = vmatpush.bf16.msra.mxu2 %v5410_v56 }
 0x2a5   : > { %2536 = vmatmul.bf16.gmra.mxu3 %v6501_v4  ;;  %v6723_v44 = vpop.f32.mrf.mxu0 }
 0x2a8   : > { %v2497_v35 = vpop.f32.mrf.mxu3  ;;  %v6708_v29 = vpop.f32.mrf.mxu1 }
 0x2a9   : > { %7304 = vst [vmem:[#allocation48_spill] sm:$0xff] %v6708_v29  ;;  %v6713_v47 = vadd.f32 %v2497_v35, %v6331_v13  ;;  %v5381_v13 = vld [vmem:[%s7222_s3 + $0x180] sm:$0xff]  ;;  %v5369_v35 = vld [vmem:[#allocation2 + $0x154] sm:$0xf] }
 0x2aa   : > { %3509 = vmatpush.bf16.msra.mxu3 %v5381_v13  ;;  %v5372_v13 = vld [vmem:[#allocation2 + $0x16c] sm:$0xf]  ;;  %v5341_v29 = vld [vmem:[#allocation2 + $0x70] sm:$0xf0] }
 0x2ab   : > { %3654 = vmatmul.bf16.gmra.mxu0 %v5025_v28  ;;  %3688 = vmatmul.bf16.vlgmr.msra.gmra.mxu1 %v4897_v40  ;;  %v4908_v28 = vld [vmem:[#allocation2 + $0x50] sm:$0xf] }
 0x2ac   : > { %v4909_v56 = vor.u32 %v5338_v3, %v4908_v28 }
 0x2b0   : > { %v2499_v4 = vpop.f32.mrf.mxu3  ;;  %v6718_v51 = vpop.f32.mrf.mxu1 }
 0x2b1   : > { %7305 = vst [vmem:[#allocation49_spill] sm:$0xff] %v6718_v51  ;;  %v6721_v22 = vadd.f32 %v2499_v4, %v6341_v49  ;;  %v5037_v49 = vor.u32 %v5369_v35, %v5034_v24  ;;  %v4920_v24 = vld [vmem:[#allocation2 + $0x68] sm:$0xf] }
 0x2b2   : > { %v4921_v28 = vor.u32 %v5341_v29, %v4920_v24  ;;  %v5344_v29 = vld [vmem:[#allocation2 + $0x88] sm:$0xf0] }
 0x2b5   : > { %2541 = vmatmul.bf16.gmra.mxu3 %v6526_v20  ;;  %v6734_v20 = vpop.f32.mrf.mxu0 }
 0x2b8   : > { %v2502_v52 = vpop.f32.mrf.mxu3  ;;  %v6729_v63 = vpop.f32.mrf.mxu1 }
 0x2b9   : > { %7306 = vst [vmem:[#allocation50_spill] sm:$0xff] %v6729_v63  ;;  %v6732_v40 = vadd.f32 %v2502_v52, %v6353_v32  ;;  %v5046_v63 = vld [vmem:[#allocation2 + $0x174] sm:$0xf0] }
 0x2ba   : > { %v5049_v52 = vor.u32 %v5372_v13, %v5046_v63  ;;  %v5058_v63 = vld [vmem:[#allocation2 + $0x18c] sm:$0xf0] }
 0x2bb   : > { %3659 = vmatmul.bf16.gmra.mxu0 %v5037_v49  ;;  %3693 = vmatmul.bf16.gmra.mxu1 %v4909_v56 }
 0x2bd   : > { %v6742_v61 = vpop.f32.mrf.mxu0 }
 0x2c0   : > { %v2504_v4 = vpop.f32.mrf.mxu3  ;;  %v6736_v14 = vpop.f32.mrf.mxu1 }
 0x2c1   : > { %7307 = vst [vmem:[#allocation51_spill] sm:$0xff] %v6736_v14  ;;  %v6739_v51 = vadd.f32 %v2504_v4, %v6365_v2  ;;  %v5409_v2 = vld [vmem:[%s7224_s5 + $0x20] sm:$0xff] }
 0x2c2   : > { %3956 = vmatpush.bf16.msra.mxu2 %v5409_v2 }
 0x2c5   : > { %2546 = vmatmul.bf16.gmra.mxu3 %v6547_v33  ;;  %v6754_v56 = vpop.f32.mrf.mxu0 }
 0x2c8   : > { %v2507_v32 = vpop.f32.mrf.mxu3  ;;  %v6744_v35 = vpop.f32.mrf.mxu1 }
 0x2c9   : > { %7308 = vst [vmem:[#allocation52_spill] sm:$0xff] %v6744_v35  ;;  %v6747_v3 = vadd.f32 %v2507_v32, %v6374_v57  ;;  %v5375_v57 = vld [vmem:[#allocation2 + $0x184] sm:$0xf]  ;;  %v4932_v32 = vld [vmem:[#allocation2 + $0x80] sm:$0xf] }
 0x2ca   : > { %v5347_v35 = vld [vmem:[#allocation2 + $0xa0] sm:$0xf0] }
 0x2cb   : > { %3664 = vmatmul.bf16.gmra.mxu0 %v5049_v52  ;;  %3698 = vmatmul.bf16.gmra.mxu1 %v4921_v28  ;;  %v5061_v52 = vor.u32 %v5375_v57, %v5058_v63  ;;  %v4933_v28 = vor.u32 %v5344_v29, %v4932_v32  ;;  %v5408_v29 = vld [vmem:[%s7224_s5 + $0x18] sm:$0xff] }
 0x2cc   : > { %3957 = vmatpush.bf16.msra.mxu2 %v5408_v29  ;;  %v5334_v32 = vld [vmem:[#allocation2 + $0x38] sm:$0xf0]  ;;  %v5337_v29 = vld [vmem:[#allocation2 + $0x50] sm:$0xf0] }
 0x2d0   : > { %v2509_v33 = vpop.f32.mrf.mxu3  ;;  %v6752_v49 = vpop.f32.mrf.mxu1 }
 0x2d1   : > { %7309 = vst [vmem:[#allocation53_spill] sm:$0xff] %v6752_v49  ;;  %v6757_v4 = vadd.f32 %v2509_v33, %v6388_v12  ;;  %v6765_v49 = vpop.f32.mrf.mxu0 }
 0x2d5   : > { %2551 = vmatmul.bf16.gmra.mxu3 %v6571_v26 }
 0x2d8   : > { %v2512_v13 = vpop.f32.mrf.mxu3  ;;  %v6763_v2 = vpop.f32.mrf.mxu1 }
 0x2d9   : > { %v6761_v24 = vadd.f32 %v2512_v13, %v6405_v43  ;;  %7310 = vst [vmem:[#allocation54_spill] sm:$0xff] %v6763_v2  ;;  %v4944_v43 = vld [vmem:[#allocation2 + $0x98] sm:$0xf] }
 0x2da   : > { %v4945_v63 = vor.u32 %v5347_v35, %v4944_v43  ;;  %v4956_v35 = vld [vmem:[#allocation2 + $0xb0] sm:$0xf] }
 0x2db   : > { %3669 = vmatmul.bf16.gmra.mxu0 %v5061_v52  ;;  %3703 = vmatmul.bf16.gmra.mxu1 %v4933_v28 }
 0x2e0   : > { %v2514_v12 = vpop.f32.mrf.mxu3  ;;  %v6770_v26 = vpop.f32.mrf.mxu1 }
 0x2e1   : > { %v6768_v33 = vadd.f32 %v2514_v12, %v6422_v37  ;;  %7311 = vst [vmem:[#allocation55_spill] sm:$0xff] %v6770_v26  ;;  %v5350_v12 = vld [vmem:[#allocation2 + $0xb8] sm:$0xf0] }
 0x2e5   : > { %2556 = vmatmul.bf16.gmra.mxu3 %v6594_v31  ;;  %v4888_v31 = vld [vmem:[#allocation2 + $0x30] sm:$0xf] }
 0x2e6   : > { %v4889_v28 = vor.u32 %v5334_v32, %v4888_v31  ;;  %v5353_v31 = vld [vmem:[#allocation2 + $0xd0] sm:$0xf0] }
 0x2e8   : > { %v2517_v14 = vpop.f32.mrf.mxu3  ;;  %v6779_v13 = vpop.f32.mrf.mxu1 }
 0x2e9   : > { %v6774_v57 = vadd.f32 %v2517_v14, %v6439_v0  ;;  %7312 = vst [vmem:[#allocation56_spill] sm:$0xff] %v6779_v13 }
 0x2eb   : > { %3708 = vmatmul.bf16.gmra.mxu1 %v4945_v63  ;;  %v4957_v63 = vor.u32 %v5350_v12, %v4956_v35 }
 0x2f0   : > { %v2519_v37 = vpop.f32.mrf.mxu3  ;;  %v6784_v0 = vpop.f32.mrf.mxu1 }
 0x2f1   : > { %v6782_v52 = vadd.f32 %v2519_v37, %v6453_v6  ;;  %7313 = vst [vmem:[#allocation57_spill] sm:$0xff] %v6784_v0  ;;  %v4900_v37 = vld [vmem:[#allocation2 + $0x48] sm:$0xf] }
 0x2f2   : > { %v4901_v32 = vor.u32 %v5337_v29, %v4900_v37  ;;  %v4968_v0 = vld [vmem:[#allocation2 + $0xc8] sm:$0xf] }
 0x2f5   : > { %3510 = vmatmul.bf16.vlgmr.msra.gmra.mxu3 %v4889_v28 }
 0x2f8   : > { %v2522_v14 = vpop.f32.mrf.mxu3  ;;  %v6792_v6 = vpop.f32.mrf.mxu1 }
 0x2f9   : > { %v6787_v43 = vadd.f32 %v2522_v14, %v6459_v42  ;;  %7314 = vst [vmem:[#allocation58_spill] sm:$0xff] %v6792_v6  ;;  %v4969_v42 = vor.u32 %v5353_v31, %v4968_v0  ;;  %v5340_v14 = vld [vmem:[#allocation2 + $0x68] sm:$0xf0]  ;;  %v4992_v6 = vld [vmem:[#allocation2 + $0xf8] sm:$0xf] }
 0x2fb   : > { %3713 = vmatmul.bf16.gmra.mxu1 %v4957_v63  ;;  %v4912_v63 = vld [vmem:[#allocation2 + $0x60] sm:$0xf] }
 0x2fc   : > { %v4913_v29 = vor.u32 %v5340_v14, %v4912_v63  ;;  %v6815_v14 = vpop.f32.mrf.mxu2 }
 0x300   : > { %v2524_v13 = vpop.f32.mrf.mxu3  ;;  %v6797_v12 = vpop.f32.mrf.mxu1 }
 0x301   : > { %v6790_v26 = vadd.f32 %v2524_v13, %v6466_v10  ;;  %7316 = vst [vmem:[#allocation60_spill] sm:$0xff] %v6797_v12  ;;  %v5407_v10 = vld [vmem:[%s7224_s5 + $0x10] sm:$0xff]  ;;  %v5343_v12 = vld [vmem:[#allocation2 + $0x80] sm:$0xf0] }
 0x302   : > { %3958 = vmatpush.bf16.msra.mxu2 %v5407_v10 }
 0x305   : > { %3515 = vmatmul.bf16.gmra.mxu3 %v4901_v32  ;;  %v4980_v32 = vld [vmem:[#allocation2 + $0xe0] sm:$0xf] }
 0x308   : > { %v2527_v28 = vpop.f32.mrf.mxu3  ;;  %v6805_v37 = vpop.f32.mrf.mxu1 }
 0x309   : > { %v6795_v2 = vadd.f32 %v2527_v28, %v6476_v34  ;;  %7318 = vst [vmem:[#allocation62_spill] sm:$0xff] %v6805_v37  ;;  %v5356_v34 = vld [vmem:[#allocation2 + $0xe8] sm:$0xf0] }
 0x30a   : > { %v4981_v28 = vor.u32 %v5356_v34, %v4980_v32  ;;  %v6822_v32 = vpop.f32.mrf.mxu2 }
 0x30b   : > { %7315 = vst [vmem:[#allocation59_spill] sm:$0xff] %v6795_v2  ;;  %3718 = vmatmul.bf16.gmra.mxu1 %v4969_v42  ;;  %v5374_v2 = vld [vmem:[#allocation2 + $0x178] sm:$0xf0] }
 0x310   : > { %v2529_v13 = vpop.f32.mrf.mxu3  ;;  %v6810_v42 = vpop.f32.mrf.mxu1 }
 0x311   : > { %v6803_v35 = vadd.f32 %v2529_v13, %v6488_v27  ;;  %7320 = vst [vmem:[#allocation64_spill] sm:$0xff] %v6810_v42  ;;  %v4924_v13 = vld [vmem:[#allocation2 + $0x78] sm:$0xf] }
 0x312   : > { %v4925_v63 = vor.u32 %v5343_v12, %v4924_v13  ;;  %v5346_v12 = vld [vmem:[#allocation2 + $0x98] sm:$0xf0]  ;;  %v4936_v13 = vld [vmem:[#allocation2 + $0x90] sm:$0xf] }
 0x313   : > { %7317 = vst [vmem:[#allocation61_spill] sm:$0xff] %v6803_v35  ;;  %v5371_v35 = vld [vmem:[#allocation2 + $0x160] sm:$0xf0] }
 0x315   : > { %3520 = vmatmul.bf16.gmra.mxu3 %v4913_v29  ;;  %v5359_v29 = vld [vmem:[#allocation2 + $0x100] sm:$0xf0] }
 0x316   : > { %v4993_v34 = vor.u32 %v5359_v29, %v4992_v6  ;;  %v5362_v6 = vld [vmem:[#allocation2 + $0x118] sm:$0xf0] }
 0x318   : > { %v2532_v0 = vpop.f32.mrf.mxu3 }
 0x319   : > { %v6808_v31 = vadd.f32 %v2532_v0, %v6496_v46  ;;  %v6820_v0 = vpop.f32.mrf.mxu1 }
 0x31a   : > { %7323 = vst [vmem:[#allocation67_spill] sm:$0xff] %v6820_v0 }
 0x31b   : > { %7319 = vst [vmem:[#allocation63_spill] sm:$0xff] %v6808_v31  ;;  %3723 = vmatmul.bf16.gmra.mxu1 %v4981_v28  ;;  %v5040_v31 = vld [vmem:[#allocation2 + $0x158] sm:$0xf] }
 0x320   : > { %v2534_v10 = vpop.f32.mrf.mxu3 }
 0x321   : > { %v6813_v27 = vadd.f32 %v2534_v10, %v6503_v41  ;;  %v5406_v41 = vld [vmem:[%s7224_s5 + $0x8] sm:$0xff] }
 0x322   : > { %3959 = vmatpush.bf16.msra.mxu2 %v5406_v41 }
 0x323   : > { %7321 = vst [vmem:[#allocation65_spill] sm:$0xff] %v6813_v27 }
 0x325   : > { %3525 = vmatmul.bf16.gmra.mxu3 %v4925_v63  ;;  %v4937_v63 = vor.u32 %v5346_v12, %v4936_v13  ;;  %v4948_v13 = vld [vmem:[#allocation2 + $0xa8] sm:$0xf] }
 0x328   : > { %v2537_v37 = vpop.f32.mrf.mxu3 }
 0x329   : > { %v6818_v46 = vadd.f32 %v2537_v37, %v6514_v55  ;;  %v6830_v55 = vpop.f32.mrf.mxu1  ;;  %v6832_v37 = vpop.f32.mrf.mxu2 }
 0x32a   : > { %7325 = vst [vmem:[#allocation69_spill] sm:$0xff] %v6830_v55  ;;  %v5016_v55 = vld [vmem:[#allocation2 + $0x128] sm:$0xf] }
 0x32b   : > { %7322 = vst [vmem:[#allocation66_spill] sm:$0xff] %v6818_v46  ;;  %3728 = vmatmul.bf16.gmra.mxu1 %v4993_v34  ;;  %v5004_v34 = vld [vmem:[#allocation2 + $0x110] sm:$0xf] }
 0x32c   : > { %v5005_v42 = vor.u32 %v5362_v6, %v5004_v34  ;;  %v5352_v34 = vld [vmem:[#allocation2 + $0xc8] sm:$0xf0] }
 0x330   : > { %v2539_v28 = vpop.f32.mrf.mxu3 }
 0x331   : > { %v6828_v10 = vadd.f32 %v2539_v28, %v6528_v58  ;;  %v6837_v41 = vpop.f32.mrf.mxu1  ;;  %v5349_v58 = vld [vmem:[#allocation2 + $0xb0] sm:$0xf0]  ;;  %v6839_v28 = vpop.f32.mrf.mxu2 }
 0x333   : > { %7324 = vst [vmem:[#allocation68_spill] sm:$0xff] %v6828_v10  ;;  %v5365_v10 = vld [vmem:[#allocation2 + $0x130] sm:$0xf0] }
 0x335   : > { %3530 = vmatmul.bf16.gmra.mxu3 %v4937_v63  ;;  %v4949_v63 = vor.u32 %v5349_v58, %v4948_v13 }
 0x338   : > { %v2542_v29 = vpop.f32.mrf.mxu3 }
 0x339   : > { %v6835_v0 = vadd.f32 %v2542_v29, %v6561_v9  ;;  %v6844_v27 = vpop.f32.mrf.mxu1  ;;  %v6849_v29 = vpop.f32.mrf.mxu2 }
 0x33b   : > { %7326 = vst [vmem:[#allocation70_spill] sm:$0xff] %v6835_v0  ;;  %3733 = vmatmul.bf16.gmra.mxu1 %v5005_v42  ;;  %v5017_v42 = vor.u32 %v5365_v10, %v5016_v55  ;;  %v5028_v10 = vld [vmem:[#allocation2 + $0x140] sm:$0xf]  ;;  %v5368_v55 = vld [vmem:[#allocation2 + $0x148] sm:$0xf0] }
 0x340   : > { %v2544_v46 = vpop.f32.mrf.mxu3 }
 0x341   : > { %v6842_v12 = vadd.f32 %v2544_v46, %v6574_v45  ;;  %v5405_v45 = vld [vmem:[%s7224_s5] sm:$0xff]  ;;  %v6857_v13 = vpop.f32.mrf.mxu1 }
 0x342   : > { %3960 = vmatpush.bf16.msra.mxu2 %v5405_v45 }
 0x343   : > { %7327 = vst [vmem:[#allocation71_spill] sm:$0xff] %v6842_v12 }
 0x345   : > { %3535 = vmatmul.bf16.gmra.mxu3 %v4949_v63  ;;  %v4960_v63 = vld [vmem:[#allocation2 + $0xc0] sm:$0xf] }
 0x346   : > { %v4961_v12 = vor.u32 %v5352_v34, %v4960_v63  ;;  %v4972_v34 = vld [vmem:[#allocation2 + $0xd8] sm:$0xf] }
 0x348   : > { %v2547_v9 = vpop.f32.mrf.mxu3 }
 0x349   : > { %v6847_v6 = vadd.f32 %v2547_v9, %v6585_v1  ;;  %v6859_v1 = vpop.f32.mrf.mxu2  ;;  %v6864_v45 = vpop.f32.mrf.mxu1 }
 0x34b   : > { %7328 = vst [vmem:[#allocation72_spill] sm:$0xff] %v6847_v6  ;;  %3738 = vmatmul.bf16.gmra.mxu1 %v5017_v42  ;;  %v5029_v6 = vor.u32 %v5368_v55, %v5028_v10  ;;  %v5041_v10 = vor.u32 %v5371_v35, %v5040_v31 }
 0x350   : > { %v2549_v46 = vpop.f32.mrf.mxu3 }
 0x351   : > { %v6855_v58 = vadd.f32 %v2549_v46, %v6597_v17  ;;  %v6866_v0 = vpop.f32.mrf.mxu2  ;;  %v5355_v46 = vld [vmem:[#allocation2 + $0xe0] sm:$0xf0] }
 0x352   : > { %v4973_v63 = vor.u32 %v5355_v46, %v4972_v34  ;;  %v4984_v46 = vld [vmem:[#allocation2 + $0xf0] sm:$0xf] }
 0x353   : > { %7329 = vst [vmem:[#allocation73_spill] sm:$0xff] %v6855_v58 }
 0x355   : > { %3540 = vmatmul.bf16.gmra.mxu3 %v4961_v12  ;;  %v6871_v12 = vpop.f32.mrf.mxu1 }
 0x358   : > { %v2552_v9 = vpop.f32.mrf.mxu3 }
 0x359   : > { %v6862_v42 = vadd.f32 %v2552_v9, %v6611_v15  ;;  %v6873_v9 = vpop.f32.mrf.mxu2 }
 0x35b   : > { %7330 = vst [vmem:[#allocation74_spill] sm:$0xff] %v6862_v42  ;;  %3743 = vmatmul.bf16.gmra.mxu1 %v5029_v6 }
 0x35d   : > { %v6878_v55 = vpop.f32.mrf.mxu1 }
 0x360   : > { %v2554_v17 = vpop.f32.mrf.mxu3 }
 0x361   : > { %v6869_v58 = vadd.f32 %v2554_v17, %v6620_v36  ;;  %v5358_v36 = vld [vmem:[#allocation2 + $0xf8] sm:$0xf0]  ;;  %v6883_v34 = vpop.f32.mrf.mxu2 }
 0x362   : > { %7334 = vst [vmem:[#allocation78_spill] sm:$0xff] %v6883_v34  ;;  %v5361_v34 = vld [vmem:[#allocation2 + $0x110] sm:$0xf0] }
 0x363   : > { %7331 = vst [vmem:[#allocation75_spill] sm:$0xff] %v6869_v58  ;;  %v5052_v58 = vld [vmem:[#allocation2 + $0x170] sm:$0xf] }
 0x365   : > { %3545 = vmatmul.bf16.gmra.mxu3 %v4973_v63  ;;  %v4985_v63 = vor.u32 %v5358_v36, %v4984_v46 }
 0x368   : > { %v2557_v15 = vpop.f32.mrf.mxu3 }
 0x369   : > { %v6876_v6 = vadd.f32 %v2557_v15, %v6630_v16  ;;  %v2732_v16 = vadd.f32 %v6277_v7, %v6652_v21  ;;  %v6887_v15 = vpop.f32.mrf.mxu0  ;;  %v6895_v36 = vpop.f32.mrf.mxu2  ;;  %v7335_v21 = vld [vmem:[#allocation19_spill] sm:$0xff] }
 0x36b   : > { %7332 = vst [vmem:[#allocation76_spill] sm:$0xff] %v6876_v6  ;;  %3748 = vmatmul.bf16.gmra.mxu1 %v5041_v10  ;;  %v5053_v10 = vor.u32 %v5374_v2, %v5052_v58  ;;  %v6890_v6 = vpop.f32.mrf.mxu1  ;;  %v6903_v2 = vld [vmem:[%s7223_s4] ss:$0 sm:$0xff] }
 0x36c   : > { %v7336_v58 = vld [vmem:[#allocation21_spill] sm:$0xff] }
 0x370   : > { %v2559_v42 = vpop.f32.mrf.mxu3 }
 0x371   : > { %v6881_v17 = vadd.f32 %v2559_v42, %v6641_v11  ;;  %v2821_v11 = vadd.f32 %v6538_v53, %v2732_v16  ;;  %v2734_v42 = vadd.f32 %v6287_v19, %v6664_v38  ;;  %v6906_v19 = vpop.f32.mrf.mxu0  ;;  %v4996_v38 = vld [vmem:[#allocation2 + $0x108] sm:$0xf] }
 0x373   : > { %7333 = vst [vmem:[#allocation77_spill] sm:$0xff] %v6881_v17  ;;  %v2823_v7 = vadd.f32 %v6545_v54, %v2734_v42  ;;  %v4997_v54 = vor.u32 %v5361_v34, %v4996_v38  ;;  %v5377_v42 = vld [vmem:[#allocation2 + $0x190] sm:$0xf0] }
 0x375   : > { %3550 = vmatmul.bf16.gmra.mxu3 %v4985_v63  ;;  %v2910_v63 = vadd.f32 %v7335_v21, %v2821_v11  ;;  %v2912_v16 = vadd.f32 %v7336_v58, %v2823_v7  ;;  %v5064_v11 = vld [vmem:[#allocation2 + $0x188] sm:$0xf] }
 0x376   : > { %v5065_v34 = vor.u32 %v5377_v42, %v5064_v11  ;;  %v5364_v11 = vld [vmem:[#allocation2 + $0x128] sm:$0xf0] }
 0x378   : > { %v3511_v35 = vpop.f32.mrf.mxu3 }
 0x379   : > { %v3601_v31 = vadd.f32 %v6710_v23, %v3511_v35  ;;  %v6910_v35 = vpop.f32.mrf.mxu1 }
 0x37b   : > { %3753 = vmatmul.bf16.gmra.mxu1 %v5053_v10  ;;  %v3690_v46 = vadd.f32 %v6837_v41, %v3601_v31 }
 0x37d   : > { %v3769_v23 = vadd.f32 %v3690_v46, %v2910_v63  ;;  %v6913_v46 = vpop.f32.mrf.mxu2 }
 0x37e   : > { %7337 = vst [vmem:[#allocation19_spill] sm:$0xff] %v6913_v46 }
 0x37f   : > { %v3805_v31 = vadd.f32 %v6903_v2, %v3769_v23  ;;  %v7340_v23 = vld [vmem:[#allocation4_spill] sm:$0xff] }
 0x380   : > { %v3513_v17 = vpop.f32.mrf.mxu3 }
 0x381   : > { %v3603_v53 = vadd.f32 %v6723_v44, %v3513_v17  ;;  %v7338_v44 = vld [vmem:[#allocation3_spill] sm:$0xff]  ;;  %v3837_v7 = vmax.f32 %v3805_v31, 0.0 }
 0x382   : > { %v2737_v17 = vadd.f32 %v7338_v44, %v6673_v62  ;;  %v6925_v62 = vpop.f32.mrf.mxu1  ;;  %v7342_v44 = vld [vmem:[#allocation23_spill] sm:$0xff] }
 0x383   : > { %v3692_v41 = vadd.f32 %v6844_v27, %v3603_v53  ;;  %v7339_v53 = vld [vmem:[#allocation25_spill] sm:$0xff] }
 0x384   : > { %v2826_v38 = vadd.f32 %v7339_v53, %v2737_v17 }
 0x385   : > { %v3770_v10 = vadd.f32 %v3692_v41, %v2912_v16  ;;  %3555 = vmatmul.bf16.gmra.mxu3 %v4997_v54  ;;  %v2739_v16 = vadd.f32 %v7340_v23, %v6687_v8  ;;  %v6922_v54 = vpop.f32.mrf.mxu0  ;;  %v6929_v42 = vpop.f32.mrf.mxu2 }
 0x387   : > { %v3806_v21 = vadd.f32 %v6903_v2, %v3770_v10  ;;  %v7341_v10 = vld [vmem:[#allocation28_spill] sm:$0xff] }
 0x388   : > { %v3516_v63 = vpop.f32.mrf.mxu3  ;;  %v2828_v31 = vadd.f32 %v7341_v10, %v2739_v16 }
 0x389   : > { %v3838_v58 = vmax.f32 %v3806_v21, 0.0  ;;  %v3606_v27 = vadd.f32 %v6734_v20, %v3516_v63  ;;  %v2915_v21 = vadd.f32 %v7342_v44, %v2826_v38  ;;  %v5008_v63 = vld [vmem:[#allocation2 + $0x120] sm:$0xf] }
 0x38a   : > { %v7344_v38 = vld [vmem:[#allocation5_spill] sm:$0xff] }
 0x38b   : > { %v3869_v41 = vpack.c.bf16 %v3838_v58, %v3837_v7  ;;  %3758 = vmatmul.bf16.gmra.mxu1 %v5065_v34  ;;  %v3695_v46 = vadd.f32 %v6857_v13, %v3606_v27  ;;  %v7343_v7 = vld [vmem:[#allocation26_spill] sm:$0xff]  ;;  %v5009_v13 = vor.u32 %v5364_v11, %v5008_v63  ;;  %v2742_v16 = vadd.f32 %v7344_v38, %v6698_v39 }
 0x38c   : > { %v2917_v58 = vadd.f32 %v7343_v7, %v2828_v31  ;;  %v7346_v11 = vld [vmem:[#allocation6_spill] sm:$0xff]  ;;  %v7347_v7 = vld [vmem:[#allocation29_spill] sm:$0xff] }
 0x38d   : > { %3961 = vmatmul.bf16.vlgmr.msra.gmra.mxu2 %v3869_v41  ;;  %v3771_v17 = vadd.f32 %v3695_v46, %v2915_v21  ;;  %v6935_v23 = vpop.f32.mrf.mxu0  ;;  %v6940_v46 = vpop.f32.mrf.mxu1  ;;  %v7345_v21 = vld [vmem:[#allocation31_spill] sm:$0xff] }
 0x38f   : > { %v3807_v53 = vadd.f32 %v6903_v2, %v3771_v17  ;;  %v2744_v17 = vadd.f32 %v7346_v11, %v6705_v30 }
 0x390   : > { %v3518_v20 = vpop.f32.mrf.mxu3 }
 0x391   : > { %v3608_v8 = vadd.f32 %v6742_v61, %v3518_v20  ;;  %v3839_v31 = vmax.f32 %v3807_v53, 0.0  ;;  %v2831_v20 = vadd.f32 %v7345_v21, %v2742_v16  ;;  %v2833_v39 = vadd.f32 %v6592_v48, %v2744_v17  ;;  %v5367_v16 = vld [vmem:[#allocation2 + $0x140] sm:$0xf0] }
 0x393   : > { %v3697_v34 = vadd.f32 %v6864_v45, %v3608_v8  ;;  %v6943_v45 = vpop.f32.mrf.mxu2  ;;  %v2922_v30 = vadd.f32 %v6588_v60, %v2833_v39 }
 0x395   : > { %v3772_v27 = vadd.f32 %v3697_v34, %v2917_v58  ;;  %3560 = vmatmul.bf16.gmra.mxu3 %v5009_v13  ;;  %v2920_v58 = vadd.f32 %v7347_v7, %v2831_v20  ;;  %v6951_v34 = vpop.f32.mrf.mxu0  ;;  %v5020_v13 = vld [vmem:[#allocation2 + $0x138] sm:$0xf]  ;;  %v6954_v38 = vpop.f32.mrf.mxu1 }
 0x397   : > { %v3808_v41 = vadd.f32 %v6903_v2, %v3772_v27 }
 0x398   : > { %v3521_v61 = vpop.f32.mrf.mxu3 }
 0x399   : > { %v3611_v10 = vadd.f32 %v6754_v56, %v3521_v61  ;;  %v3840_v44 = vmax.f32 %v3808_v41, 0.0 }
 0x39b   : > { %v3870_v8 = vpack.c.bf16 %v3840_v44, %v3839_v31  ;;  %v3700_v63 = vadd.f32 %v6871_v12, %v3611_v10  ;;  %v5021_v12 = vor.u32 %v5367_v16, %v5020_v13  ;;  %v6958_v61 = vpop.f32.mrf.mxu2  ;;  %v7348_v31 = vld [vmem:[#allocation7_spill] sm:$0xff]  ;;  %v7351_v13 = vld [vmem:[#allocation36_spill] sm:$0xff] }
 0x39c   : > { %v2747_v44 = vadd.f32 %v7348_v31, %v6713_v47 }
 0x39d   : > { %3966 = vmatmul.bf16.gmra.mxu2 %v3870_v8  ;;  %v3773_v27 = vadd.f32 %v3700_v63, %v2920_v58  ;;  %v6965_v60 = vpop.f32.mrf.mxu0  ;;  %v7350_v63 = vld [vmem:[#allocation8_spill] sm:$0xff]  ;;  %v6970_v58 = vpop.f32.mrf.mxu1 }
 0x39e   : > { %v2749_v39 = vadd.f32 %v7350_v63, %v6721_v22 }
 0x39f   : > { %v3809_v10 = vadd.f32 %v6903_v2, %v3773_v27 }
 0x3a0   : > { %v3523_v56 = vpop.f32.mrf.mxu3  ;;  %v2838_v27 = vadd.f32 %v7351_v13, %v2749_v39  ;;  %v7354_v39 = vld [vmem:[#allocation10_spill] sm:$0xff] }
 0x3a1   : > { %v3613_v53 = vadd.f32 %v6765_v49, %v3523_v56  ;;  %v3841_v11 = vmax.f32 %v3809_v10, 0.0 }
 0x3a2   : > { %v2927_v22 = vadd.f32 %v6622_v59, %v2838_v27 }
 0x3a3   : > { %v3702_v41 = vadd.f32 %v6878_v55, %v3613_v53  ;;  %v7349_v55 = vld [vmem:[#allocation34_spill] sm:$0xff]  ;;  %v6973_v47 = vpop.f32.mrf.mxu2 }
 0x3a4   : > { %v2836_v8 = vadd.f32 %v7349_v55, %v2747_v44 }
 0x3a5   : > { %v3774_v48 = vadd.f32 %v3702_v41, %v2922_v30  ;;  %3565 = vmatmul.bf16.gmra.mxu3 %v5021_v12  ;;  %v5032_v30 = vld [vmem:[#allocation2 + $0x150] sm:$0xf]  ;;  %v5370_v41 = vld [vmem:[#allocation2 + $0x158] sm:$0xf0]  ;;  %v6980_v44 = vpop.f32.mrf.mxu0 }
 0x3a6   : > { %v5033_v31 = vor.u32 %v5370_v41, %v5032_v30  ;;  %v5373_v30 = vld [vmem:[#allocation2 + $0x170] sm:$0xf0] }
 0x3a7   : > { %v3810_v21 = vadd.f32 %v6903_v2, %v3774_v48 }
 0x3a8   : > { %v3526_v49 = vpop.f32.mrf.mxu3 }
 0x3a9   : > { %v3616_v20 = vadd.f32 %v6887_v15, %v3526_v49  ;;  %v3842_v17 = vmax.f32 %v3810_v21, 0.0  ;;  %v7352_v15 = vld [vmem:[#allocation33_spill] sm:$0xff]  ;;  %v6983_v49 = vpop.f32.mrf.mxu1 }
 0x3aa   : > { %v2925_v53 = vadd.f32 %v7352_v15, %v2836_v8 }
 0x3ab   : > { %v3871_v7 = vpack.c.bf16 %v3842_v17, %v3841_v11  ;;  %v3705_v56 = vadd.f32 %v6890_v6, %v3616_v20  ;;  %v7353_v20 = vld [vmem:[#allocation9_spill] sm:$0xff] }
 0x3ac   : > { %v2752_v11 = vadd.f32 %v7353_v20, %v6732_v40  ;;  %v7355_v20 = vld [vmem:[#allocation11_spill] sm:$0xff] }
 0x3ad   : > { %3971 = vmatmul.bf16.gmra.mxu2 %v3871_v7  ;;  %v3775_v12 = vadd.f32 %v3705_v56, %v2925_v53  ;;  %v2754_v7 = vadd.f32 %v7354_v39, %v6739_v51  ;;  %v6995_v27 = vpop.f32.mrf.mxu0  ;;  %v7356_v39 = vld [vmem:[#allocation12_spill] sm:$0xff] }
 0x3ae   : > { %v2841_v63 = vadd.f32 %v6627_v5, %v2752_v11  ;;  %v2757_v11 = vadd.f32 %v7355_v20, %v6747_v3 }
 0x3af   : > { %v3811_v21 = vadd.f32 %v6903_v2, %v3775_v12  ;;  %v2843_v40 = vadd.f32 %v6638_v50, %v2754_v7  ;;  %v2759_v7 = vadd.f32 %v7356_v39, %v6757_v4 }
 0x3b0   : > { %v3528_v16 = vpop.f32.mrf.mxu3  ;;  %v2930_v15 = vadd.f32 %v6815_v14, %v2841_v63  ;;  %v5378_v14 = vld [vmem:[#allocation2 + $0x19c] sm:$0xf]  ;;  %v2846_v63 = vadd.f32 %v6649_v18, %v2757_v11 }
 0x3b1   : > { %v3618_v48 = vadd.f32 %v6906_v19, %v3528_v16  ;;  %v6988_v19 = vpop.f32.mrf.mxu2  ;;  %v6999_v53 = vpop.f32.mrf.mxu1  ;;  %v5044_v16 = vld [vmem:[#allocation2 + $0x168] sm:$0xf]  ;;  %v2932_v51 = vadd.f32 %v6822_v32, %v2843_v40  ;;  %v2848_v40 = vadd.f32 %v6660_v25, %v2759_v7 }
 0x3b3   : > { %v3707_v10 = vadd.f32 %v6910_v35, %v3618_v48  ;;  %v3843_v35 = vmax.f32 %v3811_v21, 0.0  ;;  %v5045_v48 = vor.u32 %v5373_v30, %v5044_v16  ;;  %v5380_v21 = vld [vmem:[#allocation2 + $0x1a8] sm:$0xf0] }
 0x3b4   : > { %v5376_v16 = vld [vmem:[#allocation2 + $0x188] sm:$0xf0] }
 0x3b5   : > { %v3776_v6 = vadd.f32 %v3707_v10, %v2927_v22  ;;  %3570 = vmatmul.bf16.gmra.mxu3 %v5033_v31  ;;  %v5070_v10 = vld [vmem:[#allocation2 + $0x1a4] sm:$0xf0] }
 0x3b6   : > { %v5073_v31 = vor.u32 %v5378_v14, %v5070_v10 }
 0x3b7   : > { %v3812_v17 = vadd.f32 %v6903_v2, %v3776_v6  ;;  %v5076_v6 = vld [vmem:[#allocation2 + $0x1a0] sm:$0xf] }
 0x3b8   : > { %v3531_v55 = vpop.f32.mrf.mxu3  ;;  %3674 = vmatmul.bf16.gmra.mxu0 %v5073_v31  ;;  %v7358_v31 = vld [vmem:[#allocation41_spill] sm:$0xff] }
 0x3b9   : > { %v3621_v59 = vadd.f32 %v6922_v54, %v3531_v55  ;;  %v3844_v8 = vmax.f32 %v3812_v17, 0.0  ;;  %v7002_v12 = vpop.f32.mrf.mxu2  ;;  %v5077_v17 = vor.u32 %v5380_v21, %v5076_v6  ;;  %v3635_v55 = vpop.f32.mrf.mxu0  ;;  %v7359_v6 = vld [vmem:[#allocation14_spill] sm:$0xff] }
 0x3ba   : > { %v2764_v21 = vadd.f32 %v7359_v6, %v6768_v33 }
 0x3bb   : > { %v3872_v56 = vpack.c.bf16 %v3844_v8, %v3843_v35  ;;  %v3710_v13 = vadd.f32 %v6925_v62, %v3621_v59  ;;  %3763 = vmatmul.bf16.gmra.mxu1 %v5077_v17  ;;  %v3724_v8 = vpop.f32.mrf.mxu1 }
 0x3bd   : > { %3976 = vmatmul.bf16.gmra.mxu2 %v3872_v56  ;;  %v3777_v41 = vadd.f32 %v3710_v13, %v2930_v15  ;;  %v2935_v15 = vadd.f32 %v6832_v37, %v2846_v63  ;;  %v7357_v37 = vld [vmem:[#allocation13_spill] sm:$0xff] }
 0x3bf   : > { %v3813_v50 = vadd.f32 %v6903_v2, %v3777_v41 }
 0x3c0   : > { %v3533_v54 = vpop.f32.mrf.mxu3 }
 0x3c1   : > { %v3623_v5 = vadd.f32 %v6935_v23, %v3533_v54  ;;  %v3845_v59 = vmax.f32 %v3813_v50, 0.0  ;;  %v7014_v13 = vpop.f32.mrf.mxu2  ;;  %v5056_v54 = vld [vmem:[#allocation2 + $0x180] sm:$0xf]  ;;  %v3637_v18 = vpop.f32.mrf.mxu0 }
 0x3c3   : > { %v3712_v62 = vadd.f32 %v6940_v46, %v3623_v5  ;;  %v2937_v5 = vadd.f32 %v6839_v28, %v2848_v40 }
 0x3c5   : > { %v3778_v22 = vadd.f32 %v3712_v62, %v2932_v51  ;;  %3575 = vmatmul.bf16.gmra.mxu3 %v5045_v48  ;;  %v5057_v51 = vor.u32 %v5376_v16, %v5056_v54  ;;  %v3726_v62 = vpop.f32.mrf.mxu1 }
 0x3c7   : > { %v3814_v23 = vadd.f32 %v6903_v2, %v3778_v22  ;;  %v2762_v22 = vadd.f32 %v7357_v37, %v6761_v24  ;;  %v5379_v24 = vld [vmem:[#allocation2 + $0x1a0] sm:$0xf0] }
 0x3c8   : > { %v3536_v32 = vpop.f32.mrf.mxu3 }
 0x3c9   : > { %v3626_v46 = vadd.f32 %v6951_v34, %v3536_v32  ;;  %v3846_v35 = vmax.f32 %v3814_v23, 0.0  ;;  %v7023_v25 = vpop.f32.mrf.mxu2  ;;  %v3640_v11 = vpop.f32.mrf.mxu0  ;;  %v5068_v32 = vld [vmem:[#allocation2 + $0x198] sm:$0xf] }
 0x3cb   : > { %v3873_v56 = vpack.c.bf16 %v3846_v35, %v3845_v59  ;;  %v3715_v3 = vadd.f32 %v6954_v38, %v3626_v46  ;;  %v7360_v46 = vld [vmem:[#allocation43_spill] sm:$0xff] }
 0x3cc   : > { %v2853_v59 = vadd.f32 %v7360_v46, %v2764_v21 }
 0x3cd   : > { %3981 = vmatmul.bf16.gmra.mxu2 %v3873_v56  ;;  %v3779_v30 = vadd.f32 %v3715_v3, %v2935_v15  ;;  %v3729_v17 = vpop.f32.mrf.mxu1  ;;  %v5069_v56 = vor.u32 %v5379_v24, %v5068_v32 }
 0x3ce   : > { %v2942_v33 = vadd.f32 %v6859_v1, %v2853_v59  ;;  %v7362_v1 = vld [vmem:[#allocation45_spill] sm:$0xff] }
 0x3cf   : > { %v3815_v38 = vadd.f32 %v6903_v2, %v3779_v30 }
 0x3d0   : > { %v3538_v34 = vpop.f32.mrf.mxu3 }
 0x3d1   : > { %v3628_v41 = vadd.f32 %v6965_v60, %v3538_v34  ;;  %v3847_v10 = vmax.f32 %v3815_v38, 0.0  ;;  %v7035_v63 = vpop.f32.mrf.mxu2  ;;  %v3642_v15 = vpop.f32.mrf.mxu0  ;;  %v7361_v34 = vld [vmem:[#allocation15_spill] sm:$0xff] }
 0x3d2   : > { %v2767_v54 = vadd.f32 %v7361_v34, %v6774_v57 }
 0x3d3   : > { %v3717_v4 = vadd.f32 %v6970_v58, %v3628_v41  ;;  %v2851_v58 = vadd.f32 %v7358_v31, %v2762_v22  ;;  %v7364_v22 = vld [vmem:[#allocation47_spill] sm:$0xff] }
 0x3d5   : > { %v3780_v48 = vadd.f32 %v3717_v4, %v2937_v5  ;;  %3580 = vmatmul.bf16.gmra.mxu3 %v5057_v51  ;;  %v2940_v35 = vadd.f32 %v6849_v29, %v2851_v58  ;;  %v3731_v16 = vpop.f32.mrf.mxu1  ;;  %v2856_v51 = vadd.f32 %v7362_v1, %v2767_v54 }
 0x3d7   : > { %v3816_v50 = vadd.f32 %v6903_v2, %v3780_v48  ;;  %v2945_v57 = vadd.f32 %v6866_v0, %v2856_v51 }
 0x3d8   : > { %v3541_v14 = vpop.f32.mrf.mxu3 }
 0x3d9   : > { %v3631_v60 = vadd.f32 %v6980_v44, %v3541_v14  ;;  %v3848_v28 = vmax.f32 %v3816_v50, 0.0  ;;  %v7044_v4 = vpop.f32.mrf.mxu2  ;;  %v3645_v14 = vpop.f32.mrf.mxu0 }
 0x3db   : > { %v3874_v20 = vpack.c.bf16 %v3848_v28, %v3847_v10  ;;  %v3720_v23 = vadd.f32 %v6983_v49, %v3631_v60 }
 0x3dd   : > { %3986 = vmatmul.bf16.gmra.mxu2 %v3874_v20  ;;  %v3781_v39 = vadd.f32 %v3720_v23, %v2940_v35  ;;  %v3734_v28 = vpop.f32.mrf.mxu1 }
 0x3df   : > { %v3817_v40 = vadd.f32 %v6903_v2, %v3781_v39 }
 0x3e0   : > { %v3543_v44 = vpop.f32.mrf.mxu3 }
 0x3e1   : > { %v3633_v7 = vadd.f32 %v6995_v27, %v3543_v44  ;;  %v3849_v5 = vmax.f32 %v3817_v40, 0.0  ;;  %v7052_v6 = vpop.f32.mrf.mxu2  ;;  %v3647_v59 = vpop.f32.mrf.mxu0 }
 0x3e3   : > { %v3722_v3 = vadd.f32 %v6999_v53, %v3633_v7  ;;  %v7363_v53 = vld [vmem:[#allocation16_spill] sm:$0xff] }
 0x3e4   : > { %v2769_v48 = vadd.f32 %v7363_v53, %v6782_v52 }
 0x3e5   : > { %v3782_v49 = vadd.f32 %v3722_v3, %v2942_v33  ;;  %3585 = vmatmul.bf16.gmra.mxu3 %v5069_v56  ;;  %v3736_v39 = vpop.f32.mrf.mxu1  ;;  %v7368_v33 = vld [vmem:[#allocation49_spill] sm:$0xff]  ;;  %v7369_v3 = vld [vmem:[#allocation78_spill] sm:$0xff] }
 0x3e6   : > { %v2858_v50 = vadd.f32 %v7364_v22, %v2769_v48 }
 0x3e7   : > { %v3818_v29 = vadd.f32 %v6903_v2, %v3782_v49 }
 0x3e8   : > { %v3546_v30 = vpop.f32.mrf.mxu3  ;;  %v2947_v31 = vadd.f32 %v6873_v9, %v2858_v50  ;;  %v7367_v9 = vld [vmem:[#allocation18_spill] sm:$0xff] }
 0x3e9   : > { %v3636_v41 = vadd.f32 %v3635_v55, %v3546_v30  ;;  %v3850_v27 = vmax.f32 %v3818_v29, 0.0  ;;  %v7061_v56 = vpop.f32.mrf.mxu2  ;;  %v3650_v30 = vpop.f32.mrf.mxu0 }
 0x3eb   : > { %v3875_v38 = vpack.c.bf16 %v3850_v27, %v3849_v5  ;;  %v3725_v37 = vadd.f32 %v3724_v8, %v3636_v41  ;;  %v7365_v8 = vld [vmem:[#allocation17_spill] sm:$0xff]  ;;  %v7370_v27 = vld [vmem:[#allocation59_spill] sm:$0xff] }
 0x3ec   : > { %v2772_v20 = vadd.f32 %v7365_v8, %v6787_v43 }
 0x3ed   : > { %3991 = vmatmul.bf16.gmra.mxu2 %v3875_v38  ;;  %v3783_v10 = vadd.f32 %v3725_v37, %v2945_v57  ;;  %v3739_v5 = vpop.f32.mrf.mxu1 }
 0x3ef   : > { %v3819_v52 = vadd.f32 %v6903_v2, %v3783_v10 }
 0x3f0   : > { %v3548_v60 = vpop.f32.mrf.mxu3 }
 0x3f1   : > { %v3638_v55 = vadd.f32 %v3637_v18, %v3548_v60  ;;  %v3851_v24 = vmax.f32 %v3819_v52, 0.0  ;;  %v7366_v18 = vld [vmem:[#allocation48_spill] sm:$0xff]  ;;  %v7070_v48 = vpop.f32.mrf.mxu2 }
 0x3f2   : > { %v2861_v35 = vadd.f32 %v7366_v18, %v2772_v20 }
 0x3f3   : > { %v3727_v58 = vadd.f32 %v3726_v62, %v3638_v55  ;;  %v2774_v62 = vadd.f32 %v7367_v9, %v6790_v26  ;;  %v3652_v55 = vpop.f32.mrf.mxu0 }
 0x3f4   : > { %v2950_v49 = vadd.f32 %v7369_v3, %v2861_v35 }
 0x3f5   : > { %v3784_v21 = vadd.f32 %v3727_v58, %v2947_v31  ;;  %v2863_v43 = vadd.f32 %v7368_v33, %v2774_v62  ;;  %v7375_v31 = vld [vmem:[#allocation51_spill] sm:$0xff]  ;;  %v3741_v8 = vpop.f32.mrf.mxu1 }
 0x3f7   : > { %v3820_v23 = vadd.f32 %v6903_v2, %v3784_v21  ;;  %v2952_v54 = vadd.f32 %v6895_v36, %v2863_v43  ;;  %v7373_v36 = vld [vmem:[#allocation61_spill] sm:$0xff]  ;;  %v7376_v21 = vld [vmem:[#allocation19_spill] sm:$0xff] }
 0x3f8   : > { %v3551_v32 = vpop.f32.mrf.mxu3 }
 0x3f9   : > { %v3641_v0 = vadd.f32 %v3640_v11, %v3551_v32  ;;  %v3852_v46 = vmax.f32 %v3820_v23, 0.0 }
 0x3fb   : > { %v3876_v44 = vpack.c.bf16 %v3852_v46, %v3851_v24  ;;  %v3730_v7 = vadd.f32 %v3729_v17, %v3641_v0  ;;  %v7371_v17 = vld [vmem:[#allocation20_spill] sm:$0xff]  ;;  %v7080_v0 = vld [vmem:[%s7225_s6] ss:$0 sm:$0xff]  ;;  %v3655_v43 = vpop.f32.mrf.mxu0 }
 0x3fc   : > { %v2777_v1 = vadd.f32 %v7371_v17, %v7370_v27  ;;  %v7380_v27 = vld [vmem:[#allocation65_spill] sm:$0xff]  ;;  %v7381_v17 = vld [vmem:[#allocation27_spill] sm:$0xff] }
 0x3fd   : > { %3996 = vmatmul.bf16.gmra.mxu2 %v3876_v44  ;;  %v3785_v11 = vadd.f32 %v3730_v7, %v2950_v49  ;;  %v7377_v44 = vld [vmem:[#allocation63_spill] sm:$0xff]  ;;  %v7378_v7 = vld [vmem:[#allocation24_spill] sm:$0xff] }
 0x3fe   : > { %v2782_v33 = vadd.f32 %v7378_v7, %v7377_v44  ;;  %v7385_v7 = vld [vmem:[#allocation54_spill] sm:$0xff] }
 0x3ff   : > { %v3821_v26 = vadd.f32 %v6903_v2, %v3785_v11 }
 0x400   : > { %v3553_v40 = vpop.f32.mrf.mxu3 }
 0x401   : > { %v3643_v34 = vadd.f32 %v3642_v15, %v3553_v40  ;;  %v3853_v37 = vmax.f32 %v3821_v26, 0.0  ;;  %v7372_v15 = vld [vmem:[#allocation50_spill] sm:$0xff] }
 0x402   : > { %v2866_v50 = vadd.f32 %v7372_v15, %v2777_v1  ;;  %v2784_v1 = vadd.f32 %v7381_v17, %v7380_v27 }
 0x403   : > { %v3732_v29 = vadd.f32 %v3731_v16, %v3643_v34  ;;  %v7374_v16 = vld [vmem:[#allocation22_spill] sm:$0xff]  ;;  %v3744_v34 = vpop.f32.mrf.mxu1 }
 0x404   : > { %v2779_v57 = vadd.f32 %v7374_v16, %v7373_v36  ;;  %v2955_v52 = vadd.f32 %v7376_v21, %v2866_v50  ;;  %v5557_v21 = vld [vmem:[%s5713_s22 + $0x8] sm:$0xff]  }
 0x405   : > { %v3786_v41 = vadd.f32 %v3732_v29, %v2952_v54 }
 0x406   : > { %v2868_v58 = vadd.f32 %v7375_v31, %v2779_v57 }
 0x407   : > { %v3822_v51 = vadd.f32 %v6903_v2, %v3786_v41  ;;  %v7379_v41 = vld [vmem:[#allocation52_spill] sm:$0xff] }
 0x408   : > { %v3556_v53 = vpop.f32.mrf.mxu3  ;;  %v2957_v24 = vadd.f32 %v6929_v42, %v2868_v58  ;;  %v2871_v26 = vadd.f32 %v7379_v41, %v2782_v33  ;;  %v7388_v41 = vld [vmem:[#allocation55_spill] sm:$0xff] }
 0x409   : > { %v3646_v38 = vadd.f32 %v3645_v14, %v3556_v53  ;;  %v3854_v22 = vmax.f32 %v3822_v51, 0.0 }
 0x40a   : > { %v2960_v50 = vadd.f32 %v6943_v45, %v2871_v26 }
 0x40b   : > { %v3877_v60 = vpack.c.bf16 %v3854_v22, %v3853_v37  ;;  %v3735_v10 = vadd.f32 %v3734_v28, %v3646_v38  ;;  %v5414_v28 = vld [vmem:[%s5713_s22] sm:$0xff]  }
 0x40c   : > { %v5415_v62 = vunpack.c.l.bf16 %v5414_v28  ;;  %v5416_v49 = vunpack.c.h.bf16 %v5414_v28  ;;  %v7382_v22 = vld [vmem:[#allocation53_spill] sm:$0xff] }
 0x40d   : > { %4001 = vmatmul.bf16.gmra.mxu2 %v3877_v60  ;;  %v3787_v23 = vadd.f32 %v3735_v10, %v2955_v52  ;;  %v2873_v15 = vadd.f32 %v7382_v22, %v2784_v1  ;;  %v3657_v10 = vpop.f32.mrf.mxu0  ;;  %v3746_v52 = vpop.f32.mrf.mxu1  ;;  %v5558_v22 = vld [vmem:[%s5713_s22 + $0x10] sm:$0xff]  }
 0x40f   : > { %v3823_v35 = vadd.f32 %v6903_v2, %v3787_v23  ;;  %v2962_v31 = vadd.f32 %v6958_v61, %v2873_v15 }
 0x410   : > { %v3558_v20 = vpop.f32.mrf.mxu3  ;;  %v3962_v32 = vpop.f32.mrf.mxu2 }
 0x411   : > { %v3648_v14 = vadd.f32 %v3647_v59, %v3558_v20  ;;  %v3963_v9 = vadd.f32 %v7080_v0, %v3962_v32  ;;  %v3855_v42 = vmax.f32 %v3823_v35, 0.0  ;;  %v7383_v32 = vld [vmem:[#allocation66_spill] sm:$0xff] }
 0x413   : > { %v3737_v46 = vadd.f32 %v3736_v39, %v3648_v14  ;;  %v4106_v54 = vadd.f32 %v5415_v62, %v3963_v9  ;;  %v5419_v14 = vunpack.c.l.bf16 %v5557_v21 }
 0x415   : > { %v3788_v18 = vadd.f32 %v3737_v46, %v2957_v24  ;;  %v4138_v37 = vmax.f32 %v4106_v54, 0.0  ;;  %v7384_v24 = vld [vmem:[#allocation30_spill] sm:$0xff]  ;;  %v3749_v54 = vpop.f32.mrf.mxu1 }
 0x416   : > { %v2787_v46 = vadd.f32 %v7384_v24, %v7383_v32  ;;  %v7392_v24 = vld [vmem:[#allocation71_spill] sm:$0xff] }
 0x417   : > { %v3824_v59 = vadd.f32 %v6903_v2, %v3788_v18  ;;  %v5420_v18 = vunpack.c.h.bf16 %v5557_v21 }
 0x418   : > { %v3561_v3 = vpop.f32.mrf.mxu3  ;;  %v3964_v11 = vpop.f32.mrf.mxu2  ;;  %v2876_v33 = vadd.f32 %v7385_v7, %v2787_v46  ;;  %v7393_v46 = vld [vmem:[#allocation37_spill] sm:$0xff] }
 0x419   : > { %v3651_v40 = vadd.f32 %v3650_v30, %v3561_v3  ;;  %v3856_v39 = vmax.f32 %v3824_v59, 0.0  ;;  %v3965_v29 = vadd.f32 %v7080_v0, %v3964_v11  ;;  %v7386_v59 = vld [vmem:[#allocation68_spill] sm:$0xff]  ;;  %v3660_v11 = vpop.f32.mrf.mxu0 }
 0x41a   : > { %v7387_v3 = vld [vmem:[#allocation32_spill] sm:$0xff]  ;;  %v2965_v27 = vadd.f32 %v6973_v47, %v2876_v33 }
 0x41b   : > { %v3878_v51 = vpack.c.bf16 %v3856_v39, %v3855_v42  ;;  %v4107_v53 = vadd.f32 %v5416_v49, %v3965_v29  ;;  %v3740_v38 = vadd.f32 %v3739_v5, %v3651_v40  ;;  %v2789_v49 = vadd.f32 %v7387_v3, %v7386_v59 }
 0x41d   : > { %4006 = vmatmul.bf16.gmra.mxu2 %v3878_v51  ;;  %v4139_v30 = vmax.f32 %v4107_v53, 0.0  ;;  %v3789_v57 = vadd.f32 %v3740_v38, %v2960_v50  ;;  %v2878_v26 = vadd.f32 %v7388_v41, %v2789_v49 }
 0x41f   : > { %v5480_v36 = vpack.c.bf16 %v4139_v30, %v4138_v37  ;;  %v3825_v20 = vadd.f32 %v6903_v2, %v3789_v57  ;;  %v2967_v37 = vadd.f32 %v6988_v19, %v2878_v26  ;;  %v7389_v57 = vld [vmem:[#allocation70_spill] sm:$0xff] }
 0x420   : > { %v3563_v16 = vpop.f32.mrf.mxu3  ;;  %v3967_v5 = vpop.f32.mrf.mxu2 }
 0x421   : > { %v3653_v60 = vadd.f32 %v3652_v55, %v3563_v16  ;;  %5481 = vst [vmem:[%s7100_s21] sm:$0xff] %v5480_v36   ;;  %v3968_v23 = vadd.f32 %v7080_v0, %v3967_v5  ;;  %v3857_v62 = vmax.f32 %v3825_v20, 0.0  ;;  %v3662_v50 = vpop.f32.mrf.mxu0  ;;  %v5423_v16 = vunpack.c.l.bf16 %v5558_v22 }
 0x423   : > { %v3742_v58 = vadd.f32 %v3741_v8, %v3653_v60  ;;  %v4108_v8 = vadd.f32 %v5419_v14, %v3968_v23  ;;  %v7390_v60 = vld [vmem:[#allocation35_spill] sm:$0xff]  ;;  %v7391_v14 = vld [vmem:[#allocation56_spill] sm:$0xff] }
 0x424   : > { %v2792_v47 = vadd.f32 %v7390_v60, %v7389_v57  ;;  %v7399_v57 = vld [vmem:[#allocation39_spill] sm:$0xff] }
 0x425   : > { %v3790_v45 = vadd.f32 %v3742_v58, %v2962_v31  ;;  %v3751_v31 = vpop.f32.mrf.mxu1  ;;  %v5424_v58 = vunpack.c.h.bf16 %v5558_v22 }
 0x426   : > { %v2881_v32 = vadd.f32 %v7391_v14, %v2792_v47 }
 0x427   : > { %v3826_v28 = vadd.f32 %v6903_v2, %v3790_v45 }
 0x428   : > { %v3566_v55 = vpop.f32.mrf.mxu3  ;;  %v3969_v9 = vpop.f32.mrf.mxu2 }
 0x429   : > { %v3656_v35 = vadd.f32 %v3655_v43, %v3566_v55  ;;  %v3858_v61 = vmax.f32 %v3826_v28, 0.0  ;;  %v3970_v44 = vadd.f32 %v7080_v0, %v3969_v9  ;;  %v4140_v43 = vmax.f32 %v4108_v8, 0.0  ;;  %v3665_v7 = vpop.f32.mrf.mxu0 }
 0x42a   : > { %v2794_v28 = vadd.f32 %v7393_v46, %v7392_v24 }
 0x42b   : > { %v3879_v40 = vpack.c.bf16 %v3858_v61, %v3857_v62  ;;  %v4109_v42 = vadd.f32 %v5420_v18, %v3970_v44  ;;  %v3745_v39 = vadd.f32 %v3744_v34, %v3656_v35  ;;  %v7394_v61 = vld [vmem:[#allocation57_spill] sm:$0xff]  ;;  %v2970_v44 = vadd.f32 %v7002_v12, %v2881_v32  ;;  %v7396_v12 = vld [vmem:[#allocation38_spill] sm:$0xff] }
 0x42c   : > { %v2883_v8 = vadd.f32 %v7394_v61, %v2794_v28 }
 0x42d   : > { %4011 = vmatmul.bf16.gmra.mxu2 %v3879_v40  ;;  %v4141_v29 = vmax.f32 %v4109_v42, 0.0  ;;  %v3791_v51 = vadd.f32 %v3745_v39, %v2965_v27  ;;  %v7395_v27 = vld [vmem:[#allocation72_spill] sm:$0xff] }
 0x42e   : > { %v2972_v42 = vadd.f32 %v7014_v13, %v2883_v8 }
 0x42f   : > { %v5485_v17 = vpack.c.bf16 %v4141_v29, %v4140_v43  ;;  %v3827_v34 = vadd.f32 %v6903_v2, %v3791_v51 }
 0x430   : > { %v3568_v1 = vpop.f32.mrf.mxu3  ;;  %v3972_v38 = vpop.f32.mrf.mxu2 }
 0x431   : > { %v3658_v53 = vadd.f32 %v3657_v10, %v3568_v1  ;;  %5572 = vst [vmem:[%s7100_s21 + $0x8] sm:$0xff] %v5485_v17   ;;  %v3973_v36 = vadd.f32 %v7080_v0, %v3972_v38  ;;  %v3859_v19 = vmax.f32 %v3827_v34, 0.0  ;;  %v2797_v17 = vadd.f32 %v7396_v12, %v7395_v27  ;;  %v3667_v13 = vpop.f32.mrf.mxu0 }
 0x433   : > { %v3747_v30 = vadd.f32 %v3746_v52, %v3658_v53  ;;  %v4110_v20 = vadd.f32 %v5423_v16, %v3973_v36  ;;  %v7398_v16 = vld [vmem:[#allocation73_spill] sm:$0xff] }
 0x434   : > { %v2799_v60 = vadd.f32 %v7399_v57, %v7398_v16 }
 0x435   : > { %v3792_v15 = vadd.f32 %v3747_v30, %v2967_v37  ;;  %v4142_v9 = vmax.f32 %v4110_v20, 0.0 }
 0x437   : > { %v3828_v5 = vadd.f32 %v6903_v2, %v3792_v15 }
 0x438   : > { %v3571_v10 = vpop.f32.mrf.mxu3  ;;  %v3974_v45 = vpop.f32.mrf.mxu2 }
 0x439   : > { %v3661_v21 = vadd.f32 %v3660_v11, %v3571_v10  ;;  %v3860_v52 = vmax.f32 %v3828_v5, 0.0  ;;  %v3975_v23 = vadd.f32 %v7080_v0, %v3974_v45  ;;  %v3754_v11 = vpop.f32.mrf.mxu1  ;;  %v7400_v45 = vld [vmem:[#allocation60_spill] sm:$0xff] }
 0x43b   : > { %v3880_v55 = vpack.c.bf16 %v3860_v52, %v3859_v19  ;;  %v4111_v18 = vadd.f32 %v5424_v58, %v3975_v23  ;;  %v3750_v35 = vadd.f32 %v3749_v54, %v3661_v21  ;;  %v5559_v54 = vld [vmem:[%s5713_s22 + $0x18] sm:$0xff]   ;;  %v2888_v19 = vadd.f32 %v7400_v45, %v2799_v60  ;;  %v5561_v60 = vld [vmem:[%s5713_s22 + $0x28] sm:$0xff]  }
 0x43c   : > { %v5427_v26 = vunpack.c.l.bf16 %v5559_v54  ;;  %v5428_v53 = vunpack.c.h.bf16 %v5559_v54  ;;  %v7403_v54 = vld [vmem:[#allocation62_spill] sm:$0xff] }
 0x43d   : > { %4016 = vmatmul.bf16.gmra.mxu2 %v3880_v55  ;;  %v4143_v62 = vmax.f32 %v4111_v18, 0.0  ;;  %v3793_v3 = vadd.f32 %v3750_v35, %v2970_v44  ;;  %v2977_v46 = vadd.f32 %v7035_v63, %v2888_v19  ;;  %v5560_v55 = vld [vmem:[%s5713_s22 + $0x20] sm:$0xff]   ;;  %v3670_v18 = vpop.f32.mrf.mxu0  ;;  %v7401_v44 = vld [vmem:[#allocation74_spill] sm:$0xff] }
 0x43e   : > { %v5431_v8 = vunpack.c.l.bf16 %v5560_v55 }
 0x43f   : > { %v5490_v33 = vpack.c.bf16 %v4143_v62, %v4142_v9  ;;  %v3829_v29 = vadd.f32 %v6903_v2, %v3793_v3  ;;  %v5432_v3 = vunpack.c.h.bf16 %v5560_v55  ;;  %v7409_v55 = vld [vmem:[#allocation67_spill] sm:$0xff] }
 0x440   : > { %v3573_v59 = vpop.f32.mrf.mxu3  ;;  %v3977_v40 = vpop.f32.mrf.mxu2 }
 0x441   : > { %v3663_v49 = vadd.f32 %v3662_v50, %v3573_v59  ;;  %5573 = vst [vmem:[%s7100_s21 + $0x10] sm:$0xff] %v5490_v33   ;;  %v3978_v41 = vadd.f32 %v7080_v0, %v3977_v40  ;;  %v3861_v30 = vmax.f32 %v3829_v29, 0.0  ;;  %v7397_v50 = vld [vmem:[#allocation58_spill] sm:$0xff]  ;;  %v3756_v5 = vpop.f32.mrf.mxu1  ;;  %v7404_v29 = vld [vmem:[#allocation75_spill] sm:$0xff] }
 0x442   : > { %v2886_v36 = vadd.f32 %v7397_v50, %v2797_v17 }
 0x443   : > { %v3752_v39 = vadd.f32 %v3751_v31, %v3663_v49  ;;  %v4112_v15 = vadd.f32 %v5427_v26, %v3978_v41  ;;  %v7405_v41 = vld [vmem:[#allocation42_spill] sm:$0xff] }
 0x444   : > { %v2975_v52 = vadd.f32 %v7023_v25, %v2886_v36  ;;  %v7402_v25 = vld [vmem:[#allocation40_spill] sm:$0xff]  ;;  %v2804_v26 = vadd.f32 %v7405_v41, %v7404_v29  ;;  %v5562_v41 = vld [vmem:[%s5713_s22 + $0x30] sm:$0xff]  }
 0x445   : > { %v3794_v43 = vadd.f32 %v3752_v39, %v2972_v42  ;;  %v4144_v58 = vmax.f32 %v4112_v15, 0.0 }
 0x447   : > { %v3830_v1 = vadd.f32 %v6903_v2, %v3794_v43 }
 0x448   : > { %v3576_v51 = vpop.f32.mrf.mxu3  ;;  %v3979_v37 = vpop.f32.mrf.mxu2 }
 0x449   : > { %v3666_v38 = vadd.f32 %v3665_v7, %v3576_v51  ;;  %v3862_v22 = vmax.f32 %v3830_v1, 0.0  ;;  %v3980_v34 = vadd.f32 %v7080_v0, %v3979_v37  ;;  %v3759_v62 = vpop.f32.mrf.mxu1  ;;  %v2802_v7 = vadd.f32 %v7402_v25, %v7401_v44  ;;  %v3672_v1 = vpop.f32.mrf.mxu0 }
 0x44b   : > { %v3881_v47 = vpack.c.bf16 %v3862_v22, %v3861_v30  ;;  %v4113_v31 = vadd.f32 %v5428_v53, %v3980_v34  ;;  %v3755_v10 = vadd.f32 %v3754_v11, %v3666_v38  ;;  %v2891_v43 = vadd.f32 %v7403_v54, %v2802_v7  ;;  %v7406_v38 = vld [vmem:[#allocation64_spill] sm:$0xff] }
 0x44c   : > { %v2893_v37 = vadd.f32 %v7406_v38, %v2804_v26 }
 0x44d   : > { %4021 = vmatmul.bf16.gmra.mxu2 %v3881_v47  ;;  %v4145_v21 = vmax.f32 %v4113_v31, 0.0  ;;  %v3795_v14 = vadd.f32 %v3755_v10, %v2975_v52  ;;  %v2980_v30 = vadd.f32 %v7044_v4, %v2891_v43  ;;  %v7408_v4 = vld [vmem:[#allocation44_spill] sm:$0xff] }
 0x44e   : > { %v2982_v16 = vadd.f32 %v7052_v6, %v2893_v37 }
 0x44f   : > { %v5495_v20 = vpack.c.bf16 %v4145_v21, %v4144_v58  ;;  %v3831_v9 = vadd.f32 %v6903_v2, %v3795_v14  ;;  %v5435_v58 = vunpack.c.l.bf16 %v5561_v60  ;;  %v7407_v21 = vld [vmem:[#allocation76_spill] sm:$0xff] }
 0x450   : > { %v3578_v23 = vpop.f32.mrf.mxu3  ;;  %v3982_v24 = vpop.f32.mrf.mxu2  ;;  %v2807_v45 = vadd.f32 %v7408_v4, %v7407_v21 }
 0x451   : > { %v3668_v32 = vadd.f32 %v3667_v13, %v3578_v23  ;;  %5574 = vst [vmem:[%s7100_s21 + $0x18] sm:$0xff] %v5495_v20   ;;  %v3983_v61 = vadd.f32 %v7080_v0, %v3982_v24  ;;  %v3863_v63 = vmax.f32 %v3831_v9, 0.0  ;;  %v3761_v22 = vpop.f32.mrf.mxu1  ;;  %v3675_v31 = vpop.f32.mrf.mxu0  ;;  %v5436_v23 = vunpack.c.h.bf16 %v5561_v60  ;;  %v7411_v9 = vld [vmem:[#allocation46_spill] sm:$0xff] }
 0x453   : > { %v3757_v28 = vadd.f32 %v3756_v5, %v3668_v32  ;;  %v4114_v42 = vadd.f32 %v5431_v8, %v3983_v61 }
 0x455   : > { %v3796_v35 = vadd.f32 %v3757_v28, %v2977_v46  ;;  %v4146_v51 = vmax.f32 %v4114_v42, 0.0 }
 0x457   : > { %v3832_v33 = vadd.f32 %v6903_v2, %v3796_v35  ;;  %v7410_v35 = vld [vmem:[#allocation77_spill] sm:$0xff] }
 0x458   : > { %v3581_v59 = vpop.f32.mrf.mxu3  ;;  %v3984_v40 = vpop.f32.mrf.mxu2 }
 0x459   : > { %v3671_v49 = vadd.f32 %v3670_v18, %v3581_v59  ;;  %v3864_v11 = vmax.f32 %v3832_v33, 0.0  ;;  %v3985_v39 = vadd.f32 %v7080_v0, %v3984_v40  ;;  %v3764_v52 = vpop.f32.mrf.mxu1  ;;  %v2896_v18 = vadd.f32 %v7409_v55, %v2807_v45  ;;  %v7412_v33 = vld [vmem:[#allocation69_spill] sm:$0xff] }
 0x45a   : > { %v5564_v45 = vld [vmem:[%s5713_s22 + $0x40] sm:$0xff]  }
 0x45b   : > { %v3882_v27 = vpack.c.bf16 %v3864_v11, %v3863_v63  ;;  %v4115_v12 = vadd.f32 %v5432_v3, %v3985_v39  ;;  %v3760_v17 = vadd.f32 %v3759_v62, %v3671_v49  ;;  %v2809_v62 = vadd.f32 %v7411_v9, %v7410_v35  ;;  %v3677_v49 = vpop.f32.mrf.mxu0 }
 0x45c   : > { %v2985_v3 = vadd.f32 %v7061_v56, %v2896_v18  ;;  %v5565_v18 = vld [vmem:[%s5713_s22 + $0x48] sm:$0xff]  }
 0x45d   : > { %4026 = vmatmul.bf16.gmra.mxu2 %v3882_v27  ;;  %v4147_v53 = vmax.f32 %v4115_v12, 0.0  ;;  %v3797_v34 = vadd.f32 %v3760_v17, %v2980_v30  ;;  %v2898_v59 = vadd.f32 %v7412_v33, %v2809_v62  ;;  %v5439_v17 = vunpack.c.l.bf16 %v5562_v41 }
 0x45e   : > { %v5451_v9 = vunpack.c.l.bf16 %v5565_v18  ;;  %v5452_v62 = vunpack.c.h.bf16 %v5565_v18 }
 0x45f   : > { %v5500_v13 = vpack.c.bf16 %v4147_v53, %v4146_v51  ;;  %v3833_v5 = vadd.f32 %v6903_v2, %v3797_v34  ;;  %v2987_v43 = vadd.f32 %v7070_v48, %v2898_v59 }
 0x460   : > { %v3583_v15 = vpop.f32.mrf.mxu3  ;;  %v3987_v36 = vpop.f32.mrf.mxu2 }
 0x461   : > { %v3673_v50 = vadd.f32 %v3672_v1, %v3583_v15  ;;  %5575 = vst [vmem:[%s7100_s21 + $0x20] sm:$0xff] %v5500_v13   ;;  %v3988_v10 = vadd.f32 %v7080_v0, %v3987_v36  ;;  %v3865_v6 = vmax.f32 %v3833_v5, 0.0  ;;  %v3766_v54 = vpop.f32.mrf.mxu1  ;;  %v5440_v1 = vunpack.c.h.bf16 %v5562_v41  ;;  %v5563_v36 = vld [vmem:[%s5713_s22 + $0x38] sm:$0xff]  }
 0x463   : > { %v3762_v57 = vadd.f32 %v3761_v22, %v3673_v50  ;;  %v4116_v46 = vadd.f32 %v5435_v58, %v3988_v10 }
 0x465   : > { %v3798_v47 = vadd.f32 %v3762_v57, %v2982_v16  ;;  %v4148_v25 = vmax.f32 %v4116_v46, 0.0  ;;  %v5443_v16 = vunpack.c.l.bf16 %v5563_v36  ;;  %v5444_v57 = vunpack.c.h.bf16 %v5563_v36 }
 0x467   : > { %v3834_v19 = vadd.f32 %v6903_v2, %v3798_v47 }
 0x468   : > { %v3586_v20 = vpop.f32.mrf.mxu3  ;;  %v3989_v32 = vpop.f32.mrf.mxu2 }
 0x469   : > { %v3676_v14 = vadd.f32 %v3675_v31, %v3586_v20  ;;  %v3866_v24 = vmax.f32 %v3834_v19, 0.0  ;;  %v3990_v28 = vadd.f32 %v7080_v0, %v3989_v32  ;;  %v5448_v20 = vunpack.c.h.bf16 %v5564_v45 }
 0x46b   : > { %v3883_v61 = vpack.c.bf16 %v3866_v24, %v3865_v6  ;;  %v4117_v8 = vadd.f32 %v5436_v23, %v3990_v28  ;;  %v3765_v44 = vadd.f32 %v3764_v52, %v3676_v14  ;;  %v5447_v52 = vunpack.c.l.bf16 %v5564_v45 }
 0x46d   : > { %4031 = vmatmul.bf16.gmra.mxu2 %v3883_v61  ;;  %v4149_v7 = vmax.f32 %v4117_v8, 0.0  ;;  %v3799_v11 = vadd.f32 %v3765_v44, %v2985_v3 }
 0x46f   : > { %v5505_v40 = vpack.c.bf16 %v4149_v7, %v4148_v25  ;;  %v3835_v27 = vadd.f32 %v6903_v2, %v3799_v11 }
 0x470   : > { %v3588_v63 = vpop.f32.mrf.mxu3  ;;  %v3992_v39 = vpop.f32.mrf.mxu2 }
 0x471   : > { %v3678_v42 = vadd.f32 %v3677_v49, %v3588_v63  ;;  %5576 = vst [vmem:[%s7100_s21 + $0x28] sm:$0xff] %v5505_v40   ;;  %v3993_v12 = vadd.f32 %v7080_v0, %v3992_v39  ;;  %v3867_v53 = vmax.f32 %v3835_v27, 0.0  ;;  %v5566_v49 = vld [vmem:[%s5713_s22 + $0x50] sm:$0xff]  }
 0x472   : > { %v5455_v63 = vunpack.c.l.bf16 %v5566_v49  ;;  %v5456_v11 = vunpack.c.h.bf16 %v5566_v49 }
 0x473   : > { %v3767_v29 = vadd.f32 %v3766_v54, %v3678_v42  ;;  %v4118_v37 = vadd.f32 %v5439_v17, %v3993_v12  ;;  %v5567_v12 = vld [vmem:[%s5713_s22 + $0x58] sm:$0xff]  }
 0x475   : > { %v3800_v26 = vadd.f32 %v3767_v29, %v2987_v43  ;;  %v4150_v13 = vmax.f32 %v4118_v37, 0.0 }
 0x477   : > { %v3836_v56 = vadd.f32 %v6903_v2, %v3800_v26 }
 0x478   : > { %v3994_v51 = vpop.f32.mrf.mxu2 }
 0x479   : > { %v3868_v38 = vmax.f32 %v3836_v56, 0.0  ;;  %v3995_v30 = vadd.f32 %v7080_v0, %v3994_v51  ;;  %v5459_v56 = vunpack.c.l.bf16 %v5567_v12 }
 0x47b   : > { %v3884_v48 = vpack.c.bf16 %v3868_v38, %v3867_v53  ;;  %v4119_v22 = vadd.f32 %v5440_v1, %v3995_v30  ;;  %v5460_v1 = vunpack.c.h.bf16 %v5567_v12 }
 0x47d   : > { %4036 = vmatmul.bf16.gmra.mxu2 %v3884_v48  ;;  %v4151_v15 = vmax.f32 %v4119_v22, 0.0 }
 0x47f   : > { %v5510_v34 = vpack.c.bf16 %v4151_v15, %v4150_v13  ;;  %v5568_v15 = vld [vmem:[%s5713_s22 + $0x60] sm:$0xff]  }
 0x480   : > { %v3997_v50 = vpop.f32.mrf.mxu2  ;;  %v5464_v36 = vunpack.c.h.bf16 %v5568_v15 }
 0x481   : > { %5577 = vst [vmem:[%s7100_s21 + $0x30] sm:$0xff] %v5510_v34   ;;  %v3998_v2 = vadd.f32 %v7080_v0, %v3997_v50  ;;  %v5463_v50 = vunpack.c.l.bf16 %v5568_v15 }
 0x483   : > { %v4120_v47 = vadd.f32 %v5443_v16, %v3998_v2 }
 0x485   : > { %v4152_v10 = vmax.f32 %v4120_v47, 0.0 }
 0x488   : > { %v3999_v60 = vpop.f32.mrf.mxu2 }
 0x489   : > { %v4000_v5 = vadd.f32 %v7080_v0, %v3999_v60 }
 0x48b   : > { %v4121_v31 = vadd.f32 %v5444_v57, %v4000_v5 }
 0x48d   : > { %v4153_v58 = vmax.f32 %v4121_v31, 0.0 }
 0x48f   : > { %v5515_v21 = vpack.c.bf16 %v4153_v58, %v4152_v10  ;;  %v5569_v58 = vld [vmem:[%s5713_s22 + $0x68] sm:$0xff]  }
 0x490   : > { %v4002_v4 = vpop.f32.mrf.mxu2  ;;  %v5468_v45 = vunpack.c.h.bf16 %v5569_v58 }
 0x491   : > { %5578 = vst [vmem:[%s7100_s21 + $0x38] sm:$0xff] %v5515_v21   ;;  %v4003_v19 = vadd.f32 %v7080_v0, %v4002_v4  ;;  %v5467_v4 = vunpack.c.l.bf16 %v5569_v58 }
 0x493   : > { %v4122_v14 = vadd.f32 %v5447_v52, %v4003_v19 }
 0x495   : > { %v4154_v24 = vmax.f32 %v4122_v14, 0.0 }
 0x498   : > { %v4004_v23 = vpop.f32.mrf.mxu2 }
 0x499   : > { %v4005_v32 = vadd.f32 %v7080_v0, %v4004_v23 }
 0x49b   : > { %v4123_v6 = vadd.f32 %v5448_v20, %v4005_v32 }
 0x49d   : > { %v4155_v46 = vmax.f32 %v4123_v6, 0.0 }
 0x49f   : > { %v5520_v28 = vpack.c.bf16 %v4155_v46, %v4154_v24  ;;  %v5570_v46 = vld [vmem:[%s5713_s22 + $0x70] sm:$0xff]  }
 0x4a0   : > { %v4007_v55 = vpop.f32.mrf.mxu2  ;;  %v5472_v18 = vunpack.c.h.bf16 %v5570_v46 }
 0x4a1   : > { %5579 = vst [vmem:[%s7100_s21 + $0x40] sm:$0xff] %v5520_v28   ;;  %v4008_v35 = vadd.f32 %v7080_v0, %v4007_v55  ;;  %v5471_v55 = vunpack.c.l.bf16 %v5570_v46 }
 0x4a3   : > { %v4124_v8 = vadd.f32 %v5451_v9, %v4008_v35 }
 0x4a5   : > { %v4156_v7 = vmax.f32 %v4124_v8, 0.0 }
 0x4a8   : > { %v4009_v61 = vpop.f32.mrf.mxu2 }
 0x4a9   : > { %v4010_v44 = vadd.f32 %v7080_v0, %v4009_v61 }
 0x4ab   : > { %v4125_v25 = vadd.f32 %v5452_v62, %v4010_v44 }
 0x4ad   : > { %v4157_v33 = vmax.f32 %v4125_v25, 0.0 }
 0x4af   : > { %v5525_v59 = vpack.c.bf16 %v4157_v33, %v4156_v7  ;;  %v5571_v33 = vld [vmem:[%s5713_s22 + $0x78] sm:$0xff]  }
 0x4b0   : > { %v4012_v3 = vpop.f32.mrf.mxu2  ;;  %v5476_v49 = vunpack.c.h.bf16 %v5571_v33 }
 0x4b1   : > { %5580 = vst [vmem:[%s7100_s21 + $0x48] sm:$0xff] %v5525_v59   ;;  %v4013_v40 = vadd.f32 %v7080_v0, %v4012_v3  ;;  %v5475_v3 = vunpack.c.l.bf16 %v5571_v33 }
 0x4b3   : > { %v4126_v39 = vadd.f32 %v5455_v63, %v4013_v40 }
 0x4b5   : > { %v4158_v29 = vmax.f32 %v4126_v39, 0.0 }
 0x4b8   : > { %v4014_v42 = vpop.f32.mrf.mxu2 }
 0x4b9   : > { %v4015_v54 = vadd.f32 %v7080_v0, %v4014_v42 }
 0x4bb   : > { %v4127_v43 = vadd.f32 %v5456_v11, %v4015_v54 }
 0x4bd   : > { %v4159_v41 = vmax.f32 %v4127_v43, 0.0 }
 0x4bf   : > { %v5530_v26 = vpack.c.bf16 %v4159_v41, %v4158_v29 }
 0x4c0   : > { %v4017_v27 = vpop.f32.mrf.mxu2 }
 0x4c1   : > { %5581 = vst [vmem:[%s7100_s21 + $0x50] sm:$0xff] %v5530_v26   ;;  %v4018_v17 = vadd.f32 %v7080_v0, %v4017_v27 }
 0x4c3   : > { %v4128_v53 = vadd.f32 %v5459_v56, %v4018_v17 }
 0x4c5   : > { %v4160_v30 = vmax.f32 %v4128_v53, 0.0 }
 0x4c8   : > { %v4019_v51 = vpop.f32.mrf.mxu2 }
 0x4c9   : > { %v4020_v38 = vadd.f32 %v7080_v0, %v4019_v51 }
 0x4cb   : > { %v4129_v37 = vadd.f32 %v5460_v1, %v4020_v38 }
 0x4cd   : > { %v4161_v48 = vmax.f32 %v4129_v37, 0.0 }
 0x4cf   : > { %v5535_v22 = vpack.c.bf16 %v4161_v48, %v4160_v30 }
 0x4d0   : > { %v4022_v13 = vpop.f32.mrf.mxu2 }
 0x4d1   : > { %5582 = vst [vmem:[%s7100_s21 + $0x58] sm:$0xff] %v5535_v22   ;;  %v4023_v34 = vadd.f32 %v7080_v0, %v4022_v13 }
 0x4d3   : > { %v4130_v16 = vadd.f32 %v5463_v50, %v4023_v34 }
 0x4d5   : > { %v4162_v47 = vmax.f32 %v4130_v16, 0.0 }
 0x4d8   : > { %v4024_v2 = vpop.f32.mrf.mxu2 }
 0x4d9   : > { %v4025_v57 = vadd.f32 %v7080_v0, %v4024_v2 }
 0x4db   : > { %v4131_v60 = vadd.f32 %v5464_v36, %v4025_v57 }
 0x4dd   : > { %v4163_v5 = vmax.f32 %v4131_v60, 0.0 }
 0x4df   : > { %v5540_v31 = vpack.c.bf16 %v4163_v5, %v4162_v47 }
 0x4e0   : > { %v4027_v10 = vpop.f32.mrf.mxu2 }
 0x4e1   : > { %5583 = vst [vmem:[%s7100_s21 + $0x60] sm:$0xff] %v5540_v31   ;;  %v4028_v21 = vadd.f32 %v7080_v0, %v4027_v10 }
 0x4e3   : > { %v4132_v52 = vadd.f32 %v5467_v4, %v4028_v21 }
 0x4e5   : > { %v4164_v14 = vmax.f32 %v4132_v52, 0.0 }
 0x4e8   : > { %v4029_v19 = vpop.f32.mrf.mxu2 }
 0x4e9   : > { %v4030_v20 = vadd.f32 %v7080_v0, %v4029_v19 }
 0x4eb   : > { %v4133_v23 = vadd.f32 %v5468_v45, %v4030_v20 }
 0x4ed   : > { %v4165_v32 = vmax.f32 %v4133_v23, 0.0 }
 0x4ef   : > { %v5545_v6 = vpack.c.bf16 %v4165_v32, %v4164_v14 }
 0x4f0   : > { %v4032_v24 = vpop.f32.mrf.mxu2 }
 0x4f1   : > { %5584 = vst [vmem:[%s7100_s21 + $0x68] sm:$0xff] %v5545_v6   ;;  %v4033_v28 = vadd.f32 %v7080_v0, %v4032_v24 }
 0x4f3   : > { %v4134_v9 = vadd.f32 %v5471_v55, %v4033_v28 }
 0x4f5   : > { %v4166_v8 = vmax.f32 %v4134_v9, 0.0 }
 0x4f8   : > { %v4034_v35 = vpop.f32.mrf.mxu2 }
 0x4f9   : > { %v4035_v62 = vadd.f32 %v7080_v0, %v4034_v35 }
 0x4fb   : > { %v4135_v61 = vadd.f32 %v5472_v18, %v4035_v62 }
 0x4fd   : > { %v4167_v44 = vmax.f32 %v4135_v61, 0.0 }
 0x4ff   : > { %v5550_v25 = vpack.c.bf16 %v4167_v44, %v4166_v8 }
 0x500   : > { %v4037_v7 = vpop.f32.mrf.mxu2 }
 0x501   : > { %5585 = vst [vmem:[%s7100_s21 + $0x70] sm:$0xff] %v5550_v25   ;;  %v4038_v59 = vadd.f32 %v7080_v0, %v4037_v7 }
 0x503   : > { %v4136_v63 = vadd.f32 %v5475_v3, %v4038_v59 }
 0x505   : > { %v4168_v39 = vmax.f32 %v4136_v63, 0.0 }
 0x508   : > { %v4039_v40 = vpop.f32.mrf.mxu2 }
 0x509   : > { %v4040_v11 = vadd.f32 %v7080_v0, %v4039_v40 }
 0x50b   : > { %v4137_v42 = vadd.f32 %v5476_v49, %v4040_v11 }
 0x50d   : > { %v4169_v54 = vmax.f32 %v4137_v42, 0.0 }
 0x50f   : > { %v5555_v43 = vpack.c.bf16 %v4169_v54, %v4168_v39 }
 0x511   : > { %5586 = vst [vmem:[%s7100_s21 + $0x78] sm:$0xff] %v5555_v43  }
 0x512 PF: > { %s17_s24 = sadd.s32 1, %s5630_s24  }
 0x513   : > { %p14_p4 = scmp.ge.s32.totalorder %s17_s24, 4  }
 0x515   :  { %16 = sbr.rel (!%p14_p4) target bundleno = 1 (0x1), region = 80 }

</bundles_post_ra>
